<compile_context>
chip_gen: v7x
topology: tpu7x:2x2x1
jax: 0.10.0
libtpu: 0.0.40
codegen_flags: <defaults>
</compile_context>

<pallas_src>
import functools
import math

import jax
import jax.numpy as jnp
import numpy as np
from jax import lax
from jax.experimental import pallas as pl
from jax.experimental.pallas import tpu as pltpu


# ------------------------- fused ASGCP forward kernel ------------------------
def asgcp_kernel(seq_ref, wih_ref, whh_ref, bih_ref, bhh_ref, wkq_ref,
                 ws_ref, xs_ref, wcat_ref, o_ref, *, batch, c_in, c_out, cs):
    f32 = jnp.float32
    B = batch
    H = whh_ref.shape[0]            # hidden size == num_nodes
    N = H
    S = seq_ref.shape[0] // B       # GRU sequence length == num_nodes
    BT = xs_ref.shape[1] // c_in

    # ------------------- phase 1: GRU over the node sequence -----------------
    # Hoisted input projection for ALL steps in one MXU op (h-independent).
    proj = jnp.dot(seq_ref[...], wih_ref[...],
                   preferred_element_type=f32) + bih_ref[...]        # [S*B, 3H]
    whh = whh_ref[...]
    bhh = bhh_ref[...]

    h = jnp.zeros((B, H), f32)
    key = jnp.zeros((B, H), f32)
    query = jnp.zeros((B, H), f32)
    # S (= num_nodes) is small: a fully-unrolled static loop, equivalent to
    # lax.fori_loop(..., unroll=True) after tracing.
    for t in range(S):
        gi = proj[t * B:(t + 1) * B, :]                               # [B, 3H]
        gh = jnp.dot(h, whh, preferred_element_type=f32) + bhh        # [B, 3H]
        r = jax.nn.sigmoid(gi[:, 0:H] + gh[:, 0:H])
        z = jax.nn.sigmoid(gi[:, H:2 * H] + gh[:, H:2 * H])
        n = jnp.tanh(gi[:, 2 * H:3 * H] + r * gh[:, 2 * H:3 * H])
        h = (1.0 - z) * n + z * h
        # attention key/query as running scalar-weighted reductions:
        #   key[b, i] = sum_t wk[t] * h_t[b, i]  (== gru_out^T @ wk)
        key = key + wkq_ref[t] * h
        query = query + wkq_ref[S + t] * h

    # --------- phase 2: self graph attention (vectorized over batch) ---------
    data = key[:, :, None] + query[:, None, :]                        # [B, H, H]
    data = jnp.where(data >= 0.0, data, 0.01 * data)                  # leaky_relu
    m = jnp.max(data, axis=2, keepdims=True)
    e = jnp.exp(data - m)
    att = e * pl.reciprocal(jnp.sum(e, axis=2, keepdims=True), approx=True)
    att_m = jnp.mean(att, axis=0)                                     # [H, H]
    # TODO(synk): dropout on att_m skipped (inference semantics).

    # ------------------- phase 3: normalized ASGC Laplacian ------------------
    rows = lax.broadcasted_iota(jnp.int32, (N, N), 0)
    cols = lax.broadcasted_iota(jnp.int32, (N, N), 1)
    eye = (rows == cols).astype(f32)
    degree = jnp.sum(att_m, axis=1, keepdims=True)                    # [N, 1]
    adj = 0.5 * (att_m + att_m.T)
    dinv = pl.reciprocal(jnp.sqrt(degree) + 1e-7, approx=True)
    lap_asgc = dinv * (eye * degree - adj) * dinv.T                   # [N, N]

    # ------------- phase 4: fused two-branch Chebyshev convolution -----------
    def cheb_mats(L):
        # T_1 .. T_{cs-1} in f32 (the T0 == I term needs no matmul).
        mats = [L]
        if cs >= 3:
            tk = 2.0 * jnp.dot(L, L, preferred_element_type=f32) - eye
            for k in range(2, cs):
                mats.append(tk)
                if k + 1 < cs:
                    # NOTE: tk_prev intentionally stays == L (reference bug).
                    tk = 2.0 * jnp.dot(L, tk, preferred_element_type=f32) - L
        return mats

    tstack = jnp.concatenate(cheb_mats(ws_ref[...]) + cheb_mats(lap_asgc),
                             axis=0)                                  # [2(cs-1)N, N]
    xs = xs_ref[...]                                                  # bf16 slab
    # ONE MXU op for every non-identity T_k · X (bf16 operands, f32 accumulate).
    ystack = jnp.dot(tstack.astype(jnp.bfloat16), xs,
                     preferred_element_type=f32)                      # [2(cs-1)N, BT*c_in]

    # Channel mix + sum over (branch, k) as ONE batched matmul over nodes:
    #   out[n, bt, co] = sum_q ycat[n, bt, q] * wcat[q, co],  q = (term, ci).
    pieces = [xs.astype(f32).reshape(N, BT, c_in)]                    # identity term
    for i in range(2 * (cs - 1)):
        pieces.append(ystack[i * N:(i + 1) * N, :].reshape(N, BT, c_in))
    ycat = jnp.concatenate(pieces, axis=2)                            # [N, BT, (2cs-1)c_in]
    wb = jnp.broadcast_to(wcat_ref[...], (N,) + wcat_ref.shape)       # [N, (2cs-1)c_in, c_out]
    out3 = jnp.einsum('nbk,nko->nbo', ycat, wb,
                      preferred_element_type=f32)                     # [N, BT, c_out]
    o_ref[...] = out3.reshape(N, BT * c_out)                          # lane-dense slab


def run_asgcp(seq2d, wih, whh, bih, bhh, wkq_flat, ws, xs, wcat,
              *, batch, c_in, c_out, cs):
    N = whh.shape[0]
    BT = xs.shape[1] // c_in
    vm = pltpu.MemorySpace.VMEM
    kern = functools.partial(asgcp_kernel, batch=batch, c_in=c_in,
                             c_out=c_out, cs=cs)
    return pl.pallas_call(
        kern,
        out_shape=jax.ShapeDtypeStruct((N, BT * c_out), jnp.float32),
        in_specs=[
            pl.BlockSpec(memory_space=vm),                        # seq2d  [N*B, T]
            pl.BlockSpec(memory_space=vm),                        # wih    [T, 3H]
            pl.BlockSpec(memory_space=vm),                        # whh    [H, 3H]
            pl.BlockSpec(memory_space=vm),                        # bih    [1, 3H]
            pl.BlockSpec(memory_space=vm),                        # bhh    [1, 3H]
            pl.BlockSpec(memory_space=pltpu.MemorySpace.SMEM),    # wkq    [2N] scalars
            pl.BlockSpec(memory_space=vm),                        # ws     [N, N]
            pl.BlockSpec(memory_space=vm),                        # xs     [N, BT*c_in] bf16
            pl.BlockSpec(memory_space=vm),                        # wcat   [(2cs-1)c_in, c_out]
        ],
        out_specs=pl.BlockSpec(memory_space=vm),
    )(seq2d, wih, whh, bih, bhh, wkq_flat, ws, xs, wcat)


# -------------------------------- forward pass -------------------------------
def asgcp_forward(x, params):
    B, T, N, c_in = x.shape
    cs, _, c_out = params["ts_sgc"].shape
    BT = B * T

    # GRU node-sequence input: rows ordered (node, batch), features = time.
    seq2d = jnp.transpose(x[:, :, :, 0], (2, 0, 1)).reshape(N * B, T)

    # Graph-signal slab: node axis on sublanes, (b, t, c) lane-dense; bf16 MXU.
    xs = jnp.transpose(x, (2, 0, 1, 3)).reshape(N, BT * c_in).astype(jnp.bfloat16)

    # Concatenated channel-mix weights, matching the in-kernel term order:
    #   [identity (W_sgc0 + W_asgc0), sgc_1..sgc_{cs-1}, asgc_1..asgc_{cs-1}].
    wcat = jnp.concatenate(
        [params["ts_sgc"][0] + params["ts_asgc"][0]]
        + [params["ts_sgc"][k] for k in range(1, cs)]
        + [params["ts_asgc"][k] for k in range(1, cs)], axis=0)

    wkq_flat = params["wkq"].reshape(2 * N)   # [0:N] = wk, [N:2N] = wq

    out_slab = run_asgcp(seq2d, params["gru_wih"], params["gru_whh"],
                         params["gru_bih"], params["gru_bhh"], wkq_flat,
                         params["ws"], xs, wcat,
                         batch=B, c_in=c_in, c_out=c_out, cs=cs)       # [N, BT*c_out]

    out = out_slab.reshape(N, B, T, c_out).transpose(1, 2, 0, 3)       # [B, T, N, c_out]
    return out


# --------------------------------- parameters --------------------------------
def init_params(key, N, c_in, c_out, cs, T):
    keys = jax.random.split(key, 8)

    def uni(k, shape, std):
        return jax.random.uniform(k, shape, jnp.float32, -std, std)

    std_ts = 0.1 / math.sqrt(c_in)   # ts.size(1) == c_in
    std_w = 0.1 / math.sqrt(1.0)     # wq/wk .size(1) == 1
    std_ws = 0.1 / math.sqrt(N)      # ws.size(1) == N (learnable_l=True)
    std_gru = 1.0 / math.sqrt(N)     # PyTorch GRU default init
    return dict(
        ws=uni(keys[0], (N, N), std_ws),
        ts_sgc=uni(keys[1], (cs, c_in, c_out), std_ts),
        ts_asgc=uni(keys[2], (cs, c_in, c_out), std_ts),
        wkq=uni(keys[3], (2, N), std_w),            # row 0 = wk, row 1 = wq
        gru_wih=uni(keys[4], (T, 3 * N), std_gru),  # fused W_ih^T, gates r|z|n
        gru_whh=uni(keys[5], (N, 3 * N), std_gru),  # fused W_hh^T, gates r|z|n
        gru_bih=uni(keys[6], (1, 3 * N), std_gru),
        gru_bhh=uni(keys[7], (1, 3 * N), std_gru),
    )


# ---------------------------- pure-JAX reference -----------------------------
def _cheb_ref(L, x, w, cs, t0):
    out = jnp.matmul(jnp.matmul(t0, x), w[0])
    out = out + jnp.matmul(jnp.matmul(L, x), w[1])
    tk_prev = L
    tk = 2.0 * jnp.matmul(L, L) - t0
    for k in range(2, cs):
        out = out + jnp.matmul(jnp.matmul(tk, x), w[k])
        tk = 2.0 * jnp.matmul(L, tk) - tk_prev
    return out


def asgcp_reference(x, params):
    B, T, N, c_in = x.shape
    cs = params["ts_sgc"].shape[0]
    t0 = jnp.eye(N, dtype=jnp.float32)
    out_sgc = _cheb_ref(params["ws"], x, params["ts_sgc"], cs, t0)

    xg = x[:, :, :, 0]
    seq = jnp.transpose(xg, (2, 0, 1))           # [S, B, I]
    wih, whh = params["gru_wih"], params["gru_whh"]
    bih, bhh = params["gru_bih"], params["gru_bhh"]
    H = whh.shape[0]

    def step(h, xt):
        gi = xt @ wih + bih
        gh = h @ whh + bhh
        r = jax.nn.sigmoid(gi[:, :H] + gh[:, :H])
        z = jax.nn.sigmoid(gi[:, H:2 * H] + gh[:, H:2 * H])
        n = jnp.tanh(gi[:, 2 * H:] + r * gh[:, 2 * H:])
        h_new = (1.0 - z) * n + z * h
        return h_new, h_new

    h0 = jnp.zeros((B, H), jnp.float32)
    _, gru_out = lax.scan(step, h0, seq)         # [S, B, H]
    xa = jnp.transpose(gru_out, (1, 2, 0))       # [B, H, S]
    key = xa @ params["wkq"][0][:, None]
    query = xa @ params["wkq"][1][:, None]
    data = key + jnp.transpose(query, (0, 2, 1))
    data = jnp.where(data >= 0, data, 0.01 * data)
    att = jax.nn.softmax(data, axis=2)
    att_m = jnp.mean(att, axis=0)
    degree = jnp.sum(att_m, axis=1)
    adj = 0.5 * (att_m + att_m.T)
    dinv = 1.0 / (jnp.sqrt(degree) + 1e-7)
    lap = jnp.diag(dinv) @ (jnp.diag(degree) - adj) @ jnp.diag(dinv)
    out_asgc = _cheb_ref(lap, x, params["ts_asgc"], cs, t0)
    return out_sgc + out_asgc


# ------------------------------------ main ------------------------------------
if __name__ == "__main__":
    # time_steps must be 12 (GRU input_size is hard-coded to 12 in the module).
    B, T, N, c_in, c_out, cs = 2, 12, 8, 4, 4, 3
    root = jax.random.PRNGKey(0)
    kx, kp = jax.random.split(root)
    x = jax.random.normal(kx, (B, T, N, c_in), jnp.float32)
    params = init_params(kp, N, c_in, c_out, cs, T)

    out = jax.jit(asgcp_forward)(x, params)
    out = jax.block_until_ready(out)
    assert out.shape == (B, T, N, c_out)

    ref = asgcp_reference(x, params)
    np.testing.assert_allclose(np.asarray(out), np.asarray(ref), rtol=1e-2, atol=1e-2)
    print("KERNEL_OK")
</pallas_src>

<mosaic_0001>
module attributes {stable_mosaic.version = 11 : i64} {
  func.func @asgcp_kernel(%arg0: memref<16x12xf32, #tpu.memory_space<vmem>>, %arg1: memref<12x24xf32, #tpu.memory_space<vmem>>, %arg2: memref<8x24xf32, #tpu.memory_space<vmem>>, %arg3: memref<1x24xf32, #tpu.memory_space<vmem>>, %arg4: memref<1x24xf32, #tpu.memory_space<vmem>>, %arg5: memref<16xf32, #tpu.memory_space<smem>>, %arg6: memref<8x8xf32, #tpu.memory_space<vmem>>, %arg7: memref<8x96xbf16, #tpu.memory_space<vmem>>, %arg8: memref<20x4xf32, #tpu.memory_space<vmem>>, %arg9: memref<8x96xf32, #tpu.memory_space<vmem>>) attributes {dimension_semantics = [], scalar_prefetch = 0 : i64, scratch_operands = 0 : i64, tpu.core_type = #tpu.core_type<tc>} {
    %c0 = arith.constant 0 : index
    %c0_0 = arith.constant 0 : index
    %0 = vector.load %arg0[%c0, %c0_0] : memref<16x12xf32, #tpu.memory_space<vmem>>, vector<16x12xf32>
    %c0_1 = arith.constant 0 : index
    %c0_2 = arith.constant 0 : index
    %1 = vector.load %arg1[%c0_1, %c0_2] : memref<12x24xf32, #tpu.memory_space<vmem>>, vector<12x24xf32>
    %cst = arith.constant dense<0.000000e+00> : vector<16x24xf32>
    %2 = tpu.matmul %0, %1, %cst {dimension_numbers = #tpu.dot_dimension_numbers<[1], [0], [0], [1], [0, 0, 1, 1], [], []>} : vector<16x12xf32>, vector<12x24xf32>, vector<16x24xf32> -> vector<16x24xf32>
    %c0_3 = arith.constant 0 : index
    %c0_4 = arith.constant 0 : index
    %3 = vector.load %arg3[%c0_3, %c0_4] : memref<1x24xf32, #tpu.memory_space<vmem>>, vector<1x24xf32>
    %4 = vector.broadcast %3 : vector<1x24xf32> to vector<16x24xf32>
    %5 = arith.addf %2, %4 : vector<16x24xf32>
    %c0_5 = arith.constant 0 : index
    %c0_6 = arith.constant 0 : index
    %6 = vector.load %arg2[%c0_5, %c0_6] : memref<8x24xf32, #tpu.memory_space<vmem>>, vector<8x24xf32>
    %c0_7 = arith.constant 0 : index
    %c0_8 = arith.constant 0 : index
    %7 = vector.load %arg4[%c0_7, %c0_8] : memref<1x24xf32, #tpu.memory_space<vmem>>, vector<1x24xf32>
    %cst_9 = arith.constant 0.000000e+00 : f32
    %8 = vector.broadcast %cst_9 : f32 to vector<2x8xf32>
    %cst_10 = arith.constant 0.000000e+00 : f32
    %9 = vector.broadcast %cst_10 : f32 to vector<2x8xf32>
    %cst_11 = arith.constant 0.000000e+00 : f32
    %10 = vector.broadcast %cst_11 : f32 to vector<2x8xf32>
    %11 = vector.extract_strided_slice %5 {offsets = [0, 0], sizes = [2, 24], strides = [1, 1]} : vector<16x24xf32> to vector<2x24xf32>
    %cst_12 = arith.constant dense<0.000000e+00> : vector<2x24xf32>
    %12 = tpu.matmul %8, %6, %cst_12 {dimension_numbers = #tpu.dot_dimension_numbers<[1], [0], [0], [1], [0, 0, 1, 1], [], []>} : vector<2x8xf32>, vector<8x24xf32>, vector<2x24xf32> -> vector<2x24xf32>
    %13 = vector.broadcast %7 : vector<1x24xf32> to vector<2x24xf32>
    %14 = arith.addf %12, %13 : vector<2x24xf32>
    %15 = vector.extract_strided_slice %11 {offsets = [0, 0], sizes = [2, 8], strides = [1, 1]} : vector<2x24xf32> to vector<2x8xf32>
    %16 = vector.extract_strided_slice %14 {offsets = [0, 0], sizes = [2, 8], strides = [1, 1]} : vector<2x24xf32> to vector<2x8xf32>
    %17 = arith.addf %15, %16 : vector<2x8xf32>
    %18 = arith.negf %17 : vector<2x8xf32>
    %19 = math.exp %18 : vector<2x8xf32>
    %cst_13 = arith.constant 1.000000e+00 : f32
    %20 = vector.broadcast %cst_13 : f32 to vector<2x8xf32>
    %21 = arith.addf %20, %19 : vector<2x8xf32>
    %22 = arith.divf %20, %21 : vector<2x8xf32>
    %23 = vector.extract_strided_slice %11 {offsets = [0, 8], sizes = [2, 8], strides = [1, 1]} : vector<2x24xf32> to vector<2x8xf32>
    %24 = vector.extract_strided_slice %14 {offsets = [0, 8], sizes = [2, 8], strides = [1, 1]} : vector<2x24xf32> to vector<2x8xf32>
    %25 = arith.addf %23, %24 : vector<2x8xf32>
    %26 = arith.negf %25 : vector<2x8xf32>
    %27 = math.exp %26 : vector<2x8xf32>
    %cst_14 = arith.constant 1.000000e+00 : f32
    %28 = vector.broadcast %cst_14 : f32 to vector<2x8xf32>
    %29 = arith.addf %28, %27 : vector<2x8xf32>
    %30 = arith.divf %28, %29 : vector<2x8xf32>
    %31 = vector.extract_strided_slice %11 {offsets = [0, 16], sizes = [2, 8], strides = [1, 1]} : vector<2x24xf32> to vector<2x8xf32>
    %32 = vector.extract_strided_slice %14 {offsets = [0, 16], sizes = [2, 8], strides = [1, 1]} : vector<2x24xf32> to vector<2x8xf32>
    %33 = arith.mulf %22, %32 : vector<2x8xf32>
    %34 = arith.addf %31, %33 : vector<2x8xf32>
    %35 = math.tanh %34 : vector<2x8xf32>
    %cst_15 = arith.constant 1.000000e+00 : f32
    %36 = vector.broadcast %cst_15 : f32 to vector<2x8xf32>
    %37 = arith.subf %36, %30 : vector<2x8xf32>
    %38 = arith.mulf %37, %35 : vector<2x8xf32>
    %39 = arith.mulf %30, %8 : vector<2x8xf32>
    %40 = arith.addf %38, %39 : vector<2x8xf32>
    %c0_16 = arith.constant 0 : index
    %41 = memref.load %arg5[%c0_16] : memref<16xf32, #tpu.memory_space<smem>>
    %42 = vector.broadcast %41 : f32 to vector<2x8xf32>
    %43 = arith.mulf %42, %40 : vector<2x8xf32>
    %44 = arith.addf %9, %43 : vector<2x8xf32>
    %c8 = arith.constant 8 : index
    %45 = memref.load %arg5[%c8] : memref<16xf32, #tpu.memory_space<smem>>
    %46 = vector.broadcast %45 : f32 to vector<2x8xf32>
    %47 = arith.mulf %46, %40 : vector<2x8xf32>
    %48 = arith.addf %10, %47 : vector<2x8xf32>
    %49 = vector.extract_strided_slice %5 {offsets = [2, 0], sizes = [2, 24], strides = [1, 1]} : vector<16x24xf32> to vector<2x24xf32>
    %cst_17 = arith.constant dense<0.000000e+00> : vector<2x24xf32>
    %50 = tpu.matmul %40, %6, %cst_17 {dimension_numbers = #tpu.dot_dimension_numbers<[1], [0], [0], [1], [0, 0, 1, 1], [], []>} : vector<2x8xf32>, vector<8x24xf32>, vector<2x24xf32> -> vector<2x24xf32>
    %51 = vector.broadcast %7 : vector<1x24xf32> to vector<2x24xf32>
    %52 = arith.addf %50, %51 : vector<2x24xf32>
    %53 = vector.extract_strided_slice %49 {offsets = [0, 0], sizes = [2, 8], strides = [1, 1]} : vector<2x24xf32> to vector<2x8xf32>
    %54 = vector.extract_strided_slice %52 {offsets = [0, 0], sizes = [2, 8], strides = [1, 1]} : vector<2x24xf32> to vector<2x8xf32>
    %55 = arith.addf %53, %54 : vector<2x8xf32>
    %56 = arith.negf %55 : vector<2x8xf32>
    %57 = math.exp %56 : vector<2x8xf32>
    %cst_18 = arith.constant 1.000000e+00 : f32
    %58 = vector.broadcast %cst_18 : f32 to vector<2x8xf32>
    %59 = arith.addf %58, %57 : vector<2x8xf32>
    %60 = arith.divf %58, %59 : vector<2x8xf32>
    %61 = vector.extract_strided_slice %49 {offsets = [0, 8], sizes = [2, 8], strides = [1, 1]} : vector<2x24xf32> to vector<2x8xf32>
    %62 = vector.extract_strided_slice %52 {offsets = [0, 8], sizes = [2, 8], strides = [1, 1]} : vector<2x24xf32> to vector<2x8xf32>
    %63 = arith.addf %61, %62 : vector<2x8xf32>
    %64 = arith.negf %63 : vector<2x8xf32>
    %65 = math.exp %64 : vector<2x8xf32>
    %cst_19 = arith.constant 1.000000e+00 : f32
    %66 = vector.broadcast %cst_19 : f32 to vector<2x8xf32>
    %67 = arith.addf %66, %65 : vector<2x8xf32>
    %68 = arith.divf %66, %67 : vector<2x8xf32>
    %69 = vector.extract_strided_slice %49 {offsets = [0, 16], sizes = [2, 8], strides = [1, 1]} : vector<2x24xf32> to vector<2x8xf32>
    %70 = vector.extract_strided_slice %52 {offsets = [0, 16], sizes = [2, 8], strides = [1, 1]} : vector<2x24xf32> to vector<2x8xf32>
    %71 = arith.mulf %60, %70 : vector<2x8xf32>
    %72 = arith.addf %69, %71 : vector<2x8xf32>
    %73 = math.tanh %72 : vector<2x8xf32>
    %cst_20 = arith.constant 1.000000e+00 : f32
    %74 = vector.broadcast %cst_20 : f32 to vector<2x8xf32>
    %75 = arith.subf %74, %68 : vector<2x8xf32>
    %76 = arith.mulf %75, %73 : vector<2x8xf32>
    %77 = arith.mulf %68, %40 : vector<2x8xf32>
    %78 = arith.addf %76, %77 : vector<2x8xf32>
    %c1 = arith.constant 1 : index
    %79 = memref.load %arg5[%c1] : memref<16xf32, #tpu.memory_space<smem>>
    %80 = vector.broadcast %79 : f32 to vector<2x8xf32>
    %81 = arith.mulf %80, %78 : vector<2x8xf32>
    %82 = arith.addf %44, %81 : vector<2x8xf32>
    %c9 = arith.constant 9 : index
    %83 = memref.load %arg5[%c9] : memref<16xf32, #tpu.memory_space<smem>>
    %84 = vector.broadcast %83 : f32 to vector<2x8xf32>
    %85 = arith.mulf %84, %78 : vector<2x8xf32>
    %86 = arith.addf %48, %85 : vector<2x8xf32>
    %87 = vector.extract_strided_slice %5 {offsets = [4, 0], sizes = [2, 24], strides = [1, 1]} : vector<16x24xf32> to vector<2x24xf32>
    %cst_21 = arith.constant dense<0.000000e+00> : vector<2x24xf32>
    %88 = tpu.matmul %78, %6, %cst_21 {dimension_numbers = #tpu.dot_dimension_numbers<[1], [0], [0], [1], [0, 0, 1, 1], [], []>} : vector<2x8xf32>, vector<8x24xf32>, vector<2x24xf32> -> vector<2x24xf32>
    %89 = vector.broadcast %7 : vector<1x24xf32> to vector<2x24xf32>
    %90 = arith.addf %88, %89 : vector<2x24xf32>
    %91 = vector.extract_strided_slice %87 {offsets = [0, 0], sizes = [2, 8], strides = [1, 1]} : vector<2x24xf32> to vector<2x8xf32>
    %92 = vector.extract_strided_slice %90 {offsets = [0, 0], sizes = [2, 8], strides = [1, 1]} : vector<2x24xf32> to vector<2x8xf32>
    %93 = arith.addf %91, %92 : vector<2x8xf32>
    %94 = arith.negf %93 : vector<2x8xf32>
    %95 = math.exp %94 : vector<2x8xf32>
    %cst_22 = arith.constant 1.000000e+00 : f32
    %96 = vector.broadcast %cst_22 : f32 to vector<2x8xf32>
    %97 = arith.addf %96, %95 : vector<2x8xf32>
    %98 = arith.divf %96, %97 : vector<2x8xf32>
    %99 = vector.extract_strided_slice %87 {offsets = [0, 8], sizes = [2, 8], strides = [1, 1]} : vector<2x24xf32> to vector<2x8xf32>
    %100 = vector.extract_strided_slice %90 {offsets = [0, 8], sizes = [2, 8], strides = [1, 1]} : vector<2x24xf32> to vector<2x8xf32>
    %101 = arith.addf %99, %100 : vector<2x8xf32>
    %102 = arith.negf %101 : vector<2x8xf32>
    %103 = math.exp %102 : vector<2x8xf32>
    %cst_23 = arith.constant 1.000000e+00 : f32
    %104 = vector.broadcast %cst_23 : f32 to vector<2x8xf32>
    %105 = arith.addf %104, %103 : vector<2x8xf32>
    %106 = arith.divf %104, %105 : vector<2x8xf32>
    %107 = vector.extract_strided_slice %87 {offsets = [0, 16], sizes = [2, 8], strides = [1, 1]} : vector<2x24xf32> to vector<2x8xf32>
    %108 = vector.extract_strided_slice %90 {offsets = [0, 16], sizes = [2, 8], strides = [1, 1]} : vector<2x24xf32> to vector<2x8xf32>
    %109 = arith.mulf %98, %108 : vector<2x8xf32>
    %110 = arith.addf %107, %109 : vector<2x8xf32>
    %111 = math.tanh %110 : vector<2x8xf32>
    %cst_24 = arith.constant 1.000000e+00 : f32
    %112 = vector.broadcast %cst_24 : f32 to vector<2x8xf32>
    %113 = arith.subf %112, %106 : vector<2x8xf32>
    %114 = arith.mulf %113, %111 : vector<2x8xf32>
    %115 = arith.mulf %106, %78 : vector<2x8xf32>
    %116 = arith.addf %114, %115 : vector<2x8xf32>
    %c2 = arith.constant 2 : index
    %117 = memref.load %arg5[%c2] : memref<16xf32, #tpu.memory_space<smem>>
    %118 = vector.broadcast %117 : f32 to vector<2x8xf32>
    %119 = arith.mulf %118, %116 : vector<2x8xf32>
    %120 = arith.addf %82, %119 : vector<2x8xf32>
    %c10 = arith.constant 10 : index
    %121 = memref.load %arg5[%c10] : memref<16xf32, #tpu.memory_space<smem>>
    %122 = vector.broadcast %121 : f32 to vector<2x8xf32>
    %123 = arith.mulf %122, %116 : vector<2x8xf32>
    %124 = arith.addf %86, %123 : vector<2x8xf32>
    %125 = vector.extract_strided_slice %5 {offsets = [6, 0], sizes = [2, 24], strides = [1, 1]} : vector<16x24xf32> to vector<2x24xf32>
    %cst_25 = arith.constant dense<0.000000e+00> : vector<2x24xf32>
    %126 = tpu.matmul %116, %6, %cst_25 {dimension_numbers = #tpu.dot_dimension_numbers<[1], [0], [0], [1], [0, 0, 1, 1], [], []>} : vector<2x8xf32>, vector<8x24xf32>, vector<2x24xf32> -> vector<2x24xf32>
    %127 = vector.broadcast %7 : vector<1x24xf32> to vector<2x24xf32>
    %128 = arith.addf %126, %127 : vector<2x24xf32>
    %129 = vector.extract_strided_slice %125 {offsets = [0, 0], sizes = [2, 8], strides = [1, 1]} : vector<2x24xf32> to vector<2x8xf32>
    %130 = vector.extract_strided_slice %128 {offsets = [0, 0], sizes = [2, 8], strides = [1, 1]} : vector<2x24xf32> to vector<2x8xf32>
    %131 = arith.addf %129, %130 : vector<2x8xf32>
    %132 = arith.negf %131 : vector<2x8xf32>
    %133 = math.exp %132 : vector<2x8xf32>
    %cst_26 = arith.constant 1.000000e+00 : f32
    %134 = vector.broadcast %cst_26 : f32 to vector<2x8xf32>
    %135 = arith.addf %134, %133 : vector<2x8xf32>
    %136 = arith.divf %134, %135 : vector<2x8xf32>
    %137 = vector.extract_strided_slice %125 {offsets = [0, 8], sizes = [2, 8], strides = [1, 1]} : vector<2x24xf32> to vector<2x8xf32>
    %138 = vector.extract_strided_slice %128 {offsets = [0, 8], sizes = [2, 8], strides = [1, 1]} : vector<2x24xf32> to vector<2x8xf32>
    %139 = arith.addf %137, %138 : vector<2x8xf32>
    %140 = arith.negf %139 : vector<2x8xf32>
    %141 = math.exp %140 : vector<2x8xf32>
    %cst_27 = arith.constant 1.000000e+00 : f32
    %142 = vector.broadcast %cst_27 : f32 to vector<2x8xf32>
    %143 = arith.addf %142, %141 : vector<2x8xf32>
    %144 = arith.divf %142, %143 : vector<2x8xf32>
    %145 = vector.extract_strided_slice %125 {offsets = [0, 16], sizes = [2, 8], strides = [1, 1]} : vector<2x24xf32> to vector<2x8xf32>
    %146 = vector.extract_strided_slice %128 {offsets = [0, 16], sizes = [2, 8], strides = [1, 1]} : vector<2x24xf32> to vector<2x8xf32>
    %147 = arith.mulf %136, %146 : vector<2x8xf32>
    %148 = arith.addf %145, %147 : vector<2x8xf32>
    %149 = math.tanh %148 : vector<2x8xf32>
    %cst_28 = arith.constant 1.000000e+00 : f32
    %150 = vector.broadcast %cst_28 : f32 to vector<2x8xf32>
    %151 = arith.subf %150, %144 : vector<2x8xf32>
    %152 = arith.mulf %151, %149 : vector<2x8xf32>
    %153 = arith.mulf %144, %116 : vector<2x8xf32>
    %154 = arith.addf %152, %153 : vector<2x8xf32>
    %c3 = arith.constant 3 : index
    %155 = memref.load %arg5[%c3] : memref<16xf32, #tpu.memory_space<smem>>
    %156 = vector.broadcast %155 : f32 to vector<2x8xf32>
    %157 = arith.mulf %156, %154 : vector<2x8xf32>
    %158 = arith.addf %120, %157 : vector<2x8xf32>
    %c11 = arith.constant 11 : index
    %159 = memref.load %arg5[%c11] : memref<16xf32, #tpu.memory_space<smem>>
    %160 = vector.broadcast %159 : f32 to vector<2x8xf32>
    %161 = arith.mulf %160, %154 : vector<2x8xf32>
    %162 = arith.addf %124, %161 : vector<2x8xf32>
    %163 = vector.extract_strided_slice %5 {offsets = [8, 0], sizes = [2, 24], strides = [1, 1]} : vector<16x24xf32> to vector<2x24xf32>
    %cst_29 = arith.constant dense<0.000000e+00> : vector<2x24xf32>
    %164 = tpu.matmul %154, %6, %cst_29 {dimension_numbers = #tpu.dot_dimension_numbers<[1], [0], [0], [1], [0, 0, 1, 1], [], []>} : vector<2x8xf32>, vector<8x24xf32>, vector<2x24xf32> -> vector<2x24xf32>
    %165 = vector.broadcast %7 : vector<1x24xf32> to vector<2x24xf32>
    %166 = arith.addf %164, %165 : vector<2x24xf32>
    %167 = vector.extract_strided_slice %163 {offsets = [0, 0], sizes = [2, 8], strides = [1, 1]} : vector<2x24xf32> to vector<2x8xf32>
    %168 = vector.extract_strided_slice %166 {offsets = [0, 0], sizes = [2, 8], strides = [1, 1]} : vector<2x24xf32> to vector<2x8xf32>
    %169 = arith.addf %167, %168 : vector<2x8xf32>
    %170 = arith.negf %169 : vector<2x8xf32>
    %171 = math.exp %170 : vector<2x8xf32>
    %cst_30 = arith.constant 1.000000e+00 : f32
    %172 = vector.broadcast %cst_30 : f32 to vector<2x8xf32>
    %173 = arith.addf %172, %171 : vector<2x8xf32>
    %174 = arith.divf %172, %173 : vector<2x8xf32>
    %175 = vector.extract_strided_slice %163 {offsets = [0, 8], sizes = [2, 8], strides = [1, 1]} : vector<2x24xf32> to vector<2x8xf32>
    %176 = vector.extract_strided_slice %166 {offsets = [0, 8], sizes = [2, 8], strides = [1, 1]} : vector<2x24xf32> to vector<2x8xf32>
    %177 = arith.addf %175, %176 : vector<2x8xf32>
    %178 = arith.negf %177 : vector<2x8xf32>
    %179 = math.exp %178 : vector<2x8xf32>
    %cst_31 = arith.constant 1.000000e+00 : f32
    %180 = vector.broadcast %cst_31 : f32 to vector<2x8xf32>
    %181 = arith.addf %180, %179 : vector<2x8xf32>
    %182 = arith.divf %180, %181 : vector<2x8xf32>
    %183 = vector.extract_strided_slice %163 {offsets = [0, 16], sizes = [2, 8], strides = [1, 1]} : vector<2x24xf32> to vector<2x8xf32>
    %184 = vector.extract_strided_slice %166 {offsets = [0, 16], sizes = [2, 8], strides = [1, 1]} : vector<2x24xf32> to vector<2x8xf32>
    %185 = arith.mulf %174, %184 : vector<2x8xf32>
    %186 = arith.addf %183, %185 : vector<2x8xf32>
    %187 = math.tanh %186 : vector<2x8xf32>
    %cst_32 = arith.constant 1.000000e+00 : f32
    %188 = vector.broadcast %cst_32 : f32 to vector<2x8xf32>
    %189 = arith.subf %188, %182 : vector<2x8xf32>
    %190 = arith.mulf %189, %187 : vector<2x8xf32>
    %191 = arith.mulf %182, %154 : vector<2x8xf32>
    %192 = arith.addf %190, %191 : vector<2x8xf32>
    %c4 = arith.constant 4 : index
    %193 = memref.load %arg5[%c4] : memref<16xf32, #tpu.memory_space<smem>>
    %194 = vector.broadcast %193 : f32 to vector<2x8xf32>
    %195 = arith.mulf %194, %192 : vector<2x8xf32>
    %196 = arith.addf %158, %195 : vector<2x8xf32>
    %c12 = arith.constant 12 : index
    %197 = memref.load %arg5[%c12] : memref<16xf32, #tpu.memory_space<smem>>
    %198 = vector.broadcast %197 : f32 to vector<2x8xf32>
    %199 = arith.mulf %198, %192 : vector<2x8xf32>
    %200 = arith.addf %162, %199 : vector<2x8xf32>
    %201 = vector.extract_strided_slice %5 {offsets = [10, 0], sizes = [2, 24], strides = [1, 1]} : vector<16x24xf32> to vector<2x24xf32>
    %cst_33 = arith.constant dense<0.000000e+00> : vector<2x24xf32>
    %202 = tpu.matmul %192, %6, %cst_33 {dimension_numbers = #tpu.dot_dimension_numbers<[1], [0], [0], [1], [0, 0, 1, 1], [], []>} : vector<2x8xf32>, vector<8x24xf32>, vector<2x24xf32> -> vector<2x24xf32>
    %203 = vector.broadcast %7 : vector<1x24xf32> to vector<2x24xf32>
    %204 = arith.addf %202, %203 : vector<2x24xf32>
    %205 = vector.extract_strided_slice %201 {offsets = [0, 0], sizes = [2, 8], strides = [1, 1]} : vector<2x24xf32> to vector<2x8xf32>
    %206 = vector.extract_strided_slice %204 {offsets = [0, 0], sizes = [2, 8], strides = [1, 1]} : vector<2x24xf32> to vector<2x8xf32>
    %207 = arith.addf %205, %206 : vector<2x8xf32>
    %208 = arith.negf %207 : vector<2x8xf32>
    %209 = math.exp %208 : vector<2x8xf32>
    %cst_34 = arith.constant 1.000000e+00 : f32
    %210 = vector.broadcast %cst_34 : f32 to vector<2x8xf32>
    %211 = arith.addf %210, %209 : vector<2x8xf32>
    %212 = arith.divf %210, %211 : vector<2x8xf32>
    %213 = vector.extract_strided_slice %201 {offsets = [0, 8], sizes = [2, 8], strides = [1, 1]} : vector<2x24xf32> to vector<2x8xf32>
    %214 = vector.extract_strided_slice %204 {offsets = [0, 8], sizes = [2, 8], strides = [1, 1]} : vector<2x24xf32> to vector<2x8xf32>
    %215 = arith.addf %213, %214 : vector<2x8xf32>
    %216 = arith.negf %215 : vector<2x8xf32>
    %217 = math.exp %216 : vector<2x8xf32>
    %cst_35 = arith.constant 1.000000e+00 : f32
    %218 = vector.broadcast %cst_35 : f32 to vector<2x8xf32>
    %219 = arith.addf %218, %217 : vector<2x8xf32>
    %220 = arith.divf %218, %219 : vector<2x8xf32>
    %221 = vector.extract_strided_slice %201 {offsets = [0, 16], sizes = [2, 8], strides = [1, 1]} : vector<2x24xf32> to vector<2x8xf32>
    %222 = vector.extract_strided_slice %204 {offsets = [0, 16], sizes = [2, 8], strides = [1, 1]} : vector<2x24xf32> to vector<2x8xf32>
    %223 = arith.mulf %212, %222 : vector<2x8xf32>
    %224 = arith.addf %221, %223 : vector<2x8xf32>
    %225 = math.tanh %224 : vector<2x8xf32>
    %cst_36 = arith.constant 1.000000e+00 : f32
    %226 = vector.broadcast %cst_36 : f32 to vector<2x8xf32>
    %227 = arith.subf %226, %220 : vector<2x8xf32>
    %228 = arith.mulf %227, %225 : vector<2x8xf32>
    %229 = arith.mulf %220, %192 : vector<2x8xf32>
    %230 = arith.addf %228, %229 : vector<2x8xf32>
    %c5 = arith.constant 5 : index
    %231 = memref.load %arg5[%c5] : memref<16xf32, #tpu.memory_space<smem>>
    %232 = vector.broadcast %231 : f32 to vector<2x8xf32>
    %233 = arith.mulf %232, %230 : vector<2x8xf32>
    %234 = arith.addf %196, %233 : vector<2x8xf32>
    %c13 = arith.constant 13 : index
    %235 = memref.load %arg5[%c13] : memref<16xf32, #tpu.memory_space<smem>>
    %236 = vector.broadcast %235 : f32 to vector<2x8xf32>
    %237 = arith.mulf %236, %230 : vector<2x8xf32>
    %238 = arith.addf %200, %237 : vector<2x8xf32>
    %239 = vector.extract_strided_slice %5 {offsets = [12, 0], sizes = [2, 24], strides = [1, 1]} : vector<16x24xf32> to vector<2x24xf32>
    %cst_37 = arith.constant dense<0.000000e+00> : vector<2x24xf32>
    %240 = tpu.matmul %230, %6, %cst_37 {dimension_numbers = #tpu.dot_dimension_numbers<[1], [0], [0], [1], [0, 0, 1, 1], [], []>} : vector<2x8xf32>, vector<8x24xf32>, vector<2x24xf32> -> vector<2x24xf32>
    %241 = vector.broadcast %7 : vector<1x24xf32> to vector<2x24xf32>
    %242 = arith.addf %240, %241 : vector<2x24xf32>
    %243 = vector.extract_strided_slice %239 {offsets = [0, 0], sizes = [2, 8], strides = [1, 1]} : vector<2x24xf32> to vector<2x8xf32>
    %244 = vector.extract_strided_slice %242 {offsets = [0, 0], sizes = [2, 8], strides = [1, 1]} : vector<2x24xf32> to vector<2x8xf32>
    %245 = arith.addf %243, %244 : vector<2x8xf32>
    %246 = arith.negf %245 : vector<2x8xf32>
    %247 = math.exp %246 : vector<2x8xf32>
    %cst_38 = arith.constant 1.000000e+00 : f32
    %248 = vector.broadcast %cst_38 : f32 to vector<2x8xf32>
    %249 = arith.addf %248, %247 : vector<2x8xf32>
    %250 = arith.divf %248, %249 : vector<2x8xf32>
    %251 = vector.extract_strided_slice %239 {offsets = [0, 8], sizes = [2, 8], strides = [1, 1]} : vector<2x24xf32> to vector<2x8xf32>
    %252 = vector.extract_strided_slice %242 {offsets = [0, 8], sizes = [2, 8], strides = [1, 1]} : vector<2x24xf32> to vector<2x8xf32>
    %253 = arith.addf %251, %252 : vector<2x8xf32>
    %254 = arith.negf %253 : vector<2x8xf32>
    %255 = math.exp %254 : vector<2x8xf32>
    %cst_39 = arith.constant 1.000000e+00 : f32
    %256 = vector.broadcast %cst_39 : f32 to vector<2x8xf32>
    %257 = arith.addf %256, %255 : vector<2x8xf32>
    %258 = arith.divf %256, %257 : vector<2x8xf32>
    %259 = vector.extract_strided_slice %239 {offsets = [0, 16], sizes = [2, 8], strides = [1, 1]} : vector<2x24xf32> to vector<2x8xf32>
    %260 = vector.extract_strided_slice %242 {offsets = [0, 16], sizes = [2, 8], strides = [1, 1]} : vector<2x24xf32> to vector<2x8xf32>
    %261 = arith.mulf %250, %260 : vector<2x8xf32>
    %262 = arith.addf %259, %261 : vector<2x8xf32>
    %263 = math.tanh %262 : vector<2x8xf32>
    %cst_40 = arith.constant 1.000000e+00 : f32
    %264 = vector.broadcast %cst_40 : f32 to vector<2x8xf32>
    %265 = arith.subf %264, %258 : vector<2x8xf32>
    %266 = arith.mulf %265, %263 : vector<2x8xf32>
    %267 = arith.mulf %258, %230 : vector<2x8xf32>
    %268 = arith.addf %266, %267 : vector<2x8xf32>
    %c6 = arith.constant 6 : index
    %269 = memref.load %arg5[%c6] : memref<16xf32, #tpu.memory_space<smem>>
    %270 = vector.broadcast %269 : f32 to vector<2x8xf32>
    %271 = arith.mulf %270, %268 : vector<2x8xf32>
    %272 = arith.addf %234, %271 : vector<2x8xf32>
    %c14 = arith.constant 14 : index
    %273 = memref.load %arg5[%c14] : memref<16xf32, #tpu.memory_space<smem>>
    %274 = vector.broadcast %273 : f32 to vector<2x8xf32>
    %275 = arith.mulf %274, %268 : vector<2x8xf32>
    %276 = arith.addf %238, %275 : vector<2x8xf32>
    %277 = vector.extract_strided_slice %5 {offsets = [14, 0], sizes = [2, 24], strides = [1, 1]} : vector<16x24xf32> to vector<2x24xf32>
    %cst_41 = arith.constant dense<0.000000e+00> : vector<2x24xf32>
    %278 = tpu.matmul %268, %6, %cst_41 {dimension_numbers = #tpu.dot_dimension_numbers<[1], [0], [0], [1], [0, 0, 1, 1], [], []>} : vector<2x8xf32>, vector<8x24xf32>, vector<2x24xf32> -> vector<2x24xf32>
    %279 = vector.broadcast %7 : vector<1x24xf32> to vector<2x24xf32>
    %280 = arith.addf %278, %279 : vector<2x24xf32>
    %281 = vector.extract_strided_slice %277 {offsets = [0, 0], sizes = [2, 8], strides = [1, 1]} : vector<2x24xf32> to vector<2x8xf32>
    %282 = vector.extract_strided_slice %280 {offsets = [0, 0], sizes = [2, 8], strides = [1, 1]} : vector<2x24xf32> to vector<2x8xf32>
    %283 = arith.addf %281, %282 : vector<2x8xf32>
    %284 = arith.negf %283 : vector<2x8xf32>
    %285 = math.exp %284 : vector<2x8xf32>
    %cst_42 = arith.constant 1.000000e+00 : f32
    %286 = vector.broadcast %cst_42 : f32 to vector<2x8xf32>
    %287 = arith.addf %286, %285 : vector<2x8xf32>
    %288 = arith.divf %286, %287 : vector<2x8xf32>
    %289 = vector.extract_strided_slice %277 {offsets = [0, 8], sizes = [2, 8], strides = [1, 1]} : vector<2x24xf32> to vector<2x8xf32>
    %290 = vector.extract_strided_slice %280 {offsets = [0, 8], sizes = [2, 8], strides = [1, 1]} : vector<2x24xf32> to vector<2x8xf32>
    %291 = arith.addf %289, %290 : vector<2x8xf32>
    %292 = arith.negf %291 : vector<2x8xf32>
    %293 = math.exp %292 : vector<2x8xf32>
    %cst_43 = arith.constant 1.000000e+00 : f32
    %294 = vector.broadcast %cst_43 : f32 to vector<2x8xf32>
    %295 = arith.addf %294, %293 : vector<2x8xf32>
    %296 = arith.divf %294, %295 : vector<2x8xf32>
    %297 = vector.extract_strided_slice %277 {offsets = [0, 16], sizes = [2, 8], strides = [1, 1]} : vector<2x24xf32> to vector<2x8xf32>
    %298 = vector.extract_strided_slice %280 {offsets = [0, 16], sizes = [2, 8], strides = [1, 1]} : vector<2x24xf32> to vector<2x8xf32>
    %299 = arith.mulf %288, %298 : vector<2x8xf32>
    %300 = arith.addf %297, %299 : vector<2x8xf32>
    %301 = math.tanh %300 : vector<2x8xf32>
    %cst_44 = arith.constant 1.000000e+00 : f32
    %302 = vector.broadcast %cst_44 : f32 to vector<2x8xf32>
    %303 = arith.subf %302, %296 : vector<2x8xf32>
    %304 = arith.mulf %303, %301 : vector<2x8xf32>
    %305 = arith.mulf %296, %268 : vector<2x8xf32>
    %306 = arith.addf %304, %305 : vector<2x8xf32>
    %c7 = arith.constant 7 : index
    %307 = memref.load %arg5[%c7] : memref<16xf32, #tpu.memory_space<smem>>
    %308 = vector.broadcast %307 : f32 to vector<2x8xf32>
    %309 = arith.mulf %308, %306 : vector<2x8xf32>
    %310 = arith.addf %272, %309 : vector<2x8xf32>
    %c15 = arith.constant 15 : index
    %311 = memref.load %arg5[%c15] : memref<16xf32, #tpu.memory_space<smem>>
    %312 = vector.broadcast %311 : f32 to vector<2x8xf32>
    %313 = arith.mulf %312, %306 : vector<2x8xf32>
    %314 = arith.addf %276, %313 : vector<2x8xf32>
    %315 = vector.shape_cast %310 : vector<2x8xf32> to vector<2x8x1xf32>
    %316 = vector.shape_cast %314 : vector<2x8xf32> to vector<2x1x8xf32>
    %317 = vector.broadcast %315 : vector<2x8x1xf32> to vector<2x8x8xf32>
    %318 = vector.broadcast %316 : vector<2x1x8xf32> to vector<2x8x8xf32>
    %319 = arith.addf %317, %318 : vector<2x8x8xf32>
    %cst_45 = arith.constant 0.000000e+00 : f32
    %320 = vector.broadcast %cst_45 : f32 to vector<2x8x8xf32>
    %321 = arith.cmpf oge, %319, %320 : vector<2x8x8xf32>
    %cst_46 = arith.constant 0.00999999977 : f32
    %322 = vector.broadcast %cst_46 : f32 to vector<2x8x8xf32>
    %323 = arith.mulf %322, %319 : vector<2x8x8xf32>
    %324 = arith.select %321, %319, %323 : vector<2x8x8xi1>, vector<2x8x8xf32>
    %cst_47 = arith.constant dense<0xFF800000> : vector<2x8xf32>
    %325 = vector.multi_reduction <maximumf>, %324, %cst_47 [2] : vector<2x8x8xf32> to vector<2x8xf32>
    %326 = vector.shape_cast %325 : vector<2x8xf32> to vector<2x8x1xf32>
    %327 = vector.broadcast %326 : vector<2x8x1xf32> to vector<2x8x8xf32>
    %328 = arith.subf %324, %327 : vector<2x8x8xf32>
    %329 = math.exp %328 : vector<2x8x8xf32>
    %cst_48 = arith.constant dense<0.000000e+00> : vector<2x8xf32>
    %330 = vector.multi_reduction <add>, %329, %cst_48 [2] : vector<2x8x8xf32> to vector<2x8xf32>
    %331 = vector.shape_cast %330 : vector<2x8xf32> to vector<2x8x1xf32>
    %332 = tpu.reciprocal %331 {approx = true} : vector<2x8x1xf32> -> vector<2x8x1xf32>
    %333 = vector.broadcast %332 : vector<2x8x1xf32> to vector<2x8x8xf32>
    %334 = arith.mulf %329, %333 : vector<2x8x8xf32>
    %cst_49 = arith.constant dense<0.000000e+00> : vector<8x8xf32>
    %335 = vector.multi_reduction <add>, %334, %cst_49 [0] : vector<2x8x8xf32> to vector<8x8xf32>
    %cst_50 = arith.constant 2.000000e+00 : f32
    %336 = vector.broadcast %cst_50 : f32 to vector<8x8xf32>
    %337 = arith.divf %335, %336 : vector<8x8xf32>
    %338 = tpu.iota {dimensions = array<i32: 0>} : vector<8x8xi32>
    %339 = tpu.iota {dimensions = array<i32: 1>} : vector<8x8xi32>
    %340 = arith.cmpi eq, %338, %339 : vector<8x8xi32>
    %341 = arith.extui %340 : vector<8x8xi1> to vector<8x8xi32>
    %342 = arith.sitofp %341 : vector<8x8xi32> to vector<8x8xf32>
    %cst_51 = arith.constant dense<0.000000e+00> : vector<8xf32>
    %343 = vector.multi_reduction <add>, %337, %cst_51 [1] : vector<8x8xf32> to vector<8xf32>
    %344 = vector.shape_cast %343 : vector<8xf32> to vector<8x1xf32>
    %345 = tpu.transpose %337, [1, 0] : vector<8x8xf32> -> vector<8x8xf32>
    %346 = arith.addf %337, %345 : vector<8x8xf32>
    %cst_52 = arith.constant 5.000000e-01 : f32
    %347 = vector.broadcast %cst_52 : f32 to vector<8x8xf32>
    %348 = arith.mulf %347, %346 : vector<8x8xf32>
    %349 = math.sqrt %344 : vector<8x1xf32>
    %cst_53 = arith.constant 1.000000e-07 : f32
    %350 = vector.broadcast %cst_53 : f32 to vector<8x1xf32>
    %351 = arith.addf %349, %350 : vector<8x1xf32>
    %352 = tpu.reciprocal %351 {approx = true} : vector<8x1xf32> -> vector<8x1xf32>
    %353 = vector.broadcast %344 : vector<8x1xf32> to vector<8x8xf32>
    %354 = arith.mulf %342, %353 : vector<8x8xf32>
    %355 = arith.subf %354, %348 : vector<8x8xf32>
    %356 = vector.broadcast %352 : vector<8x1xf32> to vector<8x8xf32>
    %357 = arith.mulf %356, %355 : vector<8x8xf32>
    %358 = tpu.transpose %352, [1, 0] : vector<8x1xf32> -> vector<1x8xf32>
    %359 = vector.broadcast %358 : vector<1x8xf32> to vector<8x8xf32>
    %360 = arith.mulf %357, %359 : vector<8x8xf32>
    %c0_54 = arith.constant 0 : index
    %c0_55 = arith.constant 0 : index
    %361 = vector.load %arg6[%c0_54, %c0_55] : memref<8x8xf32, #tpu.memory_space<vmem>>, vector<8x8xf32>
    %cst_56 = arith.constant dense<0.000000e+00> : vector<8x8xf32>
    %362 = tpu.matmul %361, %361, %cst_56 {dimension_numbers = #tpu.dot_dimension_numbers<[1], [0], [0], [1], [0, 0, 1, 1], [], []>} : vector<8x8xf32>, vector<8x8xf32>, vector<8x8xf32> -> vector<8x8xf32>
    %cst_57 = arith.constant 2.000000e+00 : f32
    %363 = vector.broadcast %cst_57 : f32 to vector<8x8xf32>
    %364 = arith.mulf %363, %362 : vector<8x8xf32>
    %365 = arith.subf %364, %342 : vector<8x8xf32>
    %cst_58 = arith.constant dense<0.000000e+00> : vector<8x8xf32>
    %366 = tpu.matmul %360, %360, %cst_58 {dimension_numbers = #tpu.dot_dimension_numbers<[1], [0], [0], [1], [0, 0, 1, 1], [], []>} : vector<8x8xf32>, vector<8x8xf32>, vector<8x8xf32> -> vector<8x8xf32>
    %cst_59 = arith.constant 2.000000e+00 : f32
    %367 = vector.broadcast %cst_59 : f32 to vector<8x8xf32>
    %368 = arith.mulf %367, %366 : vector<8x8xf32>
    %369 = arith.subf %368, %342 : vector<8x8xf32>
    %370 = tpu.concatenate %361, %365, %360, %369 in 0 : vector<8x8xf32>, vector<8x8xf32>, vector<8x8xf32>, vector<8x8xf32> -> vector<32x8xf32>
    %c0_60 = arith.constant 0 : index
    %c0_61 = arith.constant 0 : index
    %371 = vector.load %arg7[%c0_60, %c0_61] : memref<8x96xbf16, #tpu.memory_space<vmem>>, vector<8x96xbf16>
    %372 = arith.truncf %370 : vector<32x8xf32> to vector<32x8xbf16>
    %cst_62 = arith.constant dense<0.000000e+00> : vector<32x96xf32>
    %373 = tpu.matmul %372, %371, %cst_62 {dimension_numbers = #tpu.dot_dimension_numbers<[1], [0], [0], [1], [0, 0, 1, 1], [], []>} : vector<32x8xbf16>, vector<8x96xbf16>, vector<32x96xf32> -> vector<32x96xf32>
    %374 = arith.extf %371 : vector<8x96xbf16> to vector<8x96xf32>
    %375 = vector.shape_cast %374 : vector<8x96xf32> to vector<8x24x4xf32>
    %376 = vector.extract_strided_slice %373 {offsets = [0, 0], sizes = [8, 96], strides = [1, 1]} : vector<32x96xf32> to vector<8x96xf32>
    %377 = vector.shape_cast %376 : vector<8x96xf32> to vector<8x24x4xf32>
    %378 = vector.extract_strided_slice %373 {offsets = [8, 0], sizes = [8, 96], strides = [1, 1]} : vector<32x96xf32> to vector<8x96xf32>
    %379 = vector.shape_cast %378 : vector<8x96xf32> to vector<8x24x4xf32>
    %380 = vector.extract_strided_slice %373 {offsets = [16, 0], sizes = [8, 96], strides = [1, 1]} : vector<32x96xf32> to vector<8x96xf32>
    %381 = vector.shape_cast %380 : vector<8x96xf32> to vector<8x24x4xf32>
    %382 = vector.extract_strided_slice %373 {offsets = [24, 0], sizes = [8, 96], strides = [1, 1]} : vector<32x96xf32> to vector<8x96xf32>
    %383 = vector.shape_cast %382 : vector<8x96xf32> to vector<8x24x4xf32>
    %384 = tpu.concatenate %375, %377, %379, %381, %383 in 2 : vector<8x24x4xf32>, vector<8x24x4xf32>, vector<8x24x4xf32>, vector<8x24x4xf32>, vector<8x24x4xf32> -> vector<8x24x20xf32>
    %c0_63 = arith.constant 0 : index
    %c0_64 = arith.constant 0 : index
    %385 = vector.load %arg8[%c0_63, %c0_64] : memref<20x4xf32, #tpu.memory_space<vmem>>, vector<20x4xf32>
    %386 = vector.shape_cast %385 : vector<20x4xf32> to vector<1x20x4xf32>
    %387 = vector.broadcast %386 : vector<1x20x4xf32> to vector<8x20x4xf32>
    "tpu.trace_start"() <{level = 10 : i32, message = "nbk,nko->nbo"}> : () -> ()
    %cst_65 = arith.constant dense<0.000000e+00> : vector<8x24x4xf32>
    %388 = tpu.matmul %384, %387, %cst_65 {dimension_numbers = #tpu.dot_dimension_numbers<[2], [1], [1], [2], [0, 0, 0, 1, 1, 2], [0], [0]>} : vector<8x24x20xf32>, vector<8x20x4xf32>, vector<8x24x4xf32> -> vector<8x24x4xf32>
    "tpu.trace_stop"() : () -> ()
    %389 = vector.shape_cast %388 : vector<8x24x4xf32> to vector<8x96xf32>
    %c0_66 = arith.constant 0 : index
    %c0_67 = arith.constant 0 : index
    %390 = vector.load %arg9[%c0_66, %c0_67] : memref<8x96xf32, #tpu.memory_space<vmem>>, vector<8x96xf32>
    tpu.vector_store %arg9[%c0_66, %c0_67], %389 {strides = array<i32>} : memref<8x96xf32, #tpu.memory_space<vmem>>, vector<8x96xf32>,
    return
  }
}

</mosaic_0001>

<bundles_post_ra>
// kernel: asgcp_forward.1
= control target key start
LH: loop header
LB: loop body
LE: loop exit
PB: predicated region body
PF: predicated region fallthrough
CT: control target
= control target key end

     0   :  { %14 = vsyncpa [#allocation3], 0  ;;  %s8822_s0 = inlined_call_operand.vmem [shape: f32[16,12], index: 0, kind: input, shape index: {}]   ;;  %s8823_s1 = inlined_call_operand.vmem [shape: f32[12,24], index: 1, kind: input, shape index: {}]   ;;  %s8824_s2 = inlined_call_operand.vmem [shape: f32[8,24], index: 2, kind: input, shape index: {}]   ;;  %s8825_s3 = inlined_call_operand.vmem [shape: f32[1,24], index: 3, kind: input, shape index: {}]   ;;  %s8826_s4 = inlined_call_operand.vmem [shape: f32[1,24], index: 4, kind: input, shape index: {}]   ;;  %s8827_s5 = inlined_call_operand.vmem [shape: f32[16], index: 5, kind: input, shape index: {}]   ;;  %s8828_s6 = inlined_call_operand.vmem [shape: f32[8,8], index: 6, kind: input, shape index: {}]   ;;  %s8829_s7 = inlined_call_operand.vmem [shape: bf16[8,96], index: 7, kind: input, shape index: {}]   ;;  %s8830_s8 = inlined_call_operand.vmem [shape: f32[20,4], index: 8, kind: input, shape index: {}]   ;;  %s8831_s9 = inlined_call_operand.vmem [shape: f32[8,96], index: 9, kind: output, shape index: {}]  }
   0x1   :  { %s31_s11 = sshll.u32 %s8827_s5, 4  ;;  %s32_s11 = int_to_ptr.vmem [resolvable:$true] %s31_s11 }
   0x2   :  { %s6099_s12 = scalar_lea.vmem %s32_s11, 16  ;;  %p6104_p1 = scmp.lt.s32.totalorder %s32_s11, %s32_s11 }
   0x3   :  { %p6100_p0 = scmp.ne.s32.totalorder %s32_s11, %s6099_s12  ;;  %p6105_p2 = scmp.lt.s32.totalorder %s6099_s12, %s6099_s12 }
   0x5   :  { %p6106_p3 = por %p6105_p2, %p6104_p1 }
   0x7   :  { %p6107_p4 = pnand %p6106_p3, %p6100_p0 }
   0x9   :  { %6110 = shalt.err (!%p6107_p4)
}
   0xa   :  { %s6113_s13 = smov [#allocation2]  }
   0xb   :  { %34 = dma.vmem_to_smem %s32_s11, 16, %s6113_s13, [#allocation3]  }
   0xc   :  { %6111 = dma.done.wait [#allocation3], 16  }
   0xd   :  { %6112 = vsyncadd [#allocation3], 4294967280 }
   0xe   :  { %44 = sfence }
   0xf   :  { %v6208_v0 = vld [vmem:[%s8824_s2] sm:$0xff]  ;;  %v49_v2 = vld [vmem:[%s8823_s1 + $0x8] sm:$0xf]  ;;  %v8832_v3 = vmov 0.0   ;;  %vm6115_vm0 = vmmov 0   ;;  %vm64_vm1 = vcmask 1043456  }
  0x10   :  { %v48_v1 = vld [vmem:[%s8823_s1] sm:$0xff]  ;;  %5792 = vmatprep.subr.mxu1 %v8832_v3  ;;  %5794 = vmatprep.mubr.msk.f32.mxu1 %vm6115_vm0, %v8832_v3  ;;  %vm57_vm2 = vcmask 97280   ;;  %vm6116_vm3 = vmmov 1   ;;  %v47_v6 = vld [vmem:[%s8822_s0 + $0x8] sm:$0xff]  ;;  %s6117_s22 = smov 112   ;;  %vm151_vm5 = vcmask 64512  }
  0x11   :  { %v5968_v4 = vpack.c.bf16 %v49_v2, %v48_v1  ;;  %v46_v5 = vld [vmem:[%s8822_s0] sm:$0xff]  ;;  %5793 = vmatpush3.msra.mxu1 %v6208_v0  ;;  %vm5969_vm4 = vmpackc.low %vm64_vm1, %vm6116_vm3  ;;  %s5647_s25 = sld [smem:[#allocation2 + $0x1]]  ;;  %s251_s27 = sld [smem:[#allocation2]]  ;;  %vm1145_vm6 = vcmask 130112   ;;  %vm4273_vm12 = vcmask 31744   ;;  %vm4346_vm13 = vcmask 130048  }
  0x12   :  { %5789 = vmatprep.mubr.msk.f32.mxu0 %vm57_vm2, %v46_v5  ;;  %5795 = vmatmul.mubr.f32.vlgmr.msra.gmra.mrb[0].mxu1 %v8832_v3  ;;  %v6243_v7 = vld [vmem:[%s8826_s4] ss:$0 sm:$0xff]  ;;  %s6118_s4 = smov 16   ;;  %s5648_s26 = sld [smem:[#allocation2 + $0x9]]  ;;  %vm4374_vm14 = vcmask 162816   ;;  %vm5595_vm15 = vcmask 195584  }
  0x13   :  { %5970 = vmatprep.subr.msk.bf16.mxu0 %vm5969_vm4, %v5968_v4  ;;  %5797 = vmatprep.subr.mxu1 %v8832_v3  ;;  %v5638_v12 = vld [vmem:[%s8825_s3] ss:$0 sm:$0xff]  ;;  %s6119_s3 = smov 120   ;;  %s5644_s28 = sld [smem:[#allocation2 + $0x8]]  ;;  %vm5601_vm3 = vcmask 293888  }
  0x14   :  { %5973 = vmatpush3.bf16.msk.msra.mxu0 %vm5969_vm4, %v5968_v4  ;;  %5798 = vmatpush3.msra.mxu1 %v6208_v0  ;;  %s5651_s29 = sld [smem:[#allocation2 + $0x2]]  ;;  %s5655_s10 = sld [smem:[#allocation2 + $0x3]]  ;;  %vm5603_vm4 = vcmask 326656  }
  0x15   :  { %5799 = vmatprep.mubr.msk.f32.mxu1 %vm6115_vm0, %v8832_v3  ;;  %5802 = vmatprep.subr.mxu0 %v8832_v3  ;;  %s5652_s30 = sld [smem:[#allocation2 + $0xa]]  ;;  %s5656_s11 = sld [smem:[#allocation2 + $0xb]] }
  0x16   :  { %5807 = vmatprep.subr.mxu1 %v8832_v3  ;;  %s5660_s12 = sld [smem:[#allocation2 + $0xc]]  ;;  %s5664_s14 = sld [smem:[#allocation2 + $0xd]] }
  0x17   :  { %5790 = vmatmul.mubr.msk.f32.vlgmr.msra.gmra.mrb[0].mxu0 %vm57_vm2, %v47_v6  ;;  %v365_v51 = vstv %s5647_s25  ;;  %v252_v54 = vstv %s251_s27  ;;  %s5659_s13 = sld [smem:[#allocation2 + $0x4]]  ;;  %s5663_s15 = sld [smem:[#allocation2 + $0x5]] }
  0x18   :  { %5803 = vmatpush3.msra.mxu0 %v6208_v0  ;;  %5804 = vmatprep.mubr.msk.f32.mxu0 %vm6115_vm0, %v8832_v3  ;;  %v372_v52 = vstv %s5648_s26  ;;  %s5668_s16 = sld [smem:[#allocation2 + $0xe]]  ;;  %s5671_s17 = sld [smem:[#allocation2 + $0x7]] }
  0x19   :  { %5812 = vmatprep.subr.mxu0 %v8832_v3  ;;  %v256_v55 = vstv %s5644_s28  ;;  %s5667_s5 = sld [smem:[#allocation2 + $0x6]]  ;;  %s5672_s18 = sld [smem:[#allocation2 + $0xf]] }
  0x1a   :  { %s6121_s19 = smov 8   ;;  %s6122_s0 = smov 124  }
  0x1b   :  { %s6123_s21 = smov 104   ;;  %s6125_s23 = smov 116  }
  0x1c   :  { %s6126_s24 = smov 88   ;;  %s6127_s25 = smov 80  }
  0x1d   :  { %s6128_s26 = smov 108   ;;  %s6129_s27 = smov 72  }
  0x1e   :  { %s6130_s28 = smov 100  }
  0xe5   :  { %v221_v8 = vpop.f32.mrb[0].mxu1 }
  0xe6   :  { %v222_v9 = vadd.f32 %v6243_v7, %v221_v8  ;;  %v5796_v10 = vpop.f32.mrb[1].mxu1 }
  0xe8   :  { %233 = vrot.lane.b32.xlu0 %v222_v9, %s6117_s22 }
  0xea   :  { %v5791_v11 = vpop.f32.mrb[0].mxu0 }
  0xeb   :  { %v6250_v13 = vadd.f32 %v5791_v11, %v5638_v12  ;;  %v134_v14 = vpop.f32.mrb[1].mxu0 }
  0xec   :  { %v6252_v15 = vadd.f32 %v5638_v12, %v134_v14 }
  0xee   :  { %v225_v16 = vadd.f32 %v222_v9, %v6252_v15 }
  0xf0   :  { %v5643_v17 = vmul.f32 -1.442695, %v225_v16 }
  0xf2   :  { %6038 = vpow2.f32 %v5643_v17 }
  0xfc   :  { %v6039_v18 = vpop.eup %6038 }
  0xfd   :  { %v229_v19 = vadd.f32 1.0, %v6039_v18 }
  0xff   :  { %6040 = vrcp.f32 %v229_v19 }
 0x109   :  { %v6041_v20 = vpop.eup %6040 }
 0x10a   :  { %v243_v26 = vsub.f32 1.0, %v6041_v20  ;;  %v249_v28 = vmul.f32 0.0, %v6041_v20 }
 0x15a   :  { %v234_v21 = vpop.permute.xlu0 %233 }
 0x15b   :  { %v236_v22 = vmul.f32 %v6041_v20, %v234_v21 }
 0x15d   :  { %238 = vrot.lane.b32.xlu0 %v236_v22, %s6118_s4 }
 0x1cf   :  { %v239_v23 = vpop.permute.xlu0 %238 }
 0x1d0   :  { %v241_v24 = vadd.f32 %v239_v23, %v6252_v15 }
 0x1d2   :  { %6042 = vtanh.f32 %v241_v24 }
 0x1dc   :  { %v6043_v25 = vpop.eup %6042 }
 0x1dd   :  { %245 = vrot.lane.b32.xlu1 %v6043_v25, %s6119_s3 }
 0x24f   :  { %v246_v27 = vpop.permute.xlu1 %245 }
 0x250   :  { %v248_v29 = vmul.f32 %v246_v27, %v243_v26  ;;  %v485_v26 = vstv %s5651_s29  ;;  %v492_v27 = vstv %s5652_s30  ;;  %s6131_s29 = smov 64   ;;  %s6132_s30 = smov 92  }
 0x252   :  { %v250_v30 = vadd.f32 %v249_v28, %v248_v29 }
 0x254   :  { %260 = vrot.lane.b32.xlu1 %v250_v30, %s6119_s3  ;;  %v360_v47 = vrot.slane %v250_v30, 6  ;;  %v253_v59 = vmul.f32 %v252_v54, %v250_v30  ;;  %v257_v60 = vmul.f32 %v256_v55, %v250_v30 }
 0x2c6   :  { %v261_v31 = vpop.permute.xlu1 %260 }
 0x2c7   :  { %5800 = vmatmul.mubr.msk.f32.vlgmr.msra.gmra.mrb[2].mxu1 %vm151_vm5, %v261_v31 }
 0x2c8   :  { %5808 = vmatpush3.msra.mxu1 %v6208_v0  ;;  %5809 = vmatprep.mubr.msk.f32.mxu1 %vm6115_vm0, %v8832_v3 }
 0x2c9   :  { %5817 = vmatprep.subr.mxu1 %v8832_v3 }
 0x39a   :  { %v330_v32 = vpop.f32.mrb[2].mxu1 }
 0x39b   :  { %v331_v33 = vadd.f32 %v6243_v7, %v330_v32  ;;  %v5801_v34 = vpop.f32.mrb[3].mxu1 }
 0x39d   :  { %v335_v35 = vrot.slane %v331_v33, 6 }
 0x39f   :  { %344 = vrot.lane.b32.xlu0 %v335_v35, %s6117_s22  ;;  %v337_v36 = vadd.f32 %v335_v35, %v6252_v15 }
 0x3a1   :  { %v5646_v37 = vmul.f32 -1.442695, %v337_v36 }
 0x3a3   :  { %6044 = vpow2.f32 %v5646_v37 }
 0x3ad   :  { %v6045_v38 = vpop.eup %6044 }
 0x3ae   :  { %v341_v39 = vadd.f32 1.0, %v6045_v38 }
 0x3b0   :  { %6046 = vrcp.f32 %v341_v39 }
 0x3ba   :  { %v6047_v40 = vpop.eup %6046 }
 0x3bb   :  { %v354_v46 = vsub.f32 1.0, %v6047_v40  ;;  %v362_v50 = vmul.f32 %v6047_v40, %v360_v47 }
 0x411   :  { %v345_v41 = vpop.permute.xlu0 %344 }
 0x412   :  { %v347_v42 = vmul.f32 %v6047_v40, %v345_v41 }
 0x414   :  { %349 = vrot.lane.b32.xlu1 %v347_v42, %s6118_s4 }
 0x486   :  { %v350_v43 = vpop.permute.xlu1 %349 }
 0x487   :  { %v352_v44 = vadd.f32 %v350_v43, %v6252_v15 }
 0x489   :  { %6048 = vtanh.f32 %v352_v44 }
 0x493   :  { %v6049_v45 = vpop.eup %6048 }
 0x494   :  { %356 = vrot.lane.b32.xlu0 %v6049_v45, %s6119_s3 }
 0x506   :  { %v357_v48 = vpop.permute.xlu0 %356 }
 0x507   :  { %v359_v49 = vmul.f32 %v357_v48, %v354_v46 }
 0x509   :  { %v363_v53 = vadd.f32 %v362_v50, %v359_v49 }
 0x50b   :  { %v366_v56 = vmul.f32 %v365_v51, %v363_v53  ;;  %v373_v57 = vmul.f32 %v372_v52, %v363_v53  ;;  %v379_v58 = vrot.slane %v363_v53, 2  ;;  %v480_v22 = vrot.slane %v363_v53, 6 }
 0x50d   :  { %v368_v61 = vrot.slane %v366_v56, 2  ;;  %v375_v62 = vrot.slane %v373_v57, 2  ;;  %380 = vrot.lane.b32.xlu1 %v379_v58, %s6119_s3  ;;  %v605_v56 = vstv %s5655_s10  ;;  %v612_v57 = vstv %s5656_s11  ;;  %s6133_s10 = smov 56   ;;  %s6134_s11 = smov 84  }
 0x50f   :  { %v370_v63 = vadd.f32 %v368_v61, %v253_v59  ;;  %v377_v1 = vadd.f32 %v375_v62, %v257_v60 }
 0x57f   :  { %v381_v2 = vpop.permute.xlu1 %380 }
 0x580   :  { %5805 = vmatmul.mubr.msk.f32.vlgmr.msra.gmra.mrb[2].mxu0 %vm151_vm5, %v381_v2 }
 0x581   :  { %5813 = vmatpush3.msra.mxu0 %v6208_v0  ;;  %5814 = vmatprep.mubr.msk.f32.mxu0 %vm6115_vm0, %v8832_v3 }
 0x582   :  { %5822 = vmatprep.subr.mxu0 %v8832_v3 }
 0x653   :  { %v450_v4 = vpop.f32.mrb[2].mxu0 }
 0x654   :  { %v451_v5 = vadd.f32 %v6243_v7, %v450_v4  ;;  %v5806_v6 = vpop.f32.mrb[3].mxu0 }
 0x656   :  { %v455_v8 = vrot.slane %v451_v5, 4 }
 0x658   :  { %464 = vrot.lane.b32.xlu0 %v455_v8, %s6117_s22  ;;  %v457_v9 = vadd.f32 %v455_v8, %v6252_v15 }
 0x65a   :  { %v5650_v10 = vmul.f32 -1.442695, %v457_v9 }
 0x65c   :  { %6050 = vpow2.f32 %v5650_v10 }
 0x666   :  { %v6051_v11 = vpop.eup %6050 }
 0x667   :  { %v461_v12 = vadd.f32 1.0, %v6051_v11 }
 0x669   :  { %6052 = vrcp.f32 %v461_v12 }
 0x673   :  { %v6053_v14 = vpop.eup %6052 }
 0x674   :  { %v474_v21 = vsub.f32 1.0, %v6053_v14  ;;  %v482_v24 = vmul.f32 %v6053_v14, %v480_v22 }
 0x6ca   :  { %v465_v16 = vpop.permute.xlu0 %464 }
 0x6cb   :  { %v467_v17 = vmul.f32 %v6053_v14, %v465_v16 }
 0x6cd   :  { %469 = vrot.lane.b32.xlu1 %v467_v17, %s6118_s4 }
 0x73f   :  { %v470_v18 = vpop.permute.xlu1 %469 }
 0x740   :  { %v472_v19 = vadd.f32 %v470_v18, %v6252_v15 }
 0x742   :  { %6054 = vtanh.f32 %v472_v19 }
 0x74c   :  { %v6055_v20 = vpop.eup %6054 }
 0x74d   :  { %476 = vrot.lane.b32.xlu0 %v6055_v20, %s6119_s3 }
 0x7bf   :  { %v477_v23 = vpop.permute.xlu0 %476 }
 0x7c0   :  { %v479_v25 = vmul.f32 %v477_v23, %v474_v21 }
 0x7c2   :  { %v483_v28 = vadd.f32 %v482_v24, %v479_v25  ;;  %v726_v24 = vstv %s5660_s12  ;;  %v722_v25 = vstv %s5659_s13  ;;  %s6135_s12 = smov 48   ;;  %s6136_s13 = smov 76  }
 0x7c4   :  { %v486_v29 = vmul.f32 %v485_v26, %v483_v28  ;;  %v493_v30 = vmul.f32 %v492_v27, %v483_v28  ;;  %v499_v31 = vrot.slane %v483_v28, 4  ;;  %v600_v52 = vrot.slane %v483_v28, 6 }
 0x7c6   :  { %v488_v32 = vrot.slane %v486_v29, 4  ;;  %v495_v33 = vrot.slane %v493_v30, 4  ;;  %500 = vrot.lane.b32.xlu1 %v499_v31, %s6119_s3 }
 0x7c8   :  { %v490_v34 = vadd.f32 %v488_v32, %v370_v63  ;;  %v497_v35 = vadd.f32 %v495_v33, %v377_v1 }
 0x838   :  { %v501_v36 = vpop.permute.xlu1 %500 }
 0x839   :  { %5810 = vmatmul.mubr.msk.f32.vlgmr.msra.gmra.mrb[4].mxu1 %vm151_vm5, %v501_v36 }
 0x83a   :  { %5818 = vmatpush3.msra.mxu1 %v6208_v0  ;;  %5819 = vmatprep.mubr.msk.f32.mxu1 %vm6115_vm0, %v8832_v3 }
 0x83b   :  { %5827 = vmatprep.subr.mxu1 %v8832_v3 }
 0x90c   :  { %v570_v37 = vpop.f32.mrb[4].mxu1 }
 0x90d   :  { %v571_v38 = vadd.f32 %v6243_v7, %v570_v37  ;;  %v5811_v39 = vpop.f32.mrb[5].mxu1 }
 0x90f   :  { %v575_v40 = vrot.slane %v571_v38, 2 }
 0x911   :  { %584 = vrot.lane.b32.xlu0 %v575_v40, %s6117_s22  ;;  %v577_v41 = vadd.f32 %v575_v40, %v6252_v15 }
 0x913   :  { %v5654_v42 = vmul.f32 -1.442695, %v577_v41 }
 0x915   :  { %6056 = vpow2.f32 %v5654_v42 }
 0x91f   :  { %v6057_v43 = vpop.eup %6056 }
 0x920   :  { %v581_v44 = vadd.f32 1.0, %v6057_v43 }
 0x922   :  { %6058 = vrcp.f32 %v581_v44 }
 0x92c   :  { %v6059_v45 = vpop.eup %6058 }
 0x92d   :  { %v594_v51 = vsub.f32 1.0, %v6059_v45  ;;  %v602_v54 = vmul.f32 %v6059_v45, %v600_v52 }
 0x983   :  { %v585_v46 = vpop.permute.xlu0 %584 }
 0x984   :  { %v587_v47 = vmul.f32 %v6059_v45, %v585_v46 }
 0x986   :  { %589 = vrot.lane.b32.xlu1 %v587_v47, %s6118_s4 }
 0x9f8   :  { %v590_v48 = vpop.permute.xlu1 %589 }
 0x9f9   :  { %v592_v49 = vadd.f32 %v590_v48, %v6252_v15 }
 0x9fb   :  { %6060 = vtanh.f32 %v592_v49 }
 0xa05   :  { %v6061_v50 = vpop.eup %6060 }
 0xa06   :  { %596 = vrot.lane.b32.xlu0 %v6061_v50, %s6119_s3  ;;  %v842_v50 = vstv %s5664_s14  ;;  %s6137_s14 = smov 40  }
 0xa78   :  { %v597_v53 = vpop.permute.xlu0 %596 }
 0xa79   :  { %v599_v55 = vmul.f32 %v597_v53, %v594_v51  ;;  %v835_v51 = vstv %s5663_s15  ;;  %s6138_s15 = smov 68  }
 0xa7b   :  { %v603_v58 = vadd.f32 %v602_v54, %v599_v55 }
 0xa7d   :  { %v606_v59 = vmul.f32 %v605_v56, %v603_v58  ;;  %v613_v60 = vmul.f32 %v612_v57, %v603_v58  ;;  %v619_v61 = vrot.slane %v603_v58, 6 }
 0xa7f   :  { %v608_v62 = vrot.slane %v606_v59, 6  ;;  %v615_v63 = vrot.slane %v613_v60, 6  ;;  %620 = vrot.lane.b32.xlu1 %v619_v61, %s6119_s3 }
 0xa81   :  { %v610_v15 = vadd.f32 %v608_v62, %v490_v34  ;;  %v617_v1 = vadd.f32 %v615_v63, %v497_v35 }
 0xaf1   :  { %v621_v2 = vpop.permute.xlu1 %620 }
 0xaf2   :  { %5815 = vmatmul.mubr.msk.f32.vlgmr.msra.gmra.mrb[4].mxu0 %vm151_vm5, %v621_v2 }
 0xaf3   :  { %5823 = vmatpush3.msra.mxu0 %v6208_v0  ;;  %5824 = vmatprep.mubr.msk.f32.mxu0 %vm6115_vm0, %v8832_v3 }
 0xaf4   :  { %5832 = vmatprep.subr.mxu0 %v8832_v3 }
 0xbc5   :  { %v690_v4 = vpop.f32.mrb[4].mxu0 }
 0xbc6   :  { %v691_v5 = vadd.f32 %v6243_v7, %v690_v4  ;;  %v5816_v6 = vpop.f32.mrb[5].mxu0 }
 0xbc8   :  { %702 = vrot.lane.b32.xlu0 %v691_v5, %s6117_s22  ;;  %v694_v8 = vadd.f32 %v691_v5, %v6250_v13 }
 0xbca   :  { %v5658_v9 = vmul.f32 -1.442695, %v694_v8 }
 0xbcc   :  { %6062 = vpow2.f32 %v5658_v9 }
 0xbd6   :  { %v6063_v10 = vpop.eup %6062 }
 0xbd7   :  { %v698_v11 = vadd.f32 1.0, %v6063_v10 }
 0xbd9   :  { %6064 = vrcp.f32 %v698_v11 }
 0xbe3   :  { %v6065_v12 = vpop.eup %6064 }
 0xbe4   :  { %v712_v20 = vsub.f32 1.0, %v6065_v12  ;;  %v719_v22 = vmul.f32 %v6065_v12, %v619_v61 }
 0xc3a   :  { %v703_v14 = vpop.permute.xlu0 %702 }
 0xc3b   :  { %v705_v16 = vmul.f32 %v6065_v12, %v703_v14 }
 0xc3d   :  { %707 = vrot.lane.b32.xlu1 %v705_v16, %s6118_s4 }
 0xcaf   :  { %v708_v17 = vpop.permute.xlu1 %707 }
 0xcb0   :  { %v710_v18 = vadd.f32 %v708_v17, %v6250_v13 }
 0xcb2   :  { %6066 = vtanh.f32 %v710_v18 }
 0xcbc   :  { %v6067_v19 = vpop.eup %6066 }
 0xcbd   :  { %714 = vrot.lane.b32.xlu0 %v6067_v19, %s6119_s3 }
 0xd2f   :  { %v715_v21 = vpop.permute.xlu0 %714 }
 0xd30   :  { %v717_v23 = vmul.f32 %v715_v21, %v712_v20  ;;  %v962_v20 = vstv %s5668_s16  ;;  %v955_v21 = vstv %s5667_s5  ;;  %s6139_s16 = smov 60   ;;  %s6140_s5 = smov 52  }
 0xd32   :  { %v720_v26 = vadd.f32 %v719_v22, %v717_v23 }
 0xd34   :  { %v727_v27 = vmul.f32 %v726_v24, %v720_v26  ;;  %730 = vrot.lane.b32.xlu1 %v720_v26, %s6119_s3  ;;  %v723_v28 = vmul.f32 %v722_v25, %v720_v26  ;;  %v830_v46 = vrot.slane %v720_v26, 6 }
 0xd36   :  { %v728_v29 = vadd.f32 %v727_v27, %v617_v1  ;;  %v724_v30 = vadd.f32 %v723_v28, %v610_v15 }
 0xda6   :  { %v731_v31 = vpop.permute.xlu1 %730 }
 0xda7   :  { %5820 = vmatmul.mubr.msk.f32.vlgmr.msra.gmra.mrb[6].mxu1 %vm151_vm5, %v731_v31 }
 0xda8   :  { %5828 = vmatpush3.msra.mxu1 %v6208_v0  ;;  %5829 = vmatprep.mubr.msk.f32.mxu1 %vm6115_vm0, %v8832_v3 }
 0xda9   :  { %5837 = vmatprep.subr.mxu1 %v8832_v3 }
 0xe7a   :  { %v800_v32 = vpop.f32.mrb[6].mxu1 }
 0xe7b   :  { %v801_v33 = vadd.f32 %v6243_v7, %v800_v32  ;;  %v5821_v34 = vpop.f32.mrb[7].mxu1 }
 0xe7d   :  { %v805_v35 = vrot.slane %v801_v33, 6 }
 0xe7f   :  { %814 = vrot.lane.b32.xlu0 %v805_v35, %s6117_s22  ;;  %v807_v36 = vadd.f32 %v805_v35, %v6250_v13 }
 0xe81   :  { %v5662_v37 = vmul.f32 -1.442695, %v807_v36 }
 0xe83   :  { %6068 = vpow2.f32 %v5662_v37 }
 0xe8d   :  { %v6069_v38 = vpop.eup %6068 }
 0xe8e   :  { %v811_v39 = vadd.f32 1.0, %v6069_v38 }
 0xe90   :  { %6070 = vrcp.f32 %v811_v39 }
 0xe9a   :  { %v6071_v0 = vpop.eup %6070 }
 0xe9b   :  { %v824_v45 = vsub.f32 1.0, %v6071_v0  ;;  %v832_v49 = vmul.f32 %v6071_v0, %v830_v46 }
 0xef1   :  { %v815_v40 = vpop.permute.xlu0 %814 }
 0xef2   :  { %v817_v41 = vmul.f32 %v6071_v0, %v815_v40 }
 0xef4   :  { %819 = vrot.lane.b32.xlu1 %v817_v41, %s6118_s4 }
 0xf66   :  { %v820_v42 = vpop.permute.xlu1 %819 }
 0xf67   :  { %v822_v43 = vadd.f32 %v820_v42, %v6250_v13 }
 0xf69   :  { %6072 = vtanh.f32 %v822_v43 }
 0xf73   :  { %v6073_v44 = vpop.eup %6072 }
 0xf74   :  { %826 = vrot.lane.b32.xlu0 %v6073_v44, %s6119_s3 }
 0xfe6   :  { %v827_v47 = vpop.permute.xlu0 %826 }
 0xfe7   :  { %v829_v48 = vmul.f32 %v827_v47, %v824_v45  ;;  %v1088_v45 = vlaneseq }
 0xfe9   :  { %v833_v52 = vadd.f32 %v832_v49, %v829_v48  ;;  %v1075_v49 = vstv %s5671_s17  ;;  %s6141_s17 = smov 44  }
 0xfeb   :  { %v843_v53 = vmul.f32 %v842_v50, %v833_v52  ;;  %v849_v54 = vrot.slane %v833_v52, 2  ;;  %v836_v55 = vmul.f32 %v835_v51, %v833_v52  ;;  %v950_v16 = vrot.slane %v833_v52, 6 }
 0xfec   :  { %v1082_v50 = vstv %s5672_s18  ;;  %v6339_v52 = vshrl.u32 %v1088_v45, 7  ;;  %s6142_s18 = smov 36  }
 0xfed   :  { %v845_v56 = vrot.slane %v843_v53, 2  ;;  %850 = vrot.lane.b32.xlu1 %v849_v54, %s6119_s3  ;;  %v838_v57 = vrot.slane %v836_v55, 2 }
 0xfef   :  { %v847_v58 = vadd.f32 %v845_v56, %v728_v29  ;;  %v840_v59 = vadd.f32 %v838_v57, %v724_v30  ;;  %v1098_v56 = vsub.s32 1, %v6339_v52  ;;  %v6343_v57 = vsub.s32 0, %v6339_v52 }
0x105f   :  { %v851_v60 = vpop.permute.xlu1 %850 }
0x1060   :  { %5825 = vmatmul.mubr.msk.f32.vlgmr.msra.gmra.mrb[6].mxu0 %vm151_vm5, %v851_v60 }
0x1061   :  { %5834 = vmatprep.mubr.msk.f32.mxu0 %vm6115_vm0, %v8832_v3 }
0x1133   :  { %v920_v61 = vpop.f32.mrb[6].mxu0 }
0x1134   :  { %v921_v62 = vadd.f32 %v6243_v7, %v920_v61  ;;  %v5826_v63 = vpop.f32.mrb[7].mxu0 }
0x1136   :  { %v925_v15 = vrot.slane %v921_v62, 4  ;;  %v6120_v62 = vmov 1966171168  }
0x1137   :  { %v1106_v63 = vunpack.c.l.s4 %v6120_v62 }
0x1138   :  { %934 = vrot.lane.b32.xlu0 %v925_v15, %s6117_s22  ;;  %v927_v1 = vadd.f32 %v925_v15, %v6250_v13 }
0x1139   :  { %v1107_v15 = vunpack.c.0.s8 %v1106_v63 }
0x113a   :  { %v5666_v2 = vmul.f32 -1.442695, %v927_v1 }
0x113b   :  { %v1110_v1 = vsub.s32 %v1107_v15, %v6339_v52 }
0x113c   :  { %6074 = vpow2.f32 %v5666_v2 }
0x1146   :  { %v6075_v4 = vpop.eup %6074 }
0x1147   :  { %v931_v5 = vadd.f32 1.0, %v6075_v4 }
0x1149   :  { %6076 = vrcp.f32 %v931_v5 }
0x1153   :  { %v6077_v6 = vpop.eup %6076 }
0x1154   :  { %v944_v14 = vsub.f32 1.0, %v6077_v6  ;;  %v952_v18 = vmul.f32 %v6077_v6, %v950_v16 }
0x11aa   :  { %v935_v8 = vpop.permute.xlu0 %934 }
0x11ab   :  { %v937_v9 = vmul.f32 %v6077_v6, %v935_v8 }
0x11ad   :  { %939 = vrot.lane.b32.xlu1 %v937_v9, %s6118_s4 }
0x121f   :  { %v940_v10 = vpop.permute.xlu1 %939 }
0x1220   :  { %v942_v11 = vadd.f32 %v940_v10, %v6250_v13 }
0x1222   :  { %6078 = vtanh.f32 %v942_v11 }
0x122c   :  { %v6079_v12 = vpop.eup %6078 }
0x122d   :  { %946 = vrot.lane.b32.xlu0 %v6079_v12, %s6119_s3 }
0x129f   :  { %v947_v17 = vpop.permute.xlu0 %946 }
0x12a0   :  { %v949_v19 = vmul.f32 %v947_v17, %v944_v14 }
0x12a2   :  { %v953_v22 = vadd.f32 %v952_v18, %v949_v19 }
0x12a4   :  { %v963_v23 = vmul.f32 %v962_v20, %v953_v22  ;;  %v969_v24 = vrot.slane %v953_v22, 4  ;;  %v956_v25 = vmul.f32 %v955_v21, %v953_v22  ;;  %v1070_v44 = vrot.slane %v953_v22, 6 }
0x12a6   :  { %970 = vrot.lane.b32.xlu1 %v969_v24, %s6119_s3  ;;  %v965_v26 = vrot.slane %v963_v23, 4  ;;  %v958_v27 = vrot.slane %v956_v25, 4 }
0x12a8   :  { %v967_v28 = vadd.f32 %v965_v26, %v847_v58  ;;  %v960_v29 = vadd.f32 %v958_v27, %v840_v59 }
0x1318   :  { %v971_v30 = vpop.permute.xlu1 %970 }
0x1319   :  { %5830 = vmatmul.mubr.msk.f32.vlgmr.msra.gmra.mrb[8].mxu1 %vm151_vm5, %v971_v30 }
0x131a   :  { %5839 = vmatprep.mubr.msk.f32.mxu1 %vm6115_vm0, %v8832_v3 }
0x13ec   :  { %v1040_v31 = vpop.f32.mrb[8].mxu1 }
0x13ed   :  { %v1041_v32 = vadd.f32 %v6243_v7, %v1040_v31  ;;  %v5831_v33 = vpop.f32.mrb[9].mxu1 }
0x13ef   :  { %v1045_v34 = vrot.slane %v1041_v32, 2 }
0x13f1   :  { %1054 = vrot.lane.b32.xlu0 %v1045_v34, %s6117_s22  ;;  %v1047_v35 = vadd.f32 %v1045_v34, %v6250_v13 }
0x13f3   :  { %v5670_v36 = vmul.f32 -1.442695, %v1047_v35 }
0x13f5   :  { %6080 = vpow2.f32 %v5670_v36 }
0x13ff   :  { %v6081_v37 = vpop.eup %6080 }
0x1400   :  { %v1051_v38 = vadd.f32 1.0, %v6081_v37 }
0x1402   :  { %6082 = vrcp.f32 %v1051_v38 }
0x140c   :  { %v6083_v39 = vpop.eup %6082 }
0x140d   :  { %v1064_v43 = vsub.f32 1.0, %v6083_v39  ;;  %v1072_v47 = vmul.f32 %v6083_v39, %v1070_v44 }
0x1463   :  { %v1055_v0 = vpop.permute.xlu0 %1054 }
0x1464   :  { %v1057_v40 = vmul.f32 %v6083_v39, %v1055_v0 }
0x1466   :  { %1059 = vrot.lane.b32.xlu1 %v1057_v40, %s6118_s4 }
0x14d8   :  { %v1060_v41 = vpop.permute.xlu1 %1059 }
0x14d9   :  { %v1062_v42 = vadd.f32 %v1060_v41, %v6250_v13 }
0x14db   :  { %6084 = vtanh.f32 %v1062_v42 }
0x14e5   :  { %v6085_v7 = vpop.eup %6084 }
0x14e6   :  { %1066 = vrot.lane.b32.xlu0 %v6085_v7, %s6119_s3 }
0x1558   :  { %v1067_v46 = vpop.permute.xlu0 %1066 }
0x1559   :  { %v1069_v48 = vmul.f32 %v1067_v46, %v1064_v43 }
0x155b   :  { %v1073_v51 = vadd.f32 %v1072_v47, %v1069_v48 }
0x155d   :  { %v1076_v53 = vmul.f32 %v1075_v49, %v1073_v51  ;;  %v1083_v13 = vmul.f32 %v1082_v50, %v1073_v51 }
0x155f   :  { %v1085_v54 = vrot.slane %v1083_v13, 6  ;;  %v1078_v55 = vrot.slane %v1076_v53, 6 }
0x1561   :  { %v1087_v58 = vadd.f32 %v1085_v54, %v967_v28  ;;  %v1080_v59 = vadd.f32 %v1078_v55, %v960_v29 }
0x1563   :  { %v1099_v60 = vrot.slane %v1080_v59, %v1098_v56  ;;  %v1091_v61 = vrot.slane %v1080_v59, %v6343_v57  ;;  %v1111_v2 = vrot.slane %v1087_v58, %v1110_v1  ;;  %v1286_v58 = vld [vmem:[%s8828_s6] sm:$0xff]  ;;  %v1184_v59 = vand.u32 127, %v1088_v45 }
0x1564   :  { %5833 = vmatpush3.msra.mxu0 %v1286_v58 }
0x1565   :  { %1102 = vbcast.lane.b32.xlu0 %v1099_v60, 264  ;;  %1094 = vbcast.lane.b32.xlu1 %v1091_v61, 264  ;;  %v1112_v4 = vcombine.high %v1111_v2, %v1111_v2  ;;  %v1119_v6 = vrot.slane %v1111_v2, %v1110_v1  ;;  %vm1185_vm11 = vcmp.eq.s32.totalorder %v6339_v52, %v1184_v59 }
0x1566   :  { %5835 = vmatmul.mubr.msk.f32.vlgmr.msra.gmra.mrb[8].mxu0 %vm151_vm5, %v1286_v58  ;;  %v6368_v60 = vsel %vm1185_vm11, 1.0, %v8832_v3  ;;  %vm5619_vm11 = vcmask 588800  }
0x1567   :  { %v1126_v5 = vrot.slane %v1112_v4, %v1110_v1  ;;  %v1130_v9 = vrot.slane %v1119_v6, %v6343_v57 }
0x1569   :  { %v1134_v8 = vrot.slane %v1126_v5, %v6343_v57 }
0x15d7   :  { %v1103_v10 = vpop.permute.xlu0 %1102  ;;  %v1095_v11 = vpop.permute.xlu1 %1094 }
0x15d8   :  { %v1138_v12 = vadd.f32 %v1134_v8, %v1103_v10  ;;  %v1137_v14 = vadd.f32 %v1130_v9, %v1095_v11  ;;  %v1437_v9 = vld [vmem:[%s8829_s7] sm:$0xf]  ;;  %s6124_s7 = smov 96  }
0x15d9   :  { %5998 = vmatprep.subr.msk.bf16.mxu0 %vm64_vm1, %v1437_v9  ;;  %v1447_v10 = vsel %vm64_vm1, %v1437_v9, 0  ;;  %v6385_v11 = vunpack.c.l.bf16 %v1437_v9 }
0x15da   :  { %vm1140_vm7 = vcmp.ge.f32.partialorder %v1138_v12, 0.0  ;;  %v1142_v16 = vmul.f32 0.01, %v1138_v12  ;;  %vm1139_vm8 = vcmp.ge.f32.partialorder %v1137_v14, 0.0  ;;  %v1141_v17 = vmul.f32 0.01, %v1137_v14  ;;  %5843 = vmatpush3.bf16.msra.mxu0 %v1447_v10 }
0x15db   :  { %8886 = vst [vmem:[#allocation5_spill] sm:$0xff] %v6385_v11 }
0x15dc   :  { %v1144_v18 = vsel %vm1140_vm7, %v1138_v12, %v1142_v16  ;;  %v1143_v19 = vsel %vm1139_vm8, %v1137_v14, %v1141_v17  ;;  %vm5611_vm7 = vcmask 457728   ;;  %vm5613_vm8 = vcmask 490496  }
0x15dd   :  { %v1149_v20 = vsel %vm1145_vm6, %v1144_v18, -inf  ;;  %v1146_v21 = vsel %vm1145_vm6, %v1143_v19, -inf }
0x15de   :  { %1150 = vmax.xlane.f32.xlu0 %v1149_v20  ;;  %1147 = vmax.xlane.f32.xlu1 %v1146_v21 }
0x1639   :  { %v1356_v45 = vpop.f32.mrb[8].mxu0 }
0x163a   :  { %v1360_v5 = vmul.f32 2.0, %v1356_v45  ;;  %v5836_v6 = vpop.f32.mrb[9].mxu0  ;;  %v6144_v45 = vmov 1934713408  }
0x163c   :  { %v1361_v8 = vsub.f32 %v1360_v5, %v6368_v60  ;;  %v1636_v5 = vunpack.c.l.s4 %v6144_v45 }
0x166b   :  { %v1151_v22 = vpop.xlane.xlu0 %1150  ;;  %v1148_v23 = vpop.xlane.xlu1 %1147 }
0x166c   :  { %v1153_v24 = vsub.f32 %v1144_v18, %v1151_v22  ;;  %v1152_v25 = vsub.f32 %v1143_v19, %v1148_v23 }
0x166e   :  { %v1156_v26 = vmul.f32 1.442695, %v1153_v24  ;;  %v1154_v27 = vmul.f32 1.442695, %v1152_v25 }
0x1670   :  { %6086 = vpow2.f32 %v1156_v26 }
0x1671   :  { %6088 = vpow2.f32 %v1154_v27 }
0x167a   :  { %v6087_v28 = vpop.eup %6086 }
0x167b   :  { %v6089_v29 = vpop.eup %6088  ;;  %1162 = vrot.lane.b32.xlu1 %v6087_v28, %s6119_s3 }
0x167c   :  { %1160 = vrot.lane.b32.xlu0 %v6089_v29, %s6119_s3 }
0x16ed   :  { %v1163_v30 = vpop.permute.xlu1 %1162 }
0x16ee   :  { %v1161_v31 = vpop.permute.xlu0 %1160  ;;  %v1169_v32 = vsel %vm151_vm5, %v1163_v30, 0.0 }
0x16ef   :  { %v1166_v33 = vsel %vm151_vm5, %v1161_v31, 0.0  ;;  %1170 = vadd.xlane.f32.xlu0 %v1169_v32 }
0x16f0   :  { %1167 = vadd.xlane.f32.xlu1 %v1166_v33 }
0x177c   :  { %v1171_v34 = vpop.xlane.xlu0 %1170 }
0x177d   :  { %6090 = vrcp.f32 %v1171_v34  ;;  %v1168_v35 = vpop.xlane.xlu1 %1167 }
0x177e   :  { %6092 = vrcp.f32 %v1168_v35 }
0x1787   :  { %v6091_v36 = vpop.eup %6090 }
0x1788   :  { %v6093_v37 = vpop.eup %6092  ;;  %v1175_v38 = vmul.f32 %v6091_v36, %v6087_v28 }
0x1789   :  { %v1174_v39 = vmul.f32 %v6093_v37, %v6089_v29 }
0x178a   :  { %v1177_v0 = vsel %vm1145_vm6, %v1175_v38, 0.0 }
0x178b   :  { %v1176_v40 = vsel %vm1145_vm6, %v1174_v39, 0.0  ;;  %vm5609_vm6 = vcmask 424960  }
0x178c   :  { %v1178_v41 = vadd.f32 %v1177_v0, %v1176_v40 }
0x178e   :  { %v1180_v42 = vmul.f32 0.5, %v1178_v41 }
0x1790   :  { %1189 = vrot.lane.b32.xlu0 %v1180_v42, %s6119_s3 }
0x1802   :  { %v1190_v7 = vpop.permute.xlu0 %1189 }
0x1803   :  { %1195 = vxpose.xlu1.b32.start.end [1/1] (short) (narrow) %v1190_v7, 8  ;;  %v1192_v43 = vsel %vm151_vm5, %v1190_v7, 0.0 }
0x1804   :  { %1193 = vadd.xlane.f32.xlu0 %v1192_v43 }
0x1883   :  { %v1211_v44 = vpop.trf.xlu1 }
0x1884   :  { %1228 = vrot.lane.b32.xlu1 %v1211_v44, %s6121_s19 }
0x1888   :  { %1500 = vrot.lane.b32.xlu1 %v6385_v11, %s6122_s0 }
0x188c   :  { %1503 = vrot.lane.b32.xlu1 %v6385_v11, %s6119_s3 }
0x1890   :  { %1506 = vrot.lane.b32.xlu1 %v6385_v11, %s6125_s23 }
0x1891   :  { %v1194_v46 = vpop.xlane.xlu0 %1193 }
0x1892   :  { %6094 = vrsqrt.f32 %v1194_v46  ;;  %vm1235_vm9 = vcmp.eq.f32.partialorder %v1194_v46, inf  ;;  %v1238_v13 = vand.u32 2147483648, %v1194_v46  ;;  %vm1237_vm10 = vcmp.eq.f32.partialorder %v1194_v46, 0.0 }
0x1893   :  { %v1242_v62 = vmul.f32 %v6368_v60, %v1194_v46 }
0x1894   :  { %1509 = vrot.lane.b32.xlu1 %v6385_v11, %s6117_s22 }
0x1898   :  { %1512 = vrot.lane.b32.xlu1 %v6385_v11, %s6128_s26 }
0x189c   :  { %v6095_v50 = vpop.eup %6094  ;;  %1518 = vrot.lane.b32.xlu1 %v6385_v11, %s6130_s28 }
0x189d   :  { %v1234_v51 = vmul.f32 %v6095_v50, %v1194_v46 }
0x189f   :  { %v1236_v53 = vsel %vm1235_vm9, %v1194_v46, %v1234_v51  ;;  %vm5615_vm9 = vcmask 523264  }
0x18a0   :  { %v1239_v54 = vsel %vm1237_vm10, %v1238_v13, %v1236_v53  ;;  %1524 = vrot.lane.b32.xlu1 %v6385_v11, %s6132_s30  ;;  %vm5617_vm10 = vcmask 556032  }
0x18a1   :  { %v1240_v55 = vadd.f32 1e-07, %v1239_v54 }
0x18a3   :  { %6096 = vrcp.f32 %v1240_v55 }
0x18a4   :  { %1530 = vrot.lane.b32.xlu1 %v6385_v11, %s6134_s11 }
0x18a8   :  { %1536 = vrot.lane.b32.xlu1 %v6385_v11, %s6136_s13 }
0x18ac   :  { %1542 = vrot.lane.b32.xlu1 %v6385_v11, %s6138_s15 }
0x18ad   :  { %v6097_v56 = vpop.eup %6096 }
0x18b0   :  { %1548 = vrot.lane.b32.xlu1 %v6385_v11, %s6139_s16 }
0x18b4   :  { %1554 = vrot.lane.b32.xlu1 %v6385_v11, %s6140_s5 }
0x18b8   :  { %1560 = vrot.lane.b32.xlu1 %v6385_v11, %s6141_s17 }
0x18bc   :  { %1566 = vrot.lane.b32.xlu1 %v6385_v11, %s6142_s18 }
0x18f6   :  { %v1229_v47 = vpop.permute.xlu1 %1228 }
0x18f7   :  { %v1231_v48 = vadd.f32 %v1229_v47, %v1180_v42 }
0x18f9   :  { %v1232_v49 = vmul.f32 0.5, %v1231_v48 }
0x18fa   :  { %v6483_v23 = vpop.permute.xlu1 %1500 }
0x18fb   :  { %1244 = vrot.lane.b32.xlu0 %v1232_v49, %s6119_s3  ;;  %8889 = vst [vmem:[#allocation8_spill] sm:$0xff] %v6483_v23 }
0x18fe   :  { %v6493_v24 = vpop.permute.xlu1 %1503 }
0x18ff   :  { %8890 = vst [vmem:[#allocation9_spill] sm:$0xff] %v6493_v24 }
0x1902   :  { %v6499_v25 = vpop.permute.xlu1 %1506 }
0x1903   :  { %8891 = vst [vmem:[#allocation10_spill] sm:$0xff] %v6499_v25 }
0x1906   :  { %v6509_v26 = vpop.permute.xlu1 %1509 }
0x1907   :  { %8892 = vst [vmem:[#allocation11_spill] sm:$0xff] %v6509_v26 }
0x190a   :  { %v6515_v27 = vpop.permute.xlu1 %1512 }
0x190b   :  { %8893 = vst [vmem:[#allocation12_spill] sm:$0xff] %v6515_v27 }
0x190e   :  { %v6523_v29 = vpop.permute.xlu1 %1518 }
0x190f   :  { %8895 = vst [vmem:[#allocation14_spill] sm:$0xff] %v6523_v29 }
0x1912   :  { %v6535_v31 = vpop.permute.xlu1 %1524 }
0x1913   :  { %8897 = vst [vmem:[#allocation16_spill] sm:$0xff] %v6535_v31 }
0x1916   :  { %v6543_v33 = vpop.permute.xlu1 %1530 }
0x1917   :  { %8899 = vst [vmem:[#allocation18_spill] sm:$0xff] %v6543_v33 }
0x1919   :  { %1249 = vxpose.xlu0.b32.start.end [1/1] (short) (narrow) %v6097_v56, 8 }
0x191a   :  { %v6555_v35 = vpop.permute.xlu1 %1536 }
0x191b   :  { %8901 = vst [vmem:[#allocation20_spill] sm:$0xff] %v6555_v35 }
0x191e   :  { %v6563_v37 = vpop.permute.xlu1 %1542 }
0x191f   :  { %8903 = vst [vmem:[#allocation22_spill] sm:$0xff] %v6563_v37 }
0x1922   :  { %v6571_v39 = vpop.permute.xlu1 %1548 }
0x1923   :  { %8905 = vst [vmem:[#allocation24_spill] sm:$0xff] %v6571_v39 }
0x1926   :  { %v6583_v40 = vpop.permute.xlu1 %1554 }
0x1927   :  { %8907 = vst [vmem:[#allocation26_spill] sm:$0xff] %v6583_v40 }
0x192a   :  { %v6591_v42 = vpop.permute.xlu1 %1560 }
0x192b   :  { %8909 = vst [vmem:[#allocation28_spill] sm:$0xff] %v6591_v42 }
0x192e   :  { %v6603_v43 = vpop.permute.xlu1 %1566 }
0x192f   :  { %8911 = vst [vmem:[#allocation30_spill] sm:$0xff] %v6603_v43 }
0x1942   :  { %1515 = vrot.lane.b32.xlu0 %v6385_v11, %s6123_s21 }
0x1946   :  { %1521 = vrot.lane.b32.xlu0 %v6385_v11, %s6124_s7 }
0x194a   :  { %1527 = vrot.lane.b32.xlu0 %v6385_v11, %s6126_s24 }
0x194e   :  { %1533 = vrot.lane.b32.xlu0 %v6385_v11, %s6127_s25 }
0x1952   :  { %1539 = vrot.lane.b32.xlu0 %v6385_v11, %s6129_s27 }
0x1956   :  { %1545 = vrot.lane.b32.xlu0 %v6385_v11, %s6131_s29 }
0x195a   :  { %1551 = vrot.lane.b32.xlu0 %v6385_v11, %s6133_s10 }
0x195e   :  { %1557 = vrot.lane.b32.xlu0 %v6385_v11, %s6135_s12 }
0x1962   :  { %1563 = vrot.lane.b32.xlu0 %v6385_v11, %s6137_s14 }
0x196d   :  { %v1245_v61 = vpop.permute.xlu0 %1244 }
0x196e   :  { %v1247_v63 = vsub.f32 %v1242_v62, %v1245_v61 }
0x1970   :  { %v1248_v1 = vmul.f32 %v6097_v56, %v1247_v63 }
0x1999   :  { %v1265_v15 = vpop.trf.xlu0 }
0x199a   :  { %v1284_v2 = vrot.slane %v1265_v15, %v6343_v57  ;;  %v1438_v57 = vpack.c.bf16 %v1361_v8, %v1286_v58 }
0x199c   :  { %v6372_v4 = vmul.f32 %v1284_v2, %v1248_v1  ;;  %5844 = vmatprep.mubr.msk.bf16.mxu0 %vm151_vm5, %v1438_v57 }
0x199e   :  { %5838 = vmatpush3.msra.mxu1 %v6372_v4 }
0x199f   :  { %5840 = vmatmul.mubr.msk.f32.vlgmr.msra.gmra.mrb[10].mxu1 %vm151_vm5, %v6372_v4 }
0x19a0   :  { %5854 = vmatprep.mubr.msk.f32.mxu1 %vm6115_vm0, %v8832_v3 }
0x19b4   :  { %v6521_v28 = vpop.permute.xlu0 %1515 }
0x19b5   :  { %8894 = vst [vmem:[#allocation13_spill] sm:$0xff] %v6521_v28 }
0x19b8   :  { %v6533_v30 = vpop.permute.xlu0 %1521 }
0x19b9   :  { %8896 = vst [vmem:[#allocation15_spill] sm:$0xff] %v6533_v30 }
0x19bc   :  { %v6541_v32 = vpop.permute.xlu0 %1527 }
0x19bd   :  { %8898 = vst [vmem:[#allocation17_spill] sm:$0xff] %v6541_v32 }
0x19c0   :  { %v6553_v34 = vpop.permute.xlu0 %1533 }
0x19c1   :  { %8900 = vst [vmem:[#allocation19_spill] sm:$0xff] %v6553_v34 }
0x19c4   :  { %v6561_v36 = vpop.permute.xlu0 %1539 }
0x19c5   :  { %8902 = vst [vmem:[#allocation21_spill] sm:$0xff] %v6561_v36 }
0x19c8   :  { %v6569_v38 = vpop.permute.xlu0 %1545 }
0x19c9   :  { %8904 = vst [vmem:[#allocation23_spill] sm:$0xff] %v6569_v38 }
0x19cc   :  { %v6581_v0 = vpop.permute.xlu0 %1551 }
0x19cd   :  { %8906 = vst [vmem:[#allocation25_spill] sm:$0xff] %v6581_v0 }
0x19d0   :  { %v6589_v41 = vpop.permute.xlu0 %1557 }
0x19d1   :  { %8908 = vst [vmem:[#allocation27_spill] sm:$0xff] %v6589_v41 }
0x19d4   :  { %v6601_v7 = vpop.permute.xlu0 %1563 }
0x19d5   :  { %8910 = vst [vmem:[#allocation29_spill] sm:$0xff] %v6601_v7 }
0x1a72   :  { %v1431_v12 = vpop.f32.mrb[10].mxu1 }
0x1a73   :  { %v1435_v14 = vmul.f32 2.0, %v1431_v12  ;;  %v5841_v16 = vpop.f32.mrb[11].mxu1 }
0x1a75   :  { %v1436_v17 = vsub.f32 %v1435_v14, %v6368_v60  ;;  %v6143_v60 = vmov 1983009808  }
0x1a76   :  { %v1572_v61 = vunpack.c.l.s4 %v6143_v60 }
0x1a77   :  { %v1439_v18 = vpack.c.bf16 %v1436_v17, %v6372_v4  ;;  %v1637_v17 = vunpack.c.0.s8 %v1636_v5 }
0x1a78   :  { %v1573_v15 = vunpack.c.0.s8 %v1572_v61 }
0x1a79   :  { %5845 = vmatmul.mubr.msk.bf16.vlgmr.msra.gmra.mrb[12].mxu0 %vm151_vm5, %v1439_v18  ;;  %v6722_v7 = vsub.s32 %v1637_v17, %v6339_v52 }
0x1a7a   :  { %5869 = vmatprep.mubr.msk.f32.mxu0 %vm6115_vm0, %v8832_v3  ;;  %v6676_v6 = vsub.s32 %v1573_v15, %v6339_v52 }
0x1b4c   :  { %v6439_v19 = vpop.f32.mrb[12].mxu0 }
0x1b4d   :  { %2937 = vrot.lane.b32.xlu1 %v6439_v19, %s6119_s3  ;;  %2934 = vrot.lane.b32.xlu0 %v6439_v19, %s6122_s0  ;;  %v6445_v20 = vpop.f32.mrb[13].mxu0 }
0x1b4e   :  { %v6447_v21 = vpop.f32.mrb[14].mxu0 }
0x1b4f   :  { %8887 = vst [vmem:[#allocation6_spill] sm:$0xff] %v6447_v21  ;;  %v6449_v22 = vpop.f32.mrb[15].mxu0 }
0x1b50   :  { %8888 = vst [vmem:[#allocation7_spill] sm:$0xff] %v6449_v22 }
0x1b51   :  { %2943 = vrot.lane.b32.xlu1 %v6439_v19, %s6117_s22  ;;  %2940 = vrot.lane.b32.xlu0 %v6439_v19, %s6125_s23 }
0x1b55   :  { %2949 = vrot.lane.b32.xlu1 %v6439_v19, %s6123_s21  ;;  %2946 = vrot.lane.b32.xlu0 %v6439_v19, %s6128_s26 }
0x1b59   :  { %2958 = vrot.lane.b32.xlu1 %v6439_v19, %s6132_s30  ;;  %2952 = vrot.lane.b32.xlu0 %v6439_v19, %s6130_s28 }
0x1b5d   :  { %2964 = vrot.lane.b32.xlu1 %v6439_v19, %s6134_s11  ;;  %2955 = vrot.lane.b32.xlu0 %v6439_v19, %s6124_s7 }
0x1b61   :  { %2970 = vrot.lane.b32.xlu1 %v6439_v19, %s6136_s13  ;;  %2961 = vrot.lane.b32.xlu0 %v6439_v19, %s6126_s24 }
0x1b65   :  { %2976 = vrot.lane.b32.xlu1 %v6439_v19, %s6138_s15  ;;  %2967 = vrot.lane.b32.xlu0 %v6439_v19, %s6127_s25 }
0x1b69   :  { %2982 = vrot.lane.b32.xlu1 %v6439_v19, %s6139_s16  ;;  %2973 = vrot.lane.b32.xlu0 %v6439_v19, %s6129_s27 }
0x1b6d   :  { %2988 = vrot.lane.b32.xlu1 %v6439_v19, %s6140_s5  ;;  %2979 = vrot.lane.b32.xlu0 %v6439_v19, %s6131_s29 }
0x1b71   :  { %2994 = vrot.lane.b32.xlu1 %v6439_v19, %s6141_s17  ;;  %2985 = vrot.lane.b32.xlu0 %v6439_v19, %s6133_s10 }
0x1b75   :  { %3000 = vrot.lane.b32.xlu1 %v6439_v19, %s6142_s18  ;;  %2991 = vrot.lane.b32.xlu0 %v6439_v19, %s6135_s12 }
0x1b79   :  { %2997 = vrot.lane.b32.xlu0 %v6439_v19, %s6137_s14  ;;  %1978 = vrot.lane.b32.xlu1 %v6445_v20, %s6122_s0 }
0x1b7d   :  { %1981 = vrot.lane.b32.xlu0 %v6445_v20, %s6119_s3  ;;  %1984 = vrot.lane.b32.xlu1 %v6445_v20, %s6125_s23 }
0x1b81   :  { %1999 = vrot.lane.b32.xlu0 %v6445_v20, %s6124_s7  ;;  %1987 = vrot.lane.b32.xlu1 %v6445_v20, %s6117_s22 }
0x1b85   :  { %2005 = vrot.lane.b32.xlu0 %v6445_v20, %s6126_s24  ;;  %1990 = vrot.lane.b32.xlu1 %v6445_v20, %s6128_s26 }
0x1b89   :  { %2011 = vrot.lane.b32.xlu0 %v6445_v20, %s6127_s25  ;;  %1993 = vrot.lane.b32.xlu1 %v6445_v20, %s6123_s21 }
0x1b8d   :  { %2017 = vrot.lane.b32.xlu0 %v6445_v20, %s6129_s27  ;;  %1996 = vrot.lane.b32.xlu1 %v6445_v20, %s6130_s28 }
0x1b91   :  { %2023 = vrot.lane.b32.xlu0 %v6445_v20, %s6131_s29  ;;  %2002 = vrot.lane.b32.xlu1 %v6445_v20, %s6132_s30 }
0x1b95   :  { %2029 = vrot.lane.b32.xlu0 %v6445_v20, %s6133_s10  ;;  %2008 = vrot.lane.b32.xlu1 %v6445_v20, %s6134_s11 }
0x1b99   :  { %2035 = vrot.lane.b32.xlu0 %v6445_v20, %s6135_s12  ;;  %2014 = vrot.lane.b32.xlu1 %v6445_v20, %s6136_s13 }
0x1b9d   :  { %2041 = vrot.lane.b32.xlu0 %v6445_v20, %s6137_s14  ;;  %2020 = vrot.lane.b32.xlu1 %v6445_v20, %s6138_s15 }
0x1ba1   :  { %2026 = vrot.lane.b32.xlu1 %v6445_v20, %s6139_s16  ;;  %3415 = vrot.lane.b32.xlu0 %v6447_v21, %s6119_s3 }
0x1ba5   :  { %2032 = vrot.lane.b32.xlu1 %v6445_v20, %s6140_s5  ;;  %3421 = vrot.lane.b32.xlu0 %v6447_v21, %s6117_s22 }
0x1ba9   :  { %2038 = vrot.lane.b32.xlu1 %v6445_v20, %s6141_s17  ;;  %3427 = vrot.lane.b32.xlu0 %v6447_v21, %s6123_s21 }
0x1bad   :  { %2044 = vrot.lane.b32.xlu1 %v6445_v20, %s6142_s18  ;;  %3433 = vrot.lane.b32.xlu0 %v6447_v21, %s6124_s7 }
0x1bb1   :  { %3439 = vrot.lane.b32.xlu0 %v6447_v21, %s6126_s24  ;;  %3412 = vrot.lane.b32.xlu1 %v6447_v21, %s6122_s0 }
0x1bb5   :  { %3445 = vrot.lane.b32.xlu0 %v6447_v21, %s6127_s25  ;;  %3418 = vrot.lane.b32.xlu1 %v6447_v21, %s6125_s23 }
0x1bb9   :  { %3451 = vrot.lane.b32.xlu0 %v6447_v21, %s6129_s27  ;;  %3424 = vrot.lane.b32.xlu1 %v6447_v21, %s6128_s26 }
0x1bbd   :  { %3457 = vrot.lane.b32.xlu0 %v6447_v21, %s6131_s29  ;;  %3430 = vrot.lane.b32.xlu1 %v6447_v21, %s6130_s28 }
0x1bbf   :  { %v6609_v44 = vpop.permute.xlu0 %2934  ;;  %v6611_v46 = vpop.permute.xlu1 %2937 }
0x1bc0   :  { %v3003_v10 = vcombine.low %v6439_v19, %v6611_v46 }
0x1bc1   :  { %3463 = vrot.lane.b32.xlu0 %v6447_v21, %s6133_s10  ;;  %3436 = vrot.lane.b32.xlu1 %v6447_v21, %s6132_s30 }
0x1bc3   :  { %v6617_v47 = vpop.permute.xlu0 %2940  ;;  %v6619_v48 = vpop.permute.xlu1 %2943 }
0x1bc4   :  { %v3019_v8 = vcombine.low %v6609_v44, %v6617_v47 }
0x1bc5   :  { %3469 = vrot.lane.b32.xlu0 %v6447_v21, %s6135_s12  ;;  %3442 = vrot.lane.b32.xlu1 %v6447_v21, %s6134_s11 }
0x1bc6   :  { %v6695_v61 = vrot.slane %v3019_v8, %v6676_v6 }
0x1bc7   :  { %v6625_v49 = vpop.permute.xlu0 %2946  ;;  %v6627_v50 = vpop.permute.xlu1 %2949 }
0x1bc8   :  { %v3035_v9 = vcombine.low %v6619_v48, %v6627_v50 }
0x1bc9   :  { %3475 = vrot.lane.b32.xlu0 %v6447_v21, %s6137_s14  ;;  %3448 = vrot.lane.b32.xlu1 %v6447_v21, %s6136_s13 }
0x1bca   :  { %v6698_v15 = vrot.slane %v3035_v9, %v6676_v6  ;;  %v6715_v9 = vrot.slane %v3003_v10, %v6676_v6 }
0x1bcb   :  { %v6633_v51 = vpop.permute.xlu0 %2952  ;;  %v6635_v53 = vpop.permute.xlu1 %2958 }
0x1bcc   :  { %v3051_v1 = vcombine.low %v6625_v49, %v6633_v51  ;;  %v3067_v10 = vcombine.low %v6715_v9, %v6695_v61 }
0x1bcd   :  { %3454 = vrot.lane.b32.xlu1 %v6447_v21, %s6138_s15  ;;  %2471 = vrot.lane.b32.xlu0 %v6449_v22, %s6123_s21 }
0x1bce   :  { %v6690_v12 = vrot.slane %v3051_v1, %v6676_v6 }
0x1bcf   :  { %v6641_v13 = vpop.permute.xlu0 %2955  ;;  %v6643_v54 = vpop.permute.xlu1 %2964 }
0x1bd0   :  { %v3099_v3 = vcombine.low %v6698_v15, %v6690_v12  ;;  %v3155_v42 = vcombine.low %v6635_v53, %v6643_v54 }
0x1bd1   :  { %3460 = vrot.lane.b32.xlu1 %v6447_v21, %s6139_s16  ;;  %2477 = vrot.lane.b32.xlu0 %v6449_v22, %s6124_s7 }
0x1bd2   :  { %v6742_v38 = vrot.slane %v3155_v42, %v6676_v6 }
0x1bd3   :  { %v6649_v55 = vpop.permute.xlu0 %2961  ;;  %v6651_v56 = vpop.permute.xlu1 %2970 }
0x1bd4   :  { %v3139_v45 = vcombine.low %v6641_v13, %v6649_v55 }
0x1bd5   :  { %3466 = vrot.lane.b32.xlu1 %v6447_v21, %s6140_s5  ;;  %2483 = vrot.lane.b32.xlu0 %v6449_v22, %s6126_s24 }
0x1bd6   :  { %v6732_v39 = vrot.slane %v3139_v45, %v6676_v6  ;;  %v6747_v45 = vrot.slane %v3099_v3, %v6722_v7  ;;  %v6762_v3 = vrot.slane %v3067_v10, %v6722_v7 }
0x1bd7   :  { %v6657_v58 = vpop.permute.xlu0 %2967  ;;  %v6659_v59 = vpop.permute.xlu1 %2976 }
0x1bd8   :  { %v3187_v1 = vcombine.low %v6651_v56, %v6659_v59 }
0x1bd9   :  { %2489 = vrot.lane.b32.xlu0 %v6449_v22, %s6127_s25  ;;  %3472 = vrot.lane.b32.xlu1 %v6447_v21, %s6141_s17 }
0x1bda   :  { %v6739_v52 = vrot.slane %v3187_v1, %v6676_v6  ;;  %v3203_v1 = vcombine.low %v6732_v39, %v6742_v38 }
0x1bdb   :  { %v6665_v62 = vpop.permute.xlu0 %2973  ;;  %v6667_v63 = vpop.permute.xlu1 %2982 }
0x1bdc   :  { %v3171_v18 = vcombine.low %v6657_v58, %v6665_v62 }
0x1bdd   :  { %2495 = vrot.lane.b32.xlu0 %v6449_v22, %s6129_s27  ;;  %3478 = vrot.lane.b32.xlu1 %v6447_v21, %s6142_s18 }
0x1bdf   :  { %v2980_v2 = vpop.permute.xlu0 %2979  ;;  %v2989_v4 = vpop.permute.xlu1 %2988 }
0x1be0   :  { %v3292_v57 = vcombine.high %v6667_v63, %v2989_v4 }
0x1be1   :  { %2501 = vrot.lane.b32.xlu0 %v6449_v22, %s6131_s29  ;;  %2456 = vrot.lane.b32.xlu1 %v6449_v22, %s6122_s0 }
0x1be2   :  { %v6709_v5 = vrot.slane %v3292_v57, %v6676_v6  ;;  %v6725_v57 = vrot.slane %v3171_v18, %v6676_v6 }
0x1be3   :  { %v2986_v14 = vpop.permute.xlu0 %2985  ;;  %v2995_v16 = vpop.permute.xlu1 %2994 }
0x1be4   :  { %v3276_v60 = vcombine.high %v2980_v2, %v2986_v14  ;;  %v3275_v40 = vcombine.low %v2980_v2, %v2986_v14  ;;  %v3235_v2 = vcombine.low %v6725_v57, %v6739_v52  ;;  %v3291_v14 = vcombine.low %v6667_v63, %v2989_v4 }
0x1be5   :  { %2507 = vrot.lane.b32.xlu0 %v6449_v22, %s6133_s10  ;;  %2459 = vrot.lane.b32.xlu1 %v6449_v22, %s6119_s3  ;;  %s6146_s3 = smov 4  }
0x1be6   :  { %v6712_v8 = vrot.slane %v3276_v60, %v6676_v6  ;;  %v6783_v10 = vrot.slane %v3291_v14, %v6676_v6  ;;  %v6798_v14 = vrot.slane %v3203_v1, %v6722_v7  ;;  %v3068_v1 = vcombine.high %v6715_v9, %v6695_v61 }
0x1be7   :  { %v2992_v43 = vpop.permute.xlu0 %2991  ;;  %v3001_v41 = vpop.permute.xlu1 %3000  ;;  %v3236_v61 = vcombine.high %v6725_v57, %v6739_v52  ;;  %v3004_v57 = vcombine.high %v6439_v19, %v6611_v46 }
0x1be8   :  { %v3356_v60 = vcombine.high %v6712_v8, %v6709_v5  ;;  %v3323_v17 = vcombine.low %v2995_v16, %v3001_v41  ;;  %v3324_v18 = vcombine.high %v2995_v16, %v3001_v41  ;;  %v6755_v41 = vrot.slane %v3275_v40, %v6676_v6 }
0x1be9   :  { %2513 = vrot.lane.b32.xlu0 %v6449_v22, %s6135_s12  ;;  %2462 = vrot.lane.b32.xlu1 %v6449_v22, %s6125_s23  ;;  %v3131_v16 = vcombine.low %v6762_v3, %v6747_v45 }
0x1bea   :  { %v6765_v42 = vrot.slane %v3323_v17, %v6676_v6 }
0x1beb   :  { %v2998_v0 = vpop.permute.xlu0 %2997  ;;  %v6744_v35 = vpop.permute.xlu1 %1978 }
0x1bec   :  { %v3307_v37 = vcombine.low %v2992_v43, %v2998_v0  ;;  %v3308_v34 = vcombine.high %v2992_v43, %v2998_v0  ;;  %v6768_v0 = vrot.slane %v3324_v18, %v6676_v6  ;;  %v6790_v18 = vrot.slane %v3235_v2, %v6722_v7 }
0x1bed   :  { %2519 = vrot.lane.b32.xlu0 %v6449_v22, %s6137_s14  ;;  %2465 = vrot.lane.b32.xlu1 %v6449_v22, %s6117_s22  ;;  %s6145_s22 = smov 12   ;;  %v3100_v2 = vcombine.high %v6698_v15, %v6690_v12  ;;  %v3036_v15 = vcombine.high %v6619_v48, %v6627_v50  ;;  %v3172_v48 = vcombine.high %v6657_v58, %v6665_v62 }
0x1bee   :  { %v6771_v43 = vrot.slane %v3307_v37, %v6676_v6  ;;  %v6774_v40 = vrot.slane %v3308_v34, %v6676_v6  ;;  %v3339_v34 = vcombine.low %v6755_v41, %v6783_v10  ;;  %v3267_v30 = vcombine.low %v6798_v14, %v6790_v18 }
0x1bef   :  { %v6776_v63 = vpop.permute.xlu0 %1981  ;;  %v6778_v4 = vpop.permute.xlu1 %1984  ;;  %v6840_v9 = vrot.slane %v3100_v2, %v6722_v7  ;;  %v6870_v50 = vrot.slane %v3236_v61, %v6722_v7  ;;  %v3050_v46 = vrot.slane %v3036_v15, %v6676_v6  ;;  %v3140_v58 = vcombine.high %v6641_v13, %v6649_v55 }
0x1bf0   :  { %v3371_v17 = vcombine.low %v6771_v43, %v6765_v42  ;;  %v3388_v37 = vcombine.high %v6774_v40, %v6768_v0  ;;  %v3188_v62 = vcombine.high %v6651_v56, %v6659_v59  ;;  %v3018_v2 = vrot.slane %v3004_v57, %v6676_v6 }
0x1bf1   :  { %2468 = vrot.lane.b32.xlu1 %v6449_v22, %s6128_s26  ;;  %4105 = vrot.lane.b32.xlu0 %v3131_v16, %s6145_s22  ;;  %v6815_v16 = vrot.slane %v3356_v60, %v6722_v7  ;;  %v3052_v60 = vcombine.high %v6625_v49, %v6633_v51  ;;  %v3204_v49 = vcombine.high %v6732_v39, %v6742_v38  ;;  %s6151_s26 = smov 28  }
0x1bf2   :  { %v6801_v36 = vrot.slane %v3388_v37, %v6722_v7  ;;  %v6812_v32 = vrot.slane %v3371_v17, %v6722_v7  ;;  %v6823_v37 = vrot.slane %v3339_v34, %v6722_v7  ;;  %v3020_v34 = vcombine.high %v6609_v44, %v6617_v47 }
0x1bf3   :  { %v6803_v31 = vpop.permute.xlu0 %1999  ;;  %v6805_v33 = vpop.permute.xlu1 %1987  ;;  %8913 = vst [vmem:[#allocation32_spill] sm:$0xff] %v6815_v16  ;;  %v6852_v51 = vrot.slane %v3068_v1, %v6722_v7  ;;  %v6857_v52 = vrot.slane %v3052_v60, %v6676_v6  ;;  %v3372_v38 = vcombine.high %v6771_v43, %v6765_v42  ;;  %v3340_v42 = vcombine.high %v6755_v41, %v6783_v10 }
0x1bf4   :  { %8912 = vst [vmem:[#allocation31_spill] sm:$0xff] %v6801_v36  ;;  %v6873_v19 = vrot.slane %v3020_v34, %v6676_v6  ;;  %v6886_v43 = vrot.slane %v3204_v49, %v6722_v7  ;;  %v3156_v13 = vcombine.high %v6635_v53, %v6643_v54  ;;  %v3186_v55 = vrot.slane %v3172_v48, %v6676_v6 }
0x1bf5   :  { %2474 = vrot.lane.b32.xlu1 %v6449_v22, %s6130_s28  ;;  %4107 = vrot.lane.b32.xlu0 %v3267_v30, %s6145_s22  ;;  %v3403_v30 = vcombine.low %v6823_v37, %v6812_v32  ;;  %v3133_v39 = vcombine.low %v6852_v51, %v6840_v9  ;;  %v3115_v1 = vcombine.low %v3050_v46, %v6857_v52 }
0x1bf6   :  { %v3269_v56 = vcombine.low %v6886_v43, %v6870_v50  ;;  %v6900_v59 = vrot.slane %v3372_v38, %v6722_v7  ;;  %v3083_v41 = vcombine.low %v3018_v2, %v6873_v19  ;;  %v3154_v10 = vrot.slane %v3140_v58, %v6676_v6 }
0x1bf7   :  { %v6831_v17 = vpop.permute.xlu0 %2005  ;;  %v6833_v27 = vpop.permute.xlu1 %1990  ;;  %v3202_v61 = vrot.slane %v3188_v62, %v6676_v6  ;;  %v6909_v53 = vrot.slane %v3340_v42, %v6722_v7  ;;  %v3170_v34 = vrot.slane %v3156_v13, %v6676_v6  ;;  %v6919_v48 = vrot.slane %v3115_v1, %v6722_v7 }
0x1bf8   :  { %v3387_v42 = vcombine.low %v6774_v40, %v6768_v0  ;;  %v3116_v40 = vcombine.high %v3050_v46, %v6857_v52  ;;  %v3084_v52 = vcombine.high %v3018_v2, %v6873_v19 }
0x1bf9   :  { %2480 = vrot.lane.b32.xlu1 %v6449_v22, %s6132_s30  ;;  %4109 = vrot.lane.b32.xlu0 %v3403_v30, %s6145_s22  ;;  %v3251_v49 = vcombine.low %v3186_v55, %v3202_v61  ;;  %v3405_v57 = vcombine.low %v6909_v53, %v6900_v59  ;;  %v3219_v38 = vcombine.low %v3154_v10, %v3170_v34 }
0x1bfa   :  { %v6956_v29 = vrot.slane %v3387_v42, %v6722_v7  ;;  %v3252_v42 = vcombine.high %v3186_v55, %v3202_v61  ;;  %v6983_v2 = vrot.slane %v3116_v40, %v6722_v7 }
0x1bfb   :  { %v6859_v44 = vpop.permute.xlu0 %2011  ;;  %v6861_v47 = vpop.permute.xlu1 %1993  ;;  %v6936_v13 = vrot.slane %v3251_v49, %v6722_v7 }
0x1bfc   :  { %v2079_v46 = vcombine.low %v6805_v33, %v6861_v47 }
0x1bfd   :  { %2486 = vrot.lane.b32.xlu1 %v6449_v22, %s6134_s11  ;;  %4117 = vrot.lane.b32.xlu0 %v3133_v39, %s6145_s22  ;;  %v6925_v39 = vrot.slane %v3083_v41, %v6722_v7  ;;  %v6944_v41 = vrot.slane %v3219_v38, %v6722_v7 }
0x1bfe   :  { %v6994_v61 = vrot.slane %v2079_v46, %v6676_v6  ;;  %v2183_v46 = vcombine.low %v6803_v31, %v6831_v17 }
0x1bff   :  { %v6890_v15 = vpop.permute.xlu0 %2017  ;;  %v6892_v60 = vpop.permute.xlu1 %1996  ;;  %v3135_v1 = vcombine.low %v6925_v39, %v6919_v48  ;;  %v3271_v12 = vcombine.low %v6944_v41, %v6936_v13 }
0x1c00   :  { %v2095_v49 = vcombine.low %v6833_v27, %v6892_v60 }
0x1c01   :  { %2492 = vrot.lane.b32.xlu1 %v6449_v22, %s6136_s13  ;;  %4119 = vrot.lane.b32.xlu0 %v3269_v56, %s6145_s22  ;;  %v3355_v56 = vcombine.low %v6712_v8, %v6709_v5  ;;  %v2047_v5 = vcombine.low %v6445_v20, %v6776_v63  ;;  %v2063_v8 = vcombine.low %v6744_v35, %v6778_v4 }
0x1c02   :  { %v6976_v28 = vrot.slane %v2095_v49, %v6676_v6  ;;  %v2215_v49 = vcombine.low %v6859_v44, %v6890_v15 }
0x1c03   :  { %v6911_v54 = vpop.permute.xlu0 %2023  ;;  %v6913_v30 = vpop.permute.xlu1 %2002  ;;  %v6969_v38 = vrot.slane %v3355_v56, %v6722_v7  ;;  %v6986_v56 = vrot.slane %v2047_v5, %v6676_v6  ;;  %v6989_v55 = vrot.slane %v2063_v8, %v6676_v6  ;;  %v7007_v8 = vrot.slane %v3252_v42, %v6722_v7 }
0x1c04   :  { %v2143_v25 = vcombine.low %v6994_v61, %v6976_v28  ;;  %v7026_v24 = vrot.slane %v2215_v49, %v6676_v6  ;;  %v7041_v49 = vrot.slane %v2183_v46, %v6676_v6 }
0x1c05   :  { %2498 = vrot.lane.b32.xlu1 %v6449_v22, %s6138_s15  ;;  %4121 = vrot.lane.b32.xlu0 %v3405_v57, %s6145_s22  ;;  %v3407_v19 = vcombine.low %v6969_v38, %v6956_v29  ;;  %8916 = vst [vmem:[#allocation35_spill] sm:$0xff] %v7007_v8 }
0x1c07   :  { %v6927_v58 = vpop.permute.xlu0 %2029  ;;  %v6929_v62 = vpop.permute.xlu1 %2008 }
0x1c08   :  { %v2199_v40 = vcombine.low %v6913_v30, %v6929_v62  ;;  %v2320_v36 = vcombine.high %v6911_v54, %v6927_v58 }
0x1c09   :  { %2504 = vrot.lane.b32.xlu1 %v6449_v22, %s6139_s16  ;;  %4129 = vrot.lane.b32.xlu0 %v3135_v1, %s6145_s22 }
0x1c0b   :  { %v6946_v57 = vpop.permute.xlu0 %2035  ;;  %v6948_v0 = vpop.permute.xlu1 %2014 }
0x1c0d   :  { %2510 = vrot.lane.b32.xlu1 %v6449_v22, %s6140_s5  ;;  %4131 = vrot.lane.b32.xlu0 %v3271_v12, %s6145_s22  ;;  %v3220_v12 = vcombine.high %v3154_v10, %v3170_v34  ;;  %v7002_v10 = vrot.slane %v3084_v52, %v6722_v7  ;;  %v2111_v52 = vcombine.low %v6986_v56, %v6989_v55 }
0x1c0f   :  { %v6971_v1 = vpop.permute.xlu0 %2041  ;;  %v6973_v26 = vpop.permute.xlu1 %2020  ;;  %8914 = vst [vmem:[#allocation33_spill] sm:$0xff] %v7002_v10  ;;  %v7023_v42 = vrot.slane %v3220_v12, %v6722_v7 }
0x1c10   :  { %v2231_v23 = vcombine.low %v6948_v0, %v6973_v26 }
0x1c11   :  { %2516 = vrot.lane.b32.xlu1 %v6449_v22, %s6141_s17  ;;  %4133 = vrot.lane.b32.xlu0 %v3407_v19, %s6145_s22  ;;  %v3137_v19 = vcombine.low %v7002_v10, %v6983_v2  ;;  %8917 = vst [vmem:[#allocation36_spill] sm:$0xff] %v7023_v42  ;;  %v3273_v12 = vcombine.low %v7023_v42, %v7007_v8 }
0x1c12   :  { %v7014_v11 = vrot.slane %v2231_v23, %v6676_v6  ;;  %v7031_v23 = vrot.slane %v2199_v40, %v6676_v6  ;;  %v7046_v40 = vrot.slane %v2143_v25, %v6722_v7 }
0x1c13   :  { %v7004_v34 = vpop.permute.xlu0 %3415  ;;  %v2027_v5 = vpop.permute.xlu1 %2026 }
0x1c14   :  { %8915 = vst [vmem:[#allocation34_spill] sm:$0xff] %v7004_v34  ;;  %v2279_v34 = vcombine.low %v7026_v24, %v7014_v11 }
0x1c15   :  { %2522 = vrot.lane.b32.xlu1 %v6449_v22, %s6142_s18  ;;  %4141 = vrot.lane.b32.xlu0 %v3137_v19, %s6145_s22  ;;  %v3132_v22 = vcombine.high %v6762_v3, %v6747_v45  ;;  %v7050_v19 = vrot.slane %v2111_v52, %v6722_v7  ;;  %v7053_v45 = vrot.slane %v2320_v36, %v6676_v6 }
0x1c16   :  { %v2247_v3 = vcombine.low %v7041_v49, %v7031_v23  ;;  %v2319_v52 = vcombine.low %v6911_v54, %v6927_v58 }
0x1c17   :  { %v7034_v16 = vpop.permute.xlu0 %3421  ;;  %v2033_v21 = vpop.permute.xlu1 %2032  ;;  %8918 = vst [vmem:[#allocation37_spill] sm:$0xff] %v7050_v19 }
0x1c18   :  { %v2336_v10 = vcombine.high %v2027_v5, %v2033_v21  ;;  %v2335_v46 = vcombine.low %v2027_v5, %v2033_v21  ;;  %v2175_v21 = vcombine.low %v7050_v19, %v7046_v40  ;;  %v2351_v5 = vcombine.low %v6946_v57, %v6971_v1 }
0x1c19   :  { %4111 = vrot.lane.b32.xlu1 %v3132_v22, %s6145_s22  ;;  %4143 = vrot.lane.b32.xlu0 %v3273_v12, %s6145_s22  ;;  %v3268_v22 = vcombine.high %v6798_v14, %v6790_v18  ;;  %v2352_v18 = vcombine.high %v6946_v57, %v6971_v1  ;;  %v7084_v54 = vrot.slane %v2247_v3, %v6722_v7 }
0x1c1a   :  { %v7058_v42 = vrot.slane %v2336_v10, %v6676_v6  ;;  %v7072_v10 = vrot.slane %v2279_v34, %v6722_v7  ;;  %v7080_v14 = vrot.slane %v2335_v46, %v6676_v6  ;;  %v3404_v12 = vcombine.high %v6823_v37, %v6812_v32 }
0x1c1b   :  { %v7061_v8 = vpop.permute.xlu0 %3427  ;;  %v2039_v25 = vpop.permute.xlu1 %2038  ;;  %v2359_v46 = vrot.slane %v2351_v5, %v6676_v6  ;;  %v7098_v3 = vrot.slane %v2352_v18, %v6676_v6  ;;  %v3134_v5 = vcombine.high %v6852_v51, %v6840_v9  ;;  %v2144_v18 = vcombine.high %v6994_v61, %v6976_v28 }
0x1c1c   :  { %v2400_v36 = vcombine.high %v7053_v45, %v7058_v42  ;;  %v2311_v1 = vcombine.low %v7084_v54, %v7072_v10  ;;  %v2096_v28 = vcombine.high %v6833_v27, %v6892_v60  ;;  %v2048_v27 = vcombine.high %v6445_v20, %v6776_v63 }
0x1c1d   :  { %4113 = vrot.lane.b32.xlu1 %v3268_v22, %s6145_s22  ;;  %3913 = vrot.lane.b32.xlu0 %v2175_v21, %s6146_s3  ;;  %v7091_v22 = vrot.slane %v2319_v52, %v6676_v6  ;;  %v2064_v60 = vcombine.high %v6744_v35, %v6778_v4  ;;  %v3406_v4 = vcombine.high %v6909_v53, %v6900_v59 }
0x1c1e   :  { %v7165_v35 = vrot.slane %v2096_v28, %v6676_v6  ;;  %v2200_v59 = vcombine.high %v6913_v30, %v6929_v62 }
0x1c1f   :  { %v7086_v58 = vpop.permute.xlu0 %3433  ;;  %v2045_v34 = vpop.permute.xlu1 %2044  ;;  %v2383_v21 = vcombine.low %v7091_v22, %v7080_v14  ;;  %v2384_v53 = vcombine.high %v7091_v22, %v7080_v14 }
0x1c20   :  { %v2367_v19 = vcombine.low %v2039_v25, %v2045_v34  ;;  %v2368_v57 = vcombine.high %v2039_v25, %v2045_v34 }
0x1c21   :  { %4115 = vrot.lane.b32.xlu1 %v3404_v12, %s6145_s22  ;;  %3915 = vrot.lane.b32.xlu0 %v2311_v1, %s6146_s3 }
0x1c22   :  { %v2375_v32 = vrot.slane %v2367_v19, %v6676_v6  ;;  %v7104_v37 = vrot.slane %v2368_v57, %v6676_v6  ;;  %v2112_v19 = vcombine.high %v6986_v56, %v6989_v55  ;;  %v7121_v57 = vrot.slane %v2383_v21, %v6722_v7 }
0x1c23   :  { %v7107_v25 = vpop.permute.xlu0 %3439  ;;  %v7109_v52 = vpop.permute.xlu1 %3412  ;;  %v2280_v56 = vcombine.high %v7026_v24, %v7014_v11  ;;  %v7142_v21 = vrot.slane %v2144_v18, %v6722_v7  ;;  %v2248_v11 = vcombine.high %v7041_v49, %v7031_v23  ;;  %v7181_v18 = vrot.slane %v2048_v27, %v6676_v6 }
0x1c24   :  { %v2415_v34 = vcombine.low %v2359_v46, %v2375_v32  ;;  %v2432_v12 = vcombine.high %v7098_v3, %v7104_v37  ;;  %v7158_v24 = vrot.slane %v2112_v19, %v6722_v7  ;;  %v2416_v23 = vcombine.high %v2359_v46, %v2375_v32 }
0x1c25   :  { %4123 = vrot.lane.b32.xlu1 %v3134_v5, %s6145_s22  ;;  %v3270_v5 = vcombine.high %v6886_v43, %v6870_v50  ;;  %v2080_v50 = vcombine.high %v6805_v33, %v6861_v47  ;;  %v2232_v47 = vcombine.high %v6948_v0, %v6973_v26  ;;  %v2216_v26 = vcombine.high %v6859_v44, %v6890_v15 }
0x1c26   :  { %v7124_v1 = vrot.slane %v2415_v34, %v6722_v7  ;;  %v7127_v9 = vrot.slane %v2432_v12, %v6722_v7  ;;  %v7145_v34 = vrot.slane %v2400_v36, %v6722_v7  ;;  %v2177_v49 = vcombine.low %v7158_v24, %v7142_v21 }
0x1c27   :  { %v7131_v51 = vpop.permute.xlu0 %3445  ;;  %v7133_v61 = vpop.permute.xlu1 %3418  ;;  %v7178_v36 = vrot.slane %v2280_v56, %v6722_v7  ;;  %v7184_v12 = vrot.slane %v2064_v60, %v6676_v6  ;;  %v2094_v19 = vrot.slane %v2080_v50, %v6676_v6  ;;  %v7196_v0 = vrot.slane %v2248_v11, %v6722_v7 }
0x1c28   :  { %8919 = vst [vmem:[#allocation38_spill] sm:$0xff] %v7127_v9  ;;  %v2447_v55 = vcombine.low %v7121_v57, %v7124_v1  ;;  %8920 = vst [vmem:[#allocation39_spill] sm:$0xff] %v7145_v34  ;;  %v2184_v46 = vcombine.high %v6803_v31, %v6831_v17  ;;  %v3136_v44 = vcombine.high %v6925_v39, %v6919_v48 }
0x1c29   :  { %4125 = vrot.lane.b32.xlu1 %v3270_v5, %s6145_s22  ;;  %v2159_v15 = vcombine.low %v2094_v19, %v7165_v35  ;;  %v7208_v30 = vrot.slane %v2232_v47, %v6676_v6  ;;  %v2313_v62 = vcombine.low %v7196_v0, %v7178_v36  ;;  %v7213_v14 = vrot.slane %v2416_v23, %v6722_v7 }
0x1c2a   :  { %3917 = vrot.lane.b32.xlu0 %v2447_v55, %s6146_s3  ;;  %v2127_v31 = vcombine.low %v7181_v18, %v7184_v12  ;;  %v2230_v17 = vrot.slane %v2216_v26, %v6676_v6  ;;  %v7220_v48 = vrot.slane %v2200_v59, %v6676_v6  ;;  %v7224_v39 = vrot.slane %v2384_v53, %v6722_v7 }
0x1c2b   :  { %v7167_v33 = vpop.permute.xlu0 %3451  ;;  %v7169_v63 = vpop.permute.xlu1 %3424  ;;  %v3272_v56 = vcombine.high %v6944_v41, %v6936_v13  ;;  %v2198_v55 = vrot.slane %v2184_v46, %v6676_v6  ;;  %v7237_v50 = vrot.slane %v2159_v15, %v6722_v7  ;;  %v3408_v47 = vcombine.high %v6969_v38, %v6956_v29 }
0x1c2c   :  { %v2295_v27 = vcombine.low %v2230_v17, %v7208_v30  ;;  %v2449_v60 = vcombine.low %v7224_v39, %v7213_v14  ;;  %v2431_v23 = vcombine.low %v7098_v3, %v7104_v37  ;;  %v2399_v59 = vcombine.low %v7053_v45, %v7058_v42  ;;  %v8921_v37 = vld [vmem:[#allocation33_spill] sm:$0xff] }
0x1c2d   :  { %4127 = vrot.lane.b32.xlu1 %v3406_v4, %s6145_s22  ;;  %v2263_v11 = vcombine.low %v2198_v55, %v7220_v48  ;;  %v7243_v4 = vrot.slane %v2127_v31, %v6722_v7  ;;  %v2160_v29 = vcombine.high %v2094_v19, %v7165_v35  ;;  %v3138_v46 = vcombine.high %v8921_v37, %v6983_v2 }
0x1c2e   :  { %3925 = vrot.lane.b32.xlu0 %v2177_v49, %s6146_s3  ;;  %v7256_v26 = vrot.slane %v2295_v27, %v6722_v7  ;;  %v7277_v45 = vrot.slane %v2431_v23, %v6722_v7  ;;  %v2128_v15 = vcombine.high %v7181_v18, %v7184_v12  ;;  %v3513_v35 = vcombine.low %v7034_v16, %v7061_v8  ;;  %v8923_v18 = vld [vmem:[#allocation35_spill] sm:$0xff]  ;;  %v8924_v12 = vld [vmem:[#allocation36_spill] sm:$0xff] }
0x1c2f   :  { %v7200_v32 = vpop.permute.xlu0 %3457  ;;  %v7202_v28 = vpop.permute.xlu1 %3430  ;;  %v2179_v49 = vcombine.low %v7243_v4, %v7237_v50  ;;  %v7263_v53 = vrot.slane %v2263_v11, %v6722_v7  ;;  %v3497_v2 = vcombine.low %v7109_v52, %v7133_v61  ;;  %v7288_v19 = vrot.slane %v2399_v59, %v6722_v7  ;;  %v8925_v11 = vld [vmem:[#allocation34_spill] sm:$0xff] }
0x1c30   :  { %v3274_v27 = vcombine.high %v8924_v12, %v8923_v18  ;;  %v7312_v37 = vrot.slane %v2128_v15, %v6722_v7  ;;  %v8928_v15 = vld [vmem:[#allocation37_spill] sm:$0xff] }
0x1c31   :  { %4135 = vrot.lane.b32.xlu1 %v3136_v44, %s6145_s22  ;;  %v3529_v44 = vcombine.low %v7169_v63, %v7202_v28  ;;  %v2315_v42 = vcombine.low %v7263_v53, %v7256_v26  ;;  %v2176_v18 = vcombine.high %v8928_v15, %v7046_v40 }
0x1c32   :  { %3927 = vrot.lane.b32.xlu0 %v2313_v62, %s6146_s3  ;;  %v2296_v62 = vcombine.high %v2230_v17, %v7208_v30  ;;  %v2451_v30 = vcombine.low %v7288_v19, %v7277_v45  ;;  %v2264_v17 = vcombine.high %v2198_v55, %v7220_v48 }
0x1c33   :  { %v7226_v22 = vpop.permute.xlu0 %3463  ;;  %v7228_v5 = vpop.permute.xlu1 %3436 }
0x1c34   :  { %v7346_v40 = vrot.slane %v2264_v17, %v6722_v7  ;;  %v3754_v15 = vcombine.high %v7200_v32, %v7226_v22  ;;  %v2312_v17 = vcombine.high %v7084_v54, %v7072_v10 }
0x1c35   :  { %4137 = vrot.lane.b32.xlu1 %v3272_v56, %s6145_s22 }
0x1c36   :  { %3929 = vrot.lane.b32.xlu0 %v2449_v60, %s6146_s3  ;;  %v7298_v60 = vrot.slane %v2160_v29, %v6722_v7  ;;  %v7315_v29 = vrot.slane %v3513_v35, %v6676_v6  ;;  %8929 = vst [vmem:[#allocation36_spill] sm:$0xff] %v7346_v40 }
0x1c37   :  { %v7245_v13 = vpop.permute.xlu0 %3469  ;;  %v7247_v41 = vpop.permute.xlu1 %3442 }
0x1c38   :  { %v2181_v35 = vcombine.low %v7312_v37, %v7298_v60 }
0x1c39   :  { %4139 = vrot.lane.b32.xlu1 %v3408_v47, %s6145_s22  ;;  %v8926_v47 = vld [vmem:[#allocation6_spill] sm:$0xff] }
0x1c3a   :  { %3937 = vrot.lane.b32.xlu0 %v2179_v49, %s6146_s3  ;;  %v3481_v23 = vcombine.low %v8926_v47, %v8925_v11  ;;  %v7303_v49 = vrot.slane %v3529_v44, %v6676_v6  ;;  %v3649_v44 = vcombine.low %v7131_v51, %v7167_v33 }
0x1c3b   :  { %v7266_v38 = vpop.permute.xlu0 %3475  ;;  %v7268_v3 = vpop.permute.xlu1 %3448 }
0x1c3c   :  { %v7335_v12 = vrot.slane %v3481_v23, %v6676_v6  ;;  %v7351_v23 = vrot.slane %v3649_v44, %v6676_v6 }
0x1c3d   :  { %4147 = vrot.lane.b32.xlu1 %v3138_v46, %s6145_s22  ;;  %v7318_v46 = vrot.slane %v3497_v2, %v6676_v6  ;;  %v7332_v2 = vrot.slane %v2296_v62, %v6722_v7 }
0x1c3e   :  { %3939 = vrot.lane.b32.xlu0 %v2315_v42, %s6146_s3  ;;  %v3633_v42 = vcombine.low %v7228_v5, %v7247_v41 }
0x1c3f   :  { %v7291_v31 = vpop.permute.xlu0 %2471  ;;  %v7293_v56 = vpop.permute.xlu1 %3454  ;;  %v3545_v62 = vcombine.low %v7335_v12, %v7318_v46  ;;  %v2317_v9 = vcombine.low %v7346_v40, %v7332_v2 }
0x1c40   :  { %8922 = vst [vmem:[#allocation33_spill] sm:$0xff] %v7291_v31  ;;  %v3665_v59 = vcombine.low %v7268_v3, %v7293_v56  ;;  %v7356_v43 = vrot.slane %v3633_v42, %v6676_v6 }
0x1c41   :  { %4149 = vrot.lane.b32.xlu1 %v3274_v27, %s6145_s22  ;;  %v3617_v27 = vcombine.low %v7086_v58, %v7107_v25 }
0x1c42   :  { %3941 = vrot.lane.b32.xlu0 %v2451_v30, %s6146_s3  ;;  %v3577_v30 = vcombine.low %v7315_v29, %v7303_v49  ;;  %v7342_v20 = vrot.slane %v3665_v59, %v6676_v6 }
0x1c43   :  { %v7325_v48 = vpop.permute.xlu0 %2477  ;;  %v3461_v55 = vpop.permute.xlu1 %3460  ;;  %v7366_v44 = vrot.slane %v3617_v27, %v6676_v6  ;;  %v7384_v27 = vrot.slane %v3545_v62, %v6722_v7 }
0x1c44   :  { %8927 = vst [vmem:[#allocation35_spill] sm:$0xff] %v7325_v48  ;;  %v3713_v34 = vcombine.low %v7351_v23, %v7342_v20  ;;  %v7371_v42 = vrot.slane %v3577_v30, %v6722_v7 }
0x1c45   :  { %3919 = vrot.lane.b32.xlu1 %v2176_v18, %s6146_s3  ;;  %v3681_v10 = vcombine.low %v7366_v44, %v7356_v43 }
0x1c46   :  { %3949 = vrot.lane.b32.xlu0 %v2181_v35, %s6146_s3  ;;  %v7375_v35 = vrot.slane %v3754_v15, %v6676_v6  ;;  %v3609_v40 = vcombine.low %v7384_v27, %v7371_v42 }
0x1c47   :  { %v7359_v59 = vpop.permute.xlu0 %2483  ;;  %v3467_v18 = vpop.permute.xlu1 %3466 }
0x1c48   :  { %8930 = vst [vmem:[#allocation34_spill] sm:$0xff] %v7359_v59  ;;  %v3770_v48 = vcombine.high %v3461_v55, %v3467_v18  ;;  %v3769_v59 = vcombine.low %v3461_v55, %v3467_v18  ;;  %v3785_v55 = vcombine.low %v7245_v13, %v7266_v38 }
0x1c49   :  { %3921 = vrot.lane.b32.xlu1 %v2312_v17, %s6146_s3  ;;  %v2448_v17 = vcombine.high %v7121_v57, %v7124_v1  ;;  %v3786_v57 = vcombine.high %v7245_v13, %v7266_v38  ;;  %v7406_v1 = vrot.slane %v3681_v10, %v6722_v7 }
0x1c4a   :  { %v7380_v54 = vrot.slane %v3770_v48, %v6676_v6  ;;  %3951 = vrot.lane.b32.xlu0 %v2317_v9, %s6146_s3  ;;  %v7395_v48 = vrot.slane %v3713_v34, %v6722_v7  ;;  %v3753_v9 = vcombine.low %v7200_v32, %v7226_v22  ;;  %v7409_v62 = vrot.slane %v3769_v59, %v6676_v6 }
0x1c4b   :  { %v7386_v31 = vpop.permute.xlu0 %2489  ;;  %v3473_v30 = vpop.permute.xlu1 %3472  ;;  %v2178_v32 = vcombine.high %v7158_v24, %v7142_v21  ;;  %v3793_v38 = vrot.slane %v3785_v55, %v6676_v6 }
0x1c4c   :  { %8931 = vst [vmem:[#allocation6_spill] sm:$0xff] %v7386_v31  ;;  %v3834_v15 = vcombine.high %v7375_v35, %v7380_v54  ;;  %v3745_v31 = vcombine.low %v7406_v1, %v7395_v48  ;;  %v7418_v13 = vrot.slane %v3753_v9, %v6676_v6  ;;  %v2314_v9 = vcombine.high %v7196_v0, %v7178_v36 }
0x1c4d   :  { %3923 = vrot.lane.b32.xlu1 %v2448_v17, %s6146_s3  ;;  %v2450_v36 = vcombine.high %v7224_v39, %v7213_v14  ;;  %v3514_v39 = vcombine.high %v7034_v16, %v7061_v8 }
0x1c4e   :  { %4201 = vrot.lane.b32.xlu0 %v3609_v40, %s6118_s4  ;;  %v7423_v40 = vrot.slane %v3786_v57, %v6676_v6  ;;  %v3817_v21 = vcombine.low %v7418_v13, %v7409_v62  ;;  %v7471_v14 = vrot.slane %v3834_v15, %v6722_v7 }
0x1c4f   :  { %v7411_v34 = vpop.permute.xlu0 %2495  ;;  %v3479_v18 = vpop.permute.xlu1 %3478 }
0x1c50   :  { %v3801_v22 = vcombine.low %v3473_v30, %v3479_v18  ;;  %v3802_v17 = vcombine.high %v3473_v30, %v3479_v18  ;;  %v3578_v18 = vcombine.high %v7315_v29, %v7303_v49  ;;  %v7455_v0 = vrot.slane %v3817_v21, %v6722_v7 }
0x1c51   :  { %3931 = vrot.lane.b32.xlu1 %v2178_v32, %s6146_s3  ;;  %v3546_v32 = vcombine.high %v7335_v12, %v7318_v46  ;;  %v3530_v29 = vcombine.high %v7169_v63, %v7202_v28  ;;  %v3498_v63 = vcombine.high %v7109_v52, %v7133_v61  ;;  %v3682_v28 = vcombine.high %v7366_v44, %v7356_v43 }
0x1c52   :  { %v3809_v59 = vrot.slane %v3801_v22, %v6676_v6  ;;  %v7427_v10 = vrot.slane %v3802_v17, %v6676_v6  ;;  %4203 = vrot.lane.b32.xlu0 %v3745_v31, %s6118_s4  ;;  %v7468_v12 = vrot.slane %v3578_v18, %v6722_v7  ;;  %v3482_v52 = vcombine.high %v8926_v47, %v8925_v11 }
0x1c53   :  { %v7432_v24 = vpop.permute.xlu0 %2501  ;;  %v7434_v30 = vpop.permute.xlu1 %2456  ;;  %v7487_v15 = vrot.slane %v3546_v32, %v6722_v7  ;;  %v7496_v61 = vrot.slane %v3530_v29, %v6676_v6  ;;  %v3666_v43 = vcombine.high %v7268_v3, %v7293_v56  ;;  %v7510_v11 = vrot.slane %v3498_v63, %v6676_v6 }
0x1c54   :  { %v3849_v55 = vcombine.low %v3793_v38, %v3809_v59  ;;  %v3866_v57 = vcombine.high %v7423_v40, %v7427_v10  ;;  %v2316_v47 = vcombine.high %v7263_v53, %v7256_v26  ;;  %v3650_v3 = vcombine.high %v7131_v51, %v7167_v33 }
0x1c55   :  { %3933 = vrot.lane.b32.xlu1 %v2314_v9, %s6146_s3  ;;  %v3714_v9 = vcombine.high %v7351_v23, %v7342_v20  ;;  %v2180_v20 = vcombine.high %v7243_v4, %v7237_v50  ;;  %v3850_v50 = vcombine.high %v3793_v38, %v3809_v59  ;;  %v3611_v4 = vcombine.low %v7487_v15, %v7468_v12 }
0x1c56   :  { %v7444_v31 = vrot.slane %v3849_v55, %v6722_v7  ;;  %v7458_v49 = vrot.slane %v3866_v57, %v6722_v7  ;;  %v7507_v55 = vrot.slane %v3514_v39, %v6676_v6  ;;  %v3634_v56 = vcombine.high %v7228_v5, %v7247_v41 }
0x1c57   :  { %v7448_v22 = vpop.permute.xlu0 %2507  ;;  %v7450_v17 = vpop.permute.xlu1 %2459  ;;  %v7504_v44 = vrot.slane %v3714_v9, %v6722_v7  ;;  %v3818_v38 = vcombine.high %v7418_v13, %v7409_v62  ;;  %v7526_v18 = vrot.slane %v3682_v28, %v6722_v7  ;;  %v7529_v26 = vrot.slane %v3482_v52, %v6676_v6 }
0x1c58   :  { %v3881_v46 = vcombine.low %v7455_v0, %v7444_v31  ;;  %v3618_v51 = vcombine.high %v7086_v58, %v7107_v25  ;;  %v3593_v33 = vcombine.low %v7507_v55, %v7496_v61  ;;  %v7536_v5 = vrot.slane %v3666_v43, %v6676_v6 }
0x1c59   :  { %3935 = vrot.lane.b32.xlu1 %v2450_v36, %s6146_s3  ;;  %v3747_v41 = vcombine.low %v7526_v18, %v7504_v44  ;;  %v7542_v53 = vrot.slane %v3850_v50, %v6722_v7  ;;  %v2452_v62 = vcombine.high %v7288_v19, %v7277_v45  ;;  %v3561_v58 = vcombine.low %v7529_v26, %v7510_v11 }
0x1c5a   :  { %4205 = vrot.lane.b32.xlu0 %v3881_v46, %s6118_s4  ;;  %v7549_v25 = vrot.slane %v3650_v3, %v6676_v6  ;;  %v7552_v13 = vrot.slane %v3634_v56, %v6676_v6  ;;  %v7558_v36 = vrot.slane %v3818_v38, %v6722_v7  ;;  %v7563_v45 = vrot.slane %v3618_v51, %v6676_v6 }
0x1c5b   :  { %v7482_v23 = vpop.permute.xlu0 %2513  ;;  %v7484_v21 = vpop.permute.xlu1 %2462  ;;  %v7571_v46 = vrot.slane %v3593_v33, %v6722_v7  ;;  %v7581_v28 = vrot.slane %v3561_v58, %v6722_v7  ;;  %v3865_v43 = vcombine.low %v7423_v40, %v7427_v10  ;;  %v3594_v10 = vcombine.high %v7507_v55, %v7496_v61  ;;  %v4372_v61 = vld [vmem:[%s8830_s8 + $0x8] sm:$0xff]  ;;  %v8935_v58 = vld [vmem:[#allocation33_spill] sm:$0xff] }
0x1c5c   :  { %v3729_v19 = vcombine.low %v7549_v25, %v7536_v5  ;;  %v3883_v9 = vcombine.low %v7558_v36, %v7542_v53  ;;  %v3697_v39 = vcombine.low %v7563_v45, %v7552_v13  ;;  %v3562_v55 = vcombine.high %v7529_v26, %v7510_v11 }
0x1c5d   :  { %3943 = vrot.lane.b32.xlu1 %v2180_v20, %s6146_s3  ;;  %v2182_v20 = vcombine.high %v7312_v37, %v7298_v60  ;;  %v3613_v50 = vcombine.low %v7581_v28, %v7571_v46  ;;  %v8933_v37 = vld [vmem:[#allocation36_spill] sm:$0xff]  ;;  %v3610_v51 = vcombine.high %v7384_v27, %v7371_v42  ;;  %v7642_v27 = vrot.slane %v3594_v10, %v6722_v7 }
0x1c5e   :  { %4213 = vrot.lane.b32.xlu0 %v3611_v4, %s6118_s4  ;;  %v7591_v4 = vrot.slane %v3729_v19, %v6722_v7  ;;  %v2318_v3 = vcombine.high %v8933_v37, %v7332_v2  ;;  %v7601_v40 = vrot.slane %v3697_v39, %v6722_v7  ;;  %v4371_v2 = vld [vmem:[%s8830_s8] sm:$0xff]  ;;  %v3730_v26 = vcombine.high %v7549_v25, %v7536_v5  ;;  %v8937_v39 = vld [vmem:[#allocation7_spill] sm:$0xff] }
0x1c5f   :  { %v7521_v59 = vpop.permute.xlu0 %2519  ;;  %v7523_v57 = vpop.permute.xlu1 %2465  ;;  %v7636_v11 = vpack.c.bf16 %v4372_v61, %v4371_v2  ;;  %v8941_v2 = vld [vmem:[#allocation35_spill] sm:$0xff] }
0x1c60   :  { %v2557_v19 = vcombine.low %v7523_v57, %v8935_v58 }
0x1c61   :  { %3945 = vrot.lane.b32.xlu1 %v2316_v47, %s6146_s3  ;;  %v3833_v47 = vcombine.low %v7375_v35, %v7380_v54  ;;  %v3749_v35 = vcombine.low %v7601_v40, %v7591_v4  ;;  %v7613_v54 = vrot.slane %v3865_v43, %v6722_v7 }
0x1c62   :  { %4215 = vrot.lane.b32.xlu0 %v3747_v41, %s6118_s4  ;;  %v8881_v41 = vmov 0.0|0.0   ;;  %v7666_v25 = vrot.slane %v2557_v19, %v6676_v6  ;;  %v8943_v19 = vld [vmem:[#allocation6_spill] sm:$0xff] }
0x1c63   :  { %v7555_v32 = vpop.permute.xlu1 %2468  ;;  %v7560_v29 = vpop.permute.xlu0 %4105  ;;  %v7626_v33 = vrot.slane %v3833_v47, %v6722_v7  ;;  %5974 = vmatprep.subr.bf16.mxu1 %v8881_v41  ;;  %5977 = vmatprep.subr.bf16.mxu0 %v8881_v41  ;;  %v3698_v47 = vcombine.high %v7563_v45, %v7552_v13  ;;  %v3746_v13 = vcombine.high %v7406_v1, %v7395_v48  ;;  %v8938_v45 = vmov 0.0  }
0x1c64   :  { %5976 = vmatpush3.bf16.msra.mxu1 %v7636_v11  ;;  %5979 = vmatpush3.bf16.msra.mxu0 %v7636_v11  ;;  %v7693_v1 = vrot.slane %v3730_v26, %v6722_v7  ;;  %v3882_v26 = vcombine.high %v7455_v0, %v7444_v31 }
0x1c65   :  { %3947 = vrot.lane.b32.xlu1 %v2452_v62, %s6146_s3  ;;  %v2541_v62 = vcombine.low %v7434_v30, %v7484_v21  ;;  %5852 = vmatprep.subr.mxu1 %v8938_v45  ;;  %v7711_v16 = vrot.slane %v3698_v47, %v6722_v7 }
0x1c66   :  { %4217 = vrot.lane.b32.xlu0 %v3883_v9, %s6118_s4  ;;  %5867 = vmatprep.subr.mxu0 %v8938_v45 }
0x1c67   :  { %v7576_v63 = vpop.permute.xlu1 %2474  ;;  %v7583_v52 = vpop.permute.xlu0 %4107  ;;  %v7663_v5 = vrot.slane %v2541_v62, %v6676_v6  ;;  %v3751_v31 = vcombine.low %v7711_v16, %v7693_v1 }
0x1c68   :  { %8932 = vst [vmem:[#allocation37_spill] sm:$0xff] %v7583_v52  ;;  %v2573_v38 = vcombine.low %v7555_v32, %v7576_v63 }
0x1c69   :  { %3955 = vrot.lane.b32.xlu1 %v2182_v20, %s6146_s3  ;;  %v2525_v20 = vcombine.low %v8937_v39, %v7450_v17 }
0x1c6a   :  { %4225 = vrot.lane.b32.xlu0 %v3613_v50, %s6118_s4  ;;  %v7649_v43 = vrot.slane %v2573_v38, %v6676_v6  ;;  %v3885_v50 = vcombine.low %v7626_v33, %v7613_v54  ;;  %v7677_v38 = vld [vmem:[%s8830_s8 + $0x10] sm:$0xf] }
0x1c6b   :  { %v7596_v60 = vpop.permute.xlu1 %2480  ;;  %v7605_v56 = vpop.permute.xlu0 %4109  ;;  %8939 = vst [vmem:[#allocation7_spill] sm:$0xff] %v7677_v38  ;;  %v7687_v62 = vrot.slane %v2525_v20, %v6676_v6  ;;  %5853 = vmatpush3.msk.msra.mxu1 %vm64_vm1, %v7677_v38  ;;  %5868 = vmatpush3.msk.msra.mxu0 %vm64_vm1, %v7677_v38 }
0x1c6c   :  { %8934 = vst [vmem:[#allocation36_spill] sm:$0xff] %v7605_v56  ;;  %v2621_v48 = vcombine.low %v7666_v25, %v7649_v43  ;;  %5980 = vmatprep.subr.bf16.mxu1 %v8881_v41  ;;  %5983 = vmatprep.subr.bf16.mxu0 %v8881_v41 }
0x1c6d   :  { %3957 = vrot.lane.b32.xlu1 %v2318_v3, %s6146_s3  ;;  %v7659_v3 = vrot.slane %v3562_v55, %v6722_v7  ;;  %v2589_v20 = vcombine.low %v7687_v62, %v7663_v5 }
0x1c6e   :  { %4227 = vrot.lane.b32.xlu0 %v3749_v35, %s6118_s4  ;;  %v8940_v35 = vld [vmem:[#allocation34_spill] sm:$0xff]  ;;  %v7727_v0 = vrot.slane %v2621_v48, %v6722_v7 }
0x1c6f   :  { %v7634_v9 = vpop.permute.xlu1 %2486  ;;  %v7639_v42 = vpop.permute.xlu0 %4117  ;;  %v2661_v61 = vcombine.low %v8941_v2, %v8940_v35  ;;  %v7744_v48 = vrot.slane %v2589_v20, %v6722_v7 }
0x1c70   :  { %8936 = vst [vmem:[#allocation33_spill] sm:$0xff] %v7639_v42  ;;  %v2677_v37 = vcombine.low %v7596_v60, %v7634_v9 }
0x1c71   :  { %4207 = vrot.lane.b32.xlu1 %v3610_v51, %s6118_s4  ;;  %v3615_v51 = vcombine.low %v7659_v3, %v7642_v27 }
0x1c72   :  { %4229 = vrot.lane.b32.xlu0 %v3885_v50, %s6118_s4  ;;  %v2693_v50 = vcombine.low %v8943_v19, %v7411_v34  ;;  %v7699_v8 = vrot.slane %v2677_v37, %v6676_v6  ;;  %v7715_v37 = vrot.slane %v2661_v61, %v6676_v6 }
0x1c73   :  { %v7669_v10 = vpop.permute.xlu1 %2492  ;;  %v7681_v55 = vpop.permute.xlu0 %4119 }
0x1c74   :  { %8942 = vst [vmem:[#allocation34_spill] sm:$0xff] %v7681_v55  ;;  %v7731_v47 = vrot.slane %v2693_v50, %v6676_v6  ;;  %v2725_v61 = vcombine.low %v7715_v37, %v7699_v8 }
0x1c75   :  { %4209 = vrot.lane.b32.xlu1 %v3746_v13, %s6118_s4 }
0x1c76   :  { %4237 = vrot.lane.b32.xlu0 %v3615_v51, %s6118_s4 }
0x1c77   :  { %v7706_v13 = vpop.permute.xlu1 %2498  ;;  %v7717_v55 = vpop.permute.xlu0 %4121 }
0x1c78   :  { %8944 = vst [vmem:[#allocation35_spill] sm:$0xff] %v7717_v55  ;;  %v2709_v42 = vcombine.low %v7669_v10, %v7706_v13  ;;  %v3612_v55 = vcombine.high %v7487_v15, %v7468_v12  ;;  %v3748_v15 = vcombine.high %v7526_v18, %v7504_v44  ;;  %v2797_v44 = vcombine.low %v7432_v24, %v7448_v22 }
0x1c79   :  { %4211 = vrot.lane.b32.xlu1 %v3882_v26, %s6118_s4 }
0x1c7a   :  { %v7736_v51 = vrot.slane %v2709_v42, %v6676_v6  ;;  %4239 = vrot.lane.b32.xlu0 %v3751_v31, %s6118_s4  ;;  %v2653_v42 = vcombine.low %v7744_v48, %v7727_v0  ;;  %v7754_v31 = vrot.slane %v2725_v61, %v6722_v7 }
0x1c7b   :  { %v7739_v26 = vpop.permute.xlu1 %2504  ;;  %v7748_v41 = vpop.permute.xlu0 %4129 }
0x1c7c   :  { %v2757_v50 = vcombine.low %v7731_v47, %v7736_v51  ;;  %8945 = vst [vmem:[#allocation6_spill] sm:$0xff] %v7748_v41 }
0x1c7d   :  { %4219 = vrot.lane.b32.xlu1 %v3612_v55, %s6118_s4 }
0x1c7e   :  { %v7757_v56 = vrot.slane %v2757_v50, %v6722_v7  ;;  %4009 = vrot.lane.b32.xlu0 %v2653_v42, %s6121_s19  ;;  %v3884_v42 = vcombine.high %v7558_v36, %v7542_v53  ;;  %v7791_v53 = vrot.slane %v2797_v44, %v6676_v6 }
0x1c7f   :  { %v7760_v12 = vpop.permute.xlu1 %2510  ;;  %v7764_v20 = vpop.permute.xlu0 %4131 }
0x1c80   :  { %8946 = vst [vmem:[#allocation40_spill] sm:$0xff] %v7764_v20  ;;  %v2789_v55 = vcombine.low %v7754_v31, %v7757_v56  ;;  %v2813_v61 = vcombine.low %v7739_v26, %v7760_v12 }
0x1c81   :  { %4221 = vrot.lane.b32.xlu1 %v3748_v15, %s6118_s4  ;;  %v2829_v15 = vcombine.low %v7482_v23, %v7521_v59 }
0x1c82   :  { %4011 = vrot.lane.b32.xlu0 %v2789_v55, %s6121_s19  ;;  %v7784_v20 = vrot.slane %v2813_v61, %v6676_v6  ;;  %v3614_v55 = vcombine.high %v7581_v28, %v7571_v46  ;;  %v3750_v46 = vcombine.high %v7601_v40, %v7591_v4  ;;  %v2622_v28 = vcombine.high %v7666_v25, %v7649_v43 }
0x1c83   :  { %v7772_v50 = vpop.permute.xlu1 %2516  ;;  %v7778_v18 = vpop.permute.xlu0 %4133  ;;  %v2574_v4 = vcombine.high %v7555_v32, %v7576_v63  ;;  %v3886_v43 = vcombine.high %v7626_v33, %v7613_v54  ;;  %v2758_v25 = vcombine.high %v7731_v47, %v7736_v51  ;;  %v2558_v32 = vcombine.high %v7523_v57, %v8935_v58 }
0x1c84   :  { %8947 = vst [vmem:[#allocation41_spill] sm:$0xff] %v7778_v18  ;;  %v2861_v61 = vcombine.low %v7791_v53, %v7784_v20  ;;  %v2726_v63 = vcombine.high %v7715_v37, %v7699_v8  ;;  %v2526_v47 = vcombine.high %v8937_v39, %v7450_v17  ;;  %v3616_v57 = vcombine.high %v7659_v3, %v7642_v27 }
0x1c85   :  { %4223 = vrot.lane.b32.xlu1 %v3884_v42, %s6118_s4  ;;  %v2837_v42 = vrot.slane %v2829_v15, %v6676_v6  ;;  %v2590_v15 = vcombine.high %v7687_v62, %v7663_v5  ;;  %v7830_v62 = vrot.slane %v2622_v28, %v6722_v7  ;;  %v2710_v8 = vcombine.high %v7669_v10, %v7706_v13 }
0x1c86   :  { %v7859_v51 = vrot.slane %v2758_v25, %v6722_v7  ;;  %v2694_v17 = vcombine.high %v8943_v19, %v7411_v34  ;;  %v2678_v27 = vcombine.high %v7596_v60, %v7634_v9  ;;  %v2862_v3 = vcombine.high %v7791_v53, %v7784_v20 }
0x1c87   :  { %v7786_v41 = vpop.permute.xlu1 %2522  ;;  %v7793_v36 = vpop.permute.xlu0 %4141  ;;  %v7843_v33 = vrot.slane %v2590_v15, %v6722_v7  ;;  %v7876_v10 = vrot.slane %v2726_v63, %v6722_v7  ;;  %v2662_v34 = vcombine.high %v8941_v2, %v8940_v35  ;;  %v3752_v60 = vcombine.high %v7711_v16, %v7693_v1 }
0x1c88   :  { %8948 = vst [vmem:[#allocation42_spill] sm:$0xff] %v7793_v36  ;;  %v2845_v18 = vcombine.low %v7772_v50, %v7786_v41  ;;  %v7888_v9 = vrot.slane %v2710_v8, %v6676_v6  ;;  %v2846_v20 = vcombine.high %v7772_v50, %v7786_v41  ;;  %v2830_v16 = vcombine.high %v7482_v23, %v7521_v59 }
0x1c89   :  { %4231 = vrot.lane.b32.xlu1 %v3614_v55, %s6118_s4  ;;  %v7814_v55 = vrot.slane %v2861_v61, %v6722_v7  ;;  %v2542_v61 = vcombine.high %v7434_v30, %v7484_v21  ;;  %v7848_v30 = vrot.slane %v2574_v4, %v6676_v6  ;;  %v2655_v37 = vcombine.low %v7843_v33, %v7830_v62 }
0x1c8a   :  { %v2853_v38 = vrot.slane %v2845_v18, %v6676_v6  ;;  %v2791_v35 = vcombine.low %v7876_v10, %v7859_v51  ;;  %v7907_v41 = vrot.slane %v2678_v27, %v6676_v6  ;;  %v2814_v1 = vcombine.high %v7739_v26, %v7760_v12 }
0x1c8b   :  { %v7802_v52 = vpop.permute.xlu1 %4111  ;;  %v7808_v36 = vpop.permute.xlu0 %4143  ;;  %v7864_v39 = vrot.slane %v2542_v61, %v6676_v6  ;;  %v2876_v50 = vrot.slane %v2862_v3, %v6722_v7  ;;  %v2798_v15 = vcombine.high %v7432_v24, %v7448_v22  ;;  %v2654_v23 = vcombine.high %v7744_v48, %v7727_v0 }
0x1c8c   :  { %8949 = vst [vmem:[#allocation43_spill] sm:$0xff] %v7802_v52  ;;  %v2893_v44 = vcombine.low %v2837_v42, %v2853_v38  ;;  %8950 = vst [vmem:[#allocation44_spill] sm:$0xff] %v7808_v36  ;;  %v2894_v58 = vcombine.high %v2837_v42, %v2853_v38  ;;  %v2540_v38 = vrot.slane %v2526_v47, %v6676_v6  ;;  %v9005_v36 = vld [vmem:[#allocation20_spill] sm:$0xff] }
0x1c8d   :  { %4233 = vrot.lane.b32.xlu1 %v3750_v46, %s6118_s4  ;;  %v7867_v46 = vrot.slane %v2558_v32, %v6676_v6  ;;  %v7900_v42 = vrot.slane %v2694_v17, %v6676_v6  ;;  %v2844_v24 = vrot.slane %v2830_v16, %v6676_v6  ;;  %v2828_v0 = vrot.slane %v2814_v1, %v6676_v6 }
0x1c8e   :  { %v7817_v18 = vrot.slane %v2893_v44, %v6722_v7  ;;  %v7897_v2 = vrot.slane %v2894_v58, %v6722_v7  ;;  %v2605_v28 = vcombine.low %v2540_v38, %v7864_v39  ;;  %v2676_v44 = vrot.slane %v2662_v34, %v6676_v6 }
0x1c8f   :  { %v7821_v40 = vpop.permute.xlu1 %4113  ;;  %v7839_v54 = vpop.permute.xlu0 %3913  ;;  %v2637_v19 = vcombine.low %v7867_v46, %v7848_v30  ;;  %v2773_v59 = vcombine.low %v7900_v42, %v7888_v9  ;;  %v2790_v61 = vcombine.high %v7754_v31, %v7757_v56  ;;  %v2812_v32 = vrot.slane %v2798_v15, %v6676_v6 }
0x1c90   :  { %8951 = vst [vmem:[#allocation45_spill] sm:$0xff] %v7821_v40  ;;  %v2925_v5 = vcombine.low %v7814_v55, %v7817_v18  ;;  %v2927_v12 = vcombine.low %v2876_v50, %v7897_v2  ;;  %v2741_v22 = vcombine.low %v2676_v44, %v7907_v41  ;;  %v2613_v48 = vrot.slane %v2605_v28, %v6722_v7  ;;  %v9019_v40 = vld [vmem:[#allocation27_spill] sm:$0xff] }
0x1c91   :  { %4235 = vrot.lane.b32.xlu1 %v3886_v43, %s6118_s4  ;;  %v7923_v43 = vrot.slane %v2846_v20, %v6676_v6  ;;  %v2645_v25 = vrot.slane %v2637_v19, %v6722_v7  ;;  %v2781_v8 = vrot.slane %v2773_v59, %v6722_v7  ;;  %v2877_v58 = vcombine.low %v2812_v32, %v2828_v0 }
0x1c92   :  { %4013 = vrot.lane.b32.xlu0 %v2925_v5, %s6121_s19  ;;  %v2926_v56 = vcombine.high %v7814_v55, %v7817_v18  ;;  %v2638_v31 = vcombine.high %v7867_v46, %v7848_v30  ;;  %v2606_v19 = vcombine.high %v2540_v38, %v7864_v39  ;;  %v2656_v55 = vcombine.high %v7843_v33, %v7830_v62 }
0x1c93   :  { %v7850_v21 = vpop.permute.xlu1 %4115  ;;  %v7892_v53 = vpop.permute.xlu0 %3915  ;;  %v2909_v63 = vcombine.low %v2844_v24, %v7923_v43  ;;  %v2774_v28 = vcombine.high %v7900_v42, %v7888_v9  ;;  %v2742_v16 = vcombine.high %v2676_v44, %v7907_v41  ;;  %v2928_v15 = vcombine.high %v2876_v50, %v7897_v2  ;;  %v8964_v9 = vld [vmem:[#allocation38_spill] sm:$0xff] }
0x1c94   :  { %8952 = vst [vmem:[#allocation46_spill] sm:$0xff] %v7850_v21  ;;  %v2652_v46 = vrot.slane %v2638_v31, %v6722_v7  ;;  %v2620_v39 = vrot.slane %v2606_v19, %v6722_v7  ;;  %v2658_v44 = vcombine.high %v2613_v48, %v2645_v25  ;;  %v2878_v50 = vcombine.high %v2812_v32, %v2828_v0  ;;  %v9015_v21 = vld [vmem:[#allocation23_spill] sm:$0xff] }
0x1c95   :  { %4243 = vrot.lane.b32.xlu1 %v3616_v57, %s6118_s4  ;;  %v2657_v57 = vcombine.low %v2613_v48, %v2645_v25  ;;  %v2917_v34 = vrot.slane %v2909_v63, %v6722_v7  ;;  %v2756_v59 = vrot.slane %v2742_v16, %v6722_v7  ;;  %v8969_v25 = vld [vmem:[#allocation32_spill] sm:$0xff] }
0x1c96   :  { %4021 = vrot.lane.b32.xlu0 %v2655_v37, %s6121_s19  ;;  %v2749_v37 = vrot.slane %v2741_v22, %v6722_v7  ;;  %v2659_v33 = vcombine.low %v2620_v39, %v2652_v46  ;;  %v2892_v48 = vrot.slane %v2878_v50, %v6722_v7  ;;  %v8989_v50 = vld [vmem:[#allocation5_spill] sm:$0xff] }
0x1c97   :  { %v7883_v13 = vpop.permute.xlu1 %4123 }
0x1c98   :  { %8953 = vst [vmem:[#allocation47_spill] sm:$0xff] %v7883_v13  ;;  %v2793_v3 = vcombine.low %v2749_v37, %v2781_v8  ;;  %v2794_v63 = vcombine.high %v2749_v37, %v2781_v8  ;;  %v2660_v37 = vcombine.high %v2620_v39, %v2652_v46 }
0x1c99   :  { %4245 = vrot.lane.b32.xlu1 %v3752_v60, %s6118_s4  ;;  %v2885_v60 = vrot.slane %v2877_v58, %v6722_v7 }
0x1c9a   :  { %4023 = vrot.lane.b32.xlu0 %v2791_v35, %s6121_s19  ;;  %v2792_v35 = vcombine.high %v7876_v10, %v7859_v51  ;;  %v2788_v51 = vrot.slane %v2774_v28, %v6722_v7  ;;  %v8963_v10 = vld [vmem:[#allocation39_spill] sm:$0xff] }
0x1c9b   :  { %v7916_v4 = vpop.permute.xlu1 %4125  ;;  %v2929_v30 = vcombine.low %v2885_v60, %v2917_v34  ;;  %v8965_v42 = vcombine.low %v8963_v10, %v8964_v9  ;;  %v2930_v0 = vcombine.high %v2885_v60, %v2917_v34  ;;  %v8977_v60 = vcombine.high %v8963_v10, %v8964_v9 }
0x1c9c   :  { %8954 = vst [vmem:[#allocation48_spill] sm:$0xff] %v7916_v4  ;;  %v7925_v26 = vpop.permute.xlu0 %3917  ;;  %v2795_v2 = vcombine.low %v2756_v59, %v2788_v51  ;;  %v8983_v9 = vcombine.high %v7471_v14, %v7458_v49 }
0x1c9d   :  { %4015 = vrot.lane.b32.xlu1 %v2654_v23, %s6121_s19 }
0x1c9e   :  { %4025 = vrot.lane.b32.xlu0 %v2927_v12, %s6121_s19  ;;  %v2910_v12 = vcombine.high %v2844_v24, %v7923_v43  ;;  %v8970_v43 = vld [vmem:[#allocation31_spill] sm:$0xff] }
0x1c9f   :  { %v7935_v5 = vpop.permute.xlu1 %4127  ;;  %v8971_v24 = vcombine.low %v8969_v25, %v8970_v43  ;;  %v8980_v28 = vcombine.high %v8969_v25, %v8970_v43  ;;  %v8991_v25 = vld [vmem:[#allocation8_spill] sm:$0xff] }
0x1ca0   :  { %8955 = vst [vmem:[#allocation49_spill] sm:$0xff] %v7935_v5  ;;  %v7941_v47 = vpop.permute.xlu0 %3925  ;;  %v2924_v58 = vrot.slane %v2910_v12, %v6722_v7 }
0x1ca1   :  { %4017 = vrot.lane.b32.xlu1 %v2790_v61, %s6121_s19 }
0x1ca2   :  { %4033 = vrot.lane.b32.xlu0 %v2657_v57, %s6121_s19  ;;  %v2931_v32 = vcombine.low %v2892_v48, %v2924_v58  ;;  %v2932_v16 = vcombine.high %v2892_v48, %v2924_v58  ;;  %v8990_v58 = vld [vmem:[#allocation10_spill] sm:$0xff]  ;;  %v8993_v48 = vld [vmem:[#allocation11_spill] sm:$0xff] }
0x1ca3   :  { %v7947_v17 = vpop.permute.xlu1 %4135  ;;  %v1585_v43 = vcombine.low %v8991_v25, %v8990_v58 }
0x1ca4   :  { %8956 = vst [vmem:[#allocation50_spill] sm:$0xff] %v7947_v17  ;;  %v7953_v27 = vpop.permute.xlu0 %3927 }
0x1ca5   :  { %4019 = vrot.lane.b32.xlu1 %v2926_v56, %s6121_s19 }
0x1ca6   :  { %4035 = vrot.lane.b32.xlu0 %v2793_v3, %s6121_s19  ;;  %v8975_v3 = vcombine.low %v7471_v14, %v7458_v49  ;;  %v8995_v49 = vld [vmem:[#allocation12_spill] sm:$0xff] }
0x1ca7   :  { %v7960_v20 = vpop.permute.xlu1 %4137 }
0x1ca8   :  { %8957 = vst [vmem:[#allocation51_spill] sm:$0xff] %v7960_v20  ;;  %v7964_v18 = vpop.permute.xlu0 %3929  ;;  %v9003_v20 = vld [vmem:[#allocation19_spill] sm:$0xff] }
0x1ca9   :  { %8958 = vst [vmem:[#allocation52_spill] sm:$0xff] %v7964_v18  ;;  %4027 = vrot.lane.b32.xlu1 %v2656_v55, %s6121_s19 }
0x1caa   :  { %4037 = vrot.lane.b32.xlu0 %v2929_v30, %s6121_s19  ;;  %v2796_v30 = vcombine.high %v2756_v59, %v2788_v51 }
0x1cab   :  { %v7970_v38 = vpop.permute.xlu1 %4139 }
0x1cac   :  { %8959 = vst [vmem:[#allocation53_spill] sm:$0xff] %v7970_v38  ;;  %v7976_v62 = vpop.permute.xlu0 %3937  ;;  %v9001_v38 = vld [vmem:[#allocation16_spill] sm:$0xff] }
0x1cad   :  { %8960 = vst [vmem:[#allocation54_spill] sm:$0xff] %v7976_v62  ;;  %4029 = vrot.lane.b32.xlu1 %v2792_v35, %s6121_s19  ;;  %v9020_v62 = vld [vmem:[#allocation30_spill] sm:$0xff] }
0x1cae   :  { %4045 = vrot.lane.b32.xlu0 %v2659_v33, %s6121_s19 }
0x1caf   :  { %v7981_v1 = vpop.permute.xlu1 %4147 }
0x1cb0   :  { %8961 = vst [vmem:[#allocation55_spill] sm:$0xff] %v7981_v1  ;;  %v7984_v23 = vpop.permute.xlu0 %3939 }
0x1cb1   :  { %8962 = vst [vmem:[#allocation56_spill] sm:$0xff] %v7984_v23  ;;  %4031 = vrot.lane.b32.xlu1 %v2928_v15, %s6121_s19  ;;  %v9016_v23 = vld [vmem:[#allocation26_spill] sm:$0xff] }
0x1cb2   :  { %3953 = vrot.lane.b32.xlu0 %v8965_v42, %s6146_s3 }
0x1cb3   :  { %v7993_v41 = vpop.permute.xlu1 %4149 }
0x1cb4   :  { %8966 = vst [vmem:[#allocation39_spill] sm:$0xff] %v7993_v41  ;;  %v7996_v22 = vpop.permute.xlu0 %3941  ;;  %v8999_v41 = vld [vmem:[#allocation15_spill] sm:$0xff] }
0x1cb5   :  { %8967 = vst [vmem:[#allocation38_spill] sm:$0xff] %v7996_v22  ;;  %4039 = vrot.lane.b32.xlu1 %v2658_v44, %s6121_s19 }
0x1cb6   :  { %4047 = vrot.lane.b32.xlu0 %v2795_v2, %s6121_s19  ;;  %v8988_v2 = vld [vmem:[#allocation9_spill] sm:$0xff] }
0x1cb7   :  { %v8000_v61 = vpop.permute.xlu1 %3919 }
0x1cb8   :  { %v8002_v57 = vpop.permute.xlu0 %3949 }
0x1cb9   :  { %8968 = vst [vmem:[#allocation57_spill] sm:$0xff] %v8002_v57  ;;  %4041 = vrot.lane.b32.xlu1 %v2794_v63, %s6121_s19  ;;  %v1569_v63 = vcombine.low %v8989_v50, %v8988_v2 }
0x1cba   :  { %4145 = vrot.lane.b32.xlu0 %v8971_v24, %s6145_s22  ;;  %v8992_v24 = vld [vmem:[#allocation13_spill] sm:$0xff] }
0x1cbb   :  { %v8011_v56 = vpop.permute.xlu1 %3921 }
0x1cbc   :  { %8972 = vst [vmem:[#allocation32_spill] sm:$0xff] %v8011_v56  ;;  %v8013_v31 = vpop.permute.xlu0 %3951 }
0x1cbd   :  { %8973 = vst [vmem:[#allocation31_spill] sm:$0xff] %v8013_v31  ;;  %4043 = vrot.lane.b32.xlu1 %v2930_v0, %s6121_s19  ;;  %v1601_v0 = vcombine.low %v8993_v48, %v8992_v24 }
0x1cbe   :  { %4049 = vrot.lane.b32.xlu0 %v2931_v32, %s6121_s19  ;;  %v8994_v32 = vld [vmem:[#allocation14_spill] sm:$0xff] }
0x1cbf   :  { %v8017_v8 = vpop.permute.xlu1 %3923  ;;  %v1617_v14 = vcombine.low %v8995_v49, %v8994_v32 }
0x1cc0   :  { %8974 = vst [vmem:[#allocation58_spill] sm:$0xff] %v8017_v8  ;;  %v8024_v19 = vpop.permute.xlu0 %4201 }
0x1cc1   :  { %4051 = vrot.lane.b32.xlu1 %v2660_v37, %s6121_s19 }
0x1cc2   :  { %4241 = vrot.lane.b32.xlu0 %v8975_v3, %s6118_s4 }
0x1cc3   :  { %v8026_v34 = vpop.permute.xlu1 %3931 }
0x1cc4   :  { %8976 = vst [vmem:[#allocation59_spill] sm:$0xff] %v8026_v34  ;;  %v8034_v46 = vpop.permute.xlu0 %4203 }
0x1cc5   :  { %3959 = vrot.lane.b32.xlu1 %v8977_v60, %s6146_s3  ;;  %v8079_v60 = vrot.slane %v1569_v63, %v6676_v6  ;;  %v9004_v63 = vld [vmem:[#allocation22_spill] sm:$0xff] }
0x1cc6   :  { %v1753_v17 = vcombine.low %v9005_v36, %v9004_v63 }
0x1cc7   :  { %v8032_v55 = vpop.permute.xlu1 %3933 }
0x1cc8   :  { %8978 = vst [vmem:[#allocation60_spill] sm:$0xff] %v8032_v55  ;;  %v8116_v4 = vrot.slane %v1753_v17, %v6676_v6 }
0x1cc9   :  { %4053 = vrot.lane.b32.xlu1 %v2796_v30, %s6121_s19  ;;  %v8082_v30 = vrot.slane %v1585_v43, %v6676_v6 }
0x1ccb   :  { %v8037_v39 = vpop.permute.xlu1 %3935 }
0x1ccc   :  { %8979 = vst [vmem:[#allocation61_spill] sm:$0xff] %v8037_v39  ;;  %v8039_v35 = vpop.permute.xlu0 %4205 }
0x1ccd   :  { %4151 = vrot.lane.b32.xlu1 %v8980_v28, %s6145_s22  ;;  %v8085_v28 = vrot.slane %v1601_v0, %v6676_v6  ;;  %v1633_v0 = vcombine.low %v8079_v60, %v8082_v30 }
0x1ccf   :  { %v8045_v33 = vpop.permute.xlu1 %3943  ;;  %v8127_v13 = vrot.slane %v1633_v0, %v6722_v7  ;;  %v9014_v0 = vld [vmem:[#allocation25_spill] sm:$0xff] }
0x1cd0   :  { %8981 = vst [vmem:[#allocation62_spill] sm:$0xff] %v8045_v33  ;;  %v8047_v15 = vpop.permute.xlu0 %4213 }
0x1cd1   :  { %4055 = vrot.lane.b32.xlu1 %v2932_v16, %s6121_s19  ;;  %v8088_v16 = vrot.slane %v1617_v14, %v6676_v6 }
0x1cd3   :  { %v8050_v51 = vpop.permute.xlu1 %3945  ;;  %v1665_v14 = vcombine.low %v8085_v28, %v8088_v16 }
0x1cd4   :  { %8982 = vst [vmem:[#allocation63_spill] sm:$0xff] %v8050_v51  ;;  %v8052_v10 = vpop.permute.xlu0 %4215 }
0x1cd5   :  { %4247 = vrot.lane.b32.xlu1 %v8983_v9, %s6118_s4  ;;  %v8998_v9 = vld [vmem:[#allocation17_spill] sm:$0xff] }
0x1cd6   :  { %v1705_v1 = vcombine.low %v8999_v41, %v8998_v9 }
0x1cd7   :  { %v8058_v42 = vpop.permute.xlu1 %3947 }
0x1cd8   :  { %8984 = vst [vmem:[#allocation64_spill] sm:$0xff] %v8058_v42  ;;  %v8060_v59 = vpop.permute.xlu0 %4217  ;;  %v9002_v42 = vld [vmem:[#allocation21_spill] sm:$0xff]  ;;  %v8107_v33 = vrot.slane %v1705_v1, %v6676_v6 }
0x1cd9   :  { %8985 = vst [vmem:[#allocation65_spill] sm:$0xff] %v8060_v59  ;;  %v1737_v51 = vcombine.low %v9003_v20, %v9002_v42  ;;  %v9021_v59 = vld [vmem:[#allocation28_spill] sm:$0xff] }
0x1cdb   :  { %v8062_v44 = vpop.permute.xlu1 %3955  ;;  %v8113_v39 = vrot.slane %v1737_v51, %v6676_v6 }
0x1cdc   :  { %8986 = vst [vmem:[#allocation66_spill] sm:$0xff] %v8062_v44  ;;  %v8064_v12 = vpop.permute.xlu0 %4225  ;;  %v9000_v44 = vld [vmem:[#allocation18_spill] sm:$0xff] }
0x1cdd   :  { %8987 = vst [vmem:[#allocation67_spill] sm:$0xff] %v8064_v12  ;;  %v1801_v1 = vcombine.low %v8113_v39, %v8116_v4  ;;  %v9017_v12 = vld [vmem:[#allocation24_spill] sm:$0xff] }
0x1cdf   :  { %v8074_v37 = vpop.permute.xlu1 %3957 }
0x1ce0   :  { %8996 = vst [vmem:[#allocation9_spill] sm:$0xff] %v8074_v37  ;;  %v8076_v3 = vpop.permute.xlu0 %4227  ;;  %v1721_v37 = vcombine.low %v9001_v38, %v9000_v44 }
0x1ce1   :  { %8997 = vst [vmem:[#allocation5_spill] sm:$0xff] %v8076_v3  ;;  %v8142_v3 = vrot.slane %v1801_v1, %v6722_v7  ;;  %v1889_v1 = vcombine.low %v9021_v59, %v9020_v62 }
0x1ce2   :  { %v8110_v5 = vrot.slane %v1721_v37, %v6676_v6  ;;  %v8130_v37 = vrot.slane %v1665_v14, %v6722_v7  ;;  %v1841_v14 = vcombine.low %v9015_v21, %v9014_v0 }
0x1ce3   :  { %v8098_v43 = vpop.permute.xlu1 %4207 }
0x1ce4   :  { %9006 = vst [vmem:[#allocation10_spill] sm:$0xff] %v8098_v43  ;;  %v8100_v31 = vpop.permute.xlu0 %4229  ;;  %v1769_v55 = vcombine.low %v8107_v33, %v8110_v5 }
0x1ce5   :  { %9007 = vst [vmem:[#allocation8_spill] sm:$0xff] %v8100_v31 }
0x1ce6   :  { %v8139_v22 = vrot.slane %v1769_v55, %v6722_v7 }
0x1ce7   :  { %v8118_v57 = vpop.permute.xlu1 %4209 }
0x1ce8   :  { %9008 = vst [vmem:[#allocation13_spill] sm:$0xff] %v8118_v57  ;;  %v8120_v31 = vpop.permute.xlu0 %4237  ;;  %9012 = vst [vmem:[#allocation17_spill] sm:$0xff] %v8139_v22  ;;  %v9018_v57 = vld [vmem:[#allocation29_spill] sm:$0xff] }
0x1ce9   :  { %9009 = vst [vmem:[#allocation11_spill] sm:$0xff] %v8120_v31  ;;  %v1697_v31 = vcombine.low %v8127_v13, %v8130_v37  ;;  %v1873_v55 = vcombine.low %v9019_v40, %v9018_v57 }
0x1ceb   :  { %v8132_v51 = vpop.permute.xlu1 %4211 }
0x1cec   :  { %9010 = vst [vmem:[#allocation14_spill] sm:$0xff] %v8132_v51  ;;  %v8134_v17 = vpop.permute.xlu0 %4239  ;;  %v1857_v51 = vcombine.low %v9017_v12, %v9016_v23 }
0x1ced   :  { %9011 = vst [vmem:[#allocation12_spill] sm:$0xff] %v8134_v17  ;;  %v4274_v17 = vsel %vm4273_vm12, %v1697_v31, %v7839_v54  ;;  %v8166_v31 = vrot.slane %v1841_v14, %v6676_v6 }
0x1cee   :  { %v8169_v18 = vrot.slane %v1857_v51, %v6676_v6 }
0x1cef   :  { %v8144_v34 = vpop.permute.xlu1 %4219 }
0x1cf0   :  { %9013 = vst [vmem:[#allocation15_spill] sm:$0xff] %v8144_v34  ;;  %v4010_v8 = vpop.permute.xlu0 %4009  ;;  %v1833_v34 = vcombine.low %v8139_v22, %v8142_v3  ;;  %v8175_v22 = vrot.slane %v1873_v55, %v6676_v6  ;;  %v1905_v51 = vcombine.low %v8166_v31, %v8169_v18  ;;  %v9023_v55 = vld [vmem:[#allocation7_spill] sm:$0xff] }
0x1cf1   :  { %v4298_v56 = vsel %vm151_vm5, %v4274_v17, %v4010_v8 }
0x1cf2   :  { %v4322_v43 = vsel %vm57_vm2, %v4298_v56, %v7560_v29  ;;  %v4275_v8 = vsel %vm4273_vm12, %v1833_v34, %v7892_v53  ;;  %v8178_v29 = vrot.slane %v1889_v1, %v6676_v6 }
0x1cf3   :  { %v8161_v52 = vpop.permute.xlu1 %4221  ;;  %v4347_v54 = vsel %vm4346_vm13, %v4322_v43, %v8024_v19  ;;  %v9022_v19 = vld [vmem:[#allocation37_spill] sm:$0xff] }
0x1cf4   :  { %5855 = vmatmul.mubr.msk.f32.vlgmr.msra.gmra.mrb[12].mxu1 %vm4374_vm14, %v4347_v54  ;;  %v4012_v17 = vpop.permute.xlu0 %4011  ;;  %v1937_v14 = vcombine.low %v8175_v22, %v8178_v29  ;;  %v9024_v54 = vmov 0.0|0.0  }
0x1cf5   :  { %v4299_v56 = vsel %vm151_vm5, %v4275_v8, %v4012_v17  ;;  %5857 = vmatprep.mubr.msk.f32.mxu1 %vm6115_vm0, %v8938_v45  ;;  %5982 = vmatpush3.bf16.msra.mxu1 %v7636_v11  ;;  %v1586_v8 = vcombine.high %v8991_v25, %v8990_v58  ;;  %v1634_v17 = vcombine.high %v8079_v60, %v8082_v30 }
0x1cf6   :  { %v4323_v43 = vsel %vm57_vm2, %v4299_v56, %v9022_v19  ;;  %5882 = vmatprep.subr.mxu1 %v8938_v45  ;;  %v1666_v56 = vcombine.high %v8085_v28, %v8088_v16  ;;  %v8212_v19 = vrot.slane %v1905_v51, %v6722_v7  ;;  %v1770_v60 = vcombine.high %v8107_v33, %v8110_v5 }
0x1cf7   :  { %v8186_v53 = vpop.permute.xlu1 %4223  ;;  %v4348_v34 = vsel %vm4346_vm13, %v4323_v43, %v8034_v46  ;;  %v1570_v46 = vcombine.high %v8989_v50, %v8988_v2  ;;  %v8215_v43 = vrot.slane %v1937_v14, %v6722_v7  ;;  %v1618_v2 = vcombine.high %v8995_v49, %v8994_v32 }
0x1cf8   :  { %5858 = vmatmul.mubr.msk.f32.gmra.mrb[14].mxu1 %vm4374_vm14, %v4348_v34  ;;  %v1602_v34 = vcombine.high %v8993_v48, %v8992_v24  ;;  %v8227_v25 = vrot.slane %v1586_v8, %v6676_v6  ;;  %v1802_v30 = vcombine.high %v8113_v39, %v8116_v4  ;;  %v8236_v48 = vrot.slane %v1634_v17, %v6722_v7 }
0x1cf9   :  { %5860 = vmatprep.mubr.msk.f32.mxu1 %vm6115_vm0, %v8938_v45  ;;  %5883 = vmatpush3.msk.msra.mxu1 %vm64_vm1, %v9023_v55  ;;  %v8224_v58 = vrot.slane %v1570_v46, %v6676_v6  ;;  %v1969_v24 = vcombine.low %v8212_v19, %v8215_v43  ;;  %v8239_v32 = vrot.slane %v1666_v56, %v6722_v7 }
0x1cfa   :  { %5986 = vmatprep.subr.bf16.mxu1 %v9024_v54  ;;  %v8242_v49 = vrot.slane %v1602_v34, %v6676_v6  ;;  %v8245_v28 = vrot.slane %v1618_v2, %v6676_v6  ;;  %v1706_v5 = vcombine.high %v8999_v41, %v8998_v9  ;;  %v1722_v4 = vcombine.high %v9001_v38, %v9000_v44 }
0x1cfb   :  { %v8200_v1 = vpop.permute.xlu1 %4231  ;;  %v1738_v33 = vcombine.high %v9003_v20, %v9002_v42  ;;  %v1754_v16 = vcombine.high %v9005_v36, %v9004_v63  ;;  %v4276_v51 = vsel %vm4273_vm12, %v1969_v24, %v7925_v26  ;;  %v1649_v46 = vcombine.low %v8224_v58, %v8227_v25  ;;  %v9025_v42 = vld [vmem:[#allocation36_spill] sm:$0xff] }
0x1cfc   :  { %v8262_v41 = vrot.slane %v1770_v60, %v6722_v7  ;;  %v8265_v38 = vrot.slane %v1802_v30, %v6722_v7  ;;  %v1906_v20 = vcombine.high %v8166_v31, %v8169_v18  ;;  %v1938_v36 = vcombine.high %v8175_v22, %v8178_v29 }
0x1cfd   :  { %v1699_v26 = vcombine.low %v8236_v48, %v8239_v32  ;;  %v1681_v63 = vcombine.low %v8242_v49, %v8245_v28  ;;  %v8279_v8 = vrot.slane %v1706_v5, %v6676_v6  ;;  %v8282_v17 = vrot.slane %v1722_v4, %v6676_v6 }
0x1cfe   :  { %v8289_v22 = vrot.slane %v1738_v33, %v6676_v6  ;;  %v8292_v31 = vrot.slane %v1754_v16, %v6676_v6  ;;  %v1842_v29 = vcombine.high %v9015_v21, %v9014_v0  ;;  %v1858_v60 = vcombine.high %v9017_v12, %v9016_v23  ;;  %v9026_v23 = vld [vmem:[#allocation33_spill] sm:$0xff] }
0x1cff   :  { %v8221_v50 = vpop.permute.xlu1 %4233  ;;  %v4280_v34 = vsel %vm4273_vm12, %v1699_v26, %v7941_v47  ;;  %v1835_v30 = vcombine.low %v8262_v41, %v8265_v38  ;;  %v1890_v21 = vcombine.high %v9021_v59, %v9020_v62  ;;  %v8311_v47 = vrot.slane %v1906_v20, %v6722_v7 }
0x1d00   :  { %v8314_v0 = vrot.slane %v1938_v36, %v6722_v7  ;;  %v8322_v12 = vrot.slane %v1681_v63, %v6722_v7  ;;  %v1785_v62 = vcombine.low %v8279_v8, %v8282_v17  ;;  %v1817_v59 = vcombine.low %v8289_v22, %v8292_v31  ;;  %v9028_v63 = vld [vmem:[#allocation52_spill] sm:$0xff] }
0x1d01   :  { %v4281_v33 = vsel %vm4273_vm12, %v1835_v30, %v7953_v27  ;;  %v1698_v16 = vcombine.high %v8127_v13, %v8130_v37  ;;  %v8351_v13 = vrot.slane %v1890_v21, %v6676_v6  ;;  %v9030_v30 = vld [vmem:[#allocation43_spill] sm:$0xff] }
0x1d02   :  { %v1971_v37 = vcombine.low %v8311_v47, %v8314_v0 }
0x1d03   :  { %v8251_v39 = vpop.permute.xlu1 %4235  ;;  %v4277_v26 = vsel %vm4273_vm12, %v1698_v16, %v8000_v61  ;;  %v9029_v61 = vld [vmem:[#allocation17_spill] sm:$0xff]  ;;  %v9033_v16 = vld [vmem:[#allocation32_spill] sm:$0xff] }
0x1d04   :  { %v4014_v14 = vpop.permute.xlu0 %4013 }
0x1d05   :  { %v4300_v44 = vsel %vm151_vm5, %v4276_v51, %v4014_v14  ;;  %v8338_v14 = vrot.slane %v1842_v29, %v6676_v6  ;;  %v8367_v29 = vrot.slane %v1785_v62, %v6722_v7 }
0x1d06   :  { %v4324_v9 = vsel %vm57_vm2, %v4300_v44, %v9025_v42  ;;  %v9027_v44 = vld [vmem:[#allocation34_spill] sm:$0xff] }
0x1d07   :  { %v8284_v56 = vpop.permute.xlu1 %4243  ;;  %v4349_v18 = vsel %vm4346_vm13, %v4324_v9, %v8039_v35  ;;  %v1874_v35 = vcombine.high %v9019_v40, %v9018_v57  ;;  %v8319_v57 = vrot.slane %v1649_v46, %v6722_v7 }
0x1d08   :  { %5861 = vmatmul.mubr.msk.f32.gmra.mrb[16].mxu1 %vm4374_vm14, %v4349_v18  ;;  %v4022_v2 = vpop.permute.xlu0 %4021  ;;  %v4282_v18 = vsel %vm4273_vm12, %v1971_v37, %v9028_v63  ;;  %v9034_v37 = vld [vmem:[#allocation65_spill] sm:$0xff] }
0x1d09   :  { %v4304_v24 = vsel %vm151_vm5, %v4280_v34, %v4022_v2  ;;  %5884 = vmatprep.mubr.msk.f32.mxu1 %vm6115_vm0, %v8938_v45  ;;  %v8348_v27 = vrot.slane %v1874_v35, %v6676_v6  ;;  %v1701_v36 = vcombine.low %v8319_v57, %v8322_v12  ;;  %v8370_v34 = vrot.slane %v1817_v59, %v6722_v7 }
0x1d0a   :  { %v4328_v40 = vsel %vm57_vm2, %v4304_v24, %v9026_v23  ;;  %v1834_v35 = vcombine.high %v9029_v61, %v8142_v3  ;;  %v1650_v59 = vcombine.high %v8224_v58, %v8227_v25 }
0x1d0b   :  { %v4353_v5 = vsel %vm4346_vm13, %v4328_v40, %v8047_v15  ;;  %v8326_v4 = vpop.permute.xlu1 %4245  ;;  %v8341_v15 = vrot.slane %v1858_v60, %v6676_v6  ;;  %v1953_v23 = vcombine.low %v8348_v27, %v8351_v13  ;;  %v9031_v40 = vld [vmem:[#allocation35_spill] sm:$0xff] }
0x1d0c   :  { %5885 = vmatmul.mubr.msk.f32.vlgmr.msra.gmra.mrb[18].mxu1 %vm4374_vm14, %v4353_v5  ;;  %v4024_v51 = vpop.permute.xlu0 %4023  ;;  %v9032_v5 = vld [vmem:[#allocation10_spill] sm:$0xff]  ;;  %v8429_v61 = vrot.slane %v1650_v59, %v6722_v7  ;;  %v1700_v59 = vcombine.high %v8236_v48, %v8239_v32  ;;  %v9045_v32 = vld [vmem:[#allocation59_spill] sm:$0xff] }
0x1d0d   :  { %v4305_v46 = vsel %vm151_vm5, %v4281_v33, %v4024_v51  ;;  %5887 = vmatprep.mubr.msk.f32.mxu1 %vm6115_vm0, %v8938_v45  ;;  %5988 = vmatpush3.bf16.msra.mxu1 %v7636_v11  ;;  %v1921_v21 = vcombine.low %v8338_v14, %v8341_v15  ;;  %v1682_v33 = vcombine.high %v8242_v49, %v8245_v28  ;;  %v9036_v28 = vld [vmem:[#allocation45_spill] sm:$0xff] }
0x1d0e   :  { %v4329_v20 = vsel %vm57_vm2, %v4305_v46, %v9027_v44  ;;  %5912 = vmatprep.subr.mxu1 %v8938_v45  ;;  %v4278_v51 = vsel %vm4273_vm12, %v1834_v35, %v9033_v16  ;;  %v1970_v49 = vcombine.high %v8212_v19, %v8215_v43  ;;  %v9038_v19 = vld [vmem:[#allocation13_spill] sm:$0xff]  ;;  %v9039_v35 = vld [vmem:[#allocation58_spill] sm:$0xff] }
0x1d0f   :  { %v4016_v42 = vpop.permute.xlu1 %4015  ;;  %v4354_v9 = vsel %vm4346_vm13, %v4329_v20, %v8052_v10  ;;  %v9035_v20 = vld [vmem:[#allocation54_spill] sm:$0xff] }
0x1d10   :  { %v4301_v2 = vsel %vm151_vm5, %v4277_v26, %v4016_v42  ;;  %5888 = vmatmul.mubr.msk.f32.gmra.mrb[20].mxu1 %vm4374_vm14, %v4354_v9  ;;  %v4026_v60 = vpop.permute.xlu0 %4025  ;;  %v4286_v26 = vsel %vm4273_vm12, %v1701_v36, %v9035_v20  ;;  %v1837_v42 = vcombine.low %v8367_v29, %v8370_v34  ;;  %v8418_v36 = vrot.slane %v1921_v21, %v6722_v7  ;;  %v9042_v16 = vld [vmem:[#allocation46_spill] sm:$0xff] }
0x1d11   :  { %v4325_v10 = vsel %vm57_vm2, %v4301_v2, %v9030_v30  ;;  %v4306_v24 = vsel %vm151_vm5, %v4282_v18, %v4026_v60  ;;  %5890 = vmatprep.mubr.msk.f32.mxu1 %vm6115_vm0, %v8938_v45  ;;  %5913 = vmatpush3.msk.msra.mxu1 %vm64_vm1, %v9023_v55  ;;  %v8421_v18 = vrot.slane %v1953_v23, %v6722_v7  ;;  %v9037_v2 = vld [vmem:[#allocation6_spill] sm:$0xff]  ;;  %v9041_v23 = vld [vmem:[#allocation56_spill] sm:$0xff] }
0x1d12   :  { %v4330_v3 = vsel %vm57_vm2, %v4306_v24, %v9031_v40  ;;  %v4350_v62 = vsel %vm4346_vm13, %v4325_v10, %v9032_v5  ;;  %5992 = vmatprep.subr.bf16.mxu1 %v9024_v54  ;;  %v4279_v30 = vsel %vm4273_vm12, %v1970_v49, %v9039_v35  ;;  %v9040_v10 = vld [vmem:[#allocation67_spill] sm:$0xff]  ;;  %v4287_v40 = vsel %vm4273_vm12, %v1837_v42, %v9041_v23  ;;  %v9044_v20 = vld [vmem:[#allocation14_spill] sm:$0xff]  ;;  %v9050_v23 = vld [vmem:[#allocation41_spill] sm:$0xff] }
0x1d13   :  { %5870 = vmatmul.mubr.msk.f32.vlgmr.msra.gmra.mrb[10].mxu0 %vm4374_vm14, %v4350_v62  ;;  %v4018_v46 = vpop.permute.xlu1 %4017  ;;  %v4355_v44 = vsel %vm4346_vm13, %v4330_v3, %v9034_v37  ;;  %v8439_v3 = vrot.slane %v1682_v33, %v6722_v7  ;;  %v1973_v33 = vcombine.low %v8418_v36, %v8421_v18  ;;  %v9043_v37 = vld [vmem:[#allocation40_spill] sm:$0xff]  ;;  %v9047_v49 = vld [vmem:[#allocation38_spill] sm:$0xff] }
0x1d14   :  { %v4302_v58 = vsel %vm151_vm5, %v4278_v51, %v4018_v46  ;;  %5891 = vmatmul.mubr.msk.f32.gmra.mrb[22].mxu1 %vm4374_vm14, %v4355_v44  ;;  %v4034_v25 = vpop.permute.xlu0 %4033  ;;  %5872 = vmatprep.mubr.msk.f32.mxu0 %vm6115_vm0, %v8938_v45 }
0x1d15   :  { %v4326_v9 = vsel %vm57_vm2, %v4302_v58, %v9036_v28  ;;  %v4310_v63 = vsel %vm151_vm5, %v4286_v26, %v4034_v25  ;;  %5985 = vmatpush3.bf16.msra.mxu0 %v7636_v11  ;;  %5914 = vmatprep.mubr.msk.f32.mxu1 %vm6115_vm0, %v8938_v45  ;;  %v4283_v26 = vsel %vm4273_vm12, %v1700_v59, %v9045_v32  ;;  %v9046_v58 = vld [vmem:[#allocation5_spill] sm:$0xff] }
0x1d16   :  { %v4334_v60 = vsel %vm57_vm2, %v4310_v63, %v9037_v2  ;;  %v4351_v43 = vsel %vm4346_vm13, %v4326_v9, %v9038_v19  ;;  %5897 = vmatprep.subr.mxu0 %v8938_v45  ;;  %v4288_v28 = vsel %vm4273_vm12, %v1973_v33, %v9047_v49  ;;  %v1703_v2 = vcombine.low %v8429_v61, %v8439_v3  ;;  %v9048_v19 = vld [vmem:[#allocation47_spill] sm:$0xff] }
0x1d17   :  { %v4359_v24 = vsel %vm4346_vm13, %v4334_v60, %v9040_v10  ;;  %5873 = vmatmul.mubr.msk.f32.gmra.mrb[16].mxu0 %vm4374_vm14, %v4351_v43  ;;  %v4020_v21 = vpop.permute.xlu1 %4019  ;;  %v1836_v60 = vcombine.high %v8262_v41, %v8265_v38  ;;  %v1818_v10 = vcombine.high %v8289_v22, %v8292_v31  ;;  %v9051_v38 = vld [vmem:[#allocation60_spill] sm:$0xff] }
0x1d18   :  { %v4303_v5 = vsel %vm151_vm5, %v4279_v30, %v4020_v21  ;;  %5915 = vmatmul.mubr.msk.f32.vlgmr.msra.gmra.mrb[24].mxu1 %vm4374_vm14, %v4359_v24  ;;  %v4036_v62 = vpop.permute.xlu0 %4035  ;;  %5875 = vmatprep.mubr.msk.f32.mxu0 %vm6115_vm0, %v8938_v45  ;;  %v1786_v30 = vcombine.high %v8279_v8, %v8282_v17  ;;  %v9049_v24 = vld [vmem:[#allocation15_spill] sm:$0xff]  ;;  %v9053_v17 = vld [vmem:[#allocation57_spill] sm:$0xff] }
0x1d19   :  { %v4327_v51 = vsel %vm57_vm2, %v4303_v5, %v9042_v16  ;;  %v4311_v46 = vsel %vm151_vm5, %v4287_v40, %v4036_v62  ;;  %5917 = vmatprep.mubr.msk.f32.mxu1 %vm6115_vm0, %v8938_v45  ;;  %5898 = vmatpush3.msk.msra.mxu0 %vm64_vm1, %v9023_v55  ;;  %v4284_v40 = vsel %vm4273_vm12, %v1836_v60, %v9051_v38  ;;  %v9052_v62 = vld [vmem:[#allocation8_spill] sm:$0xff] }
0x1d1a   :  { %v4335_v44 = vsel %vm57_vm2, %v4311_v46, %v9043_v37  ;;  %v4352_v48 = vsel %vm4346_vm13, %v4327_v51, %v9044_v20  ;;  %5994 = vmatpush3.bf16.msra.mxu1 %v7636_v11  ;;  %5989 = vmatprep.subr.bf16.mxu0 %v9024_v54  ;;  %v4292_v22 = vsel %vm4273_vm12, %v1703_v2, %v9053_v17  ;;  %v9054_v51 = vld [vmem:[#allocation48_spill] sm:$0xff]  ;;  %v9055_v20 = vld [vmem:[#allocation42_spill] sm:$0xff] }
0x1d1b   :  { %5876 = vmatmul.mubr.msk.f32.gmra.mrb[18].mxu0 %vm4374_vm14, %v4352_v48  ;;  %v4028_v42 = vpop.permute.xlu1 %4027  ;;  %v4360_v25 = vsel %vm4346_vm13, %v4335_v44, %v9046_v58  ;;  %5942 = vmatprep.subr.mxu1 %v8938_v45  ;;  %v1972_v16 = vcombine.high %v8311_v47, %v8314_v0  ;;  %v8513_v37 = vrot.slane %v1786_v30, %v6722_v7  ;;  %v9056_v0 = vld [vmem:[#allocation61_spill] sm:$0xff] }
0x1d1c   :  { %v4307_v9 = vsel %vm151_vm5, %v4283_v26, %v4028_v42  ;;  %5918 = vmatmul.mubr.msk.f32.gmra.mrb[26].mxu1 %vm4374_vm14, %v4360_v25  ;;  %v4038_v63 = vpop.permute.xlu0 %4037  ;;  %5899 = vmatprep.mubr.msk.f32.mxu0 %vm6115_vm0, %v8938_v45  ;;  %v8516_v44 = vrot.slane %v1818_v10, %v6722_v7  ;;  %v9057_v26 = vld [vmem:[#allocation11_spill] sm:$0xff]  ;;  %v1954_v2 = vcombine.high %v8348_v27, %v8351_v13  ;;  %v9061_v13 = vld [vmem:[#allocation50_spill] sm:$0xff] }
0x1d1d   :  { %v4331_v43 = vsel %vm57_vm2, %v4307_v9, %v9048_v19  ;;  %v4312_v35 = vsel %vm151_vm5, %v4288_v28, %v4038_v63  ;;  %5920 = vmatprep.mubr.msk.f32.mxu1 %vm6115_vm0, %v8938_v45  ;;  %v4285_v32 = vsel %vm4273_vm12, %v1972_v16, %v9056_v0  ;;  %v9058_v28 = vld [vmem:[#allocation49_spill] sm:$0xff]  ;;  %v1922_v63 = vcombine.high %v8338_v14, %v8341_v15  ;;  %v9068_v0 = vld [vmem:[#allocation66_spill] sm:$0xff] }
0x1d1e   :  { %v4356_v21 = vsel %vm4346_vm13, %v4331_v43, %v9049_v24  ;;  %v4336_v41 = vsel %vm57_vm2, %v4312_v35, %v9050_v23  ;;  %5943 = vmatpush3.msk.msra.mxu1 %vm64_vm1, %v9023_v55  ;;  %v1839_v60 = vcombine.low %v8513_v37, %v8516_v44  ;;  %v9060_v43 = vld [vmem:[#allocation31_spill] sm:$0xff]  ;;  %v1968_v10 = vrot.slane %v1954_v2, %v6722_v7 }
0x1d1f   :  { %5900 = vmatmul.mubr.msk.f32.vlgmr.msra.gmra.mrb[20].mxu0 %vm4374_vm14, %v4356_v21  ;;  %v4030_v5 = vpop.permute.xlu1 %4029  ;;  %v4361_v8 = vsel %vm4346_vm13, %v4336_v41, %v9052_v62  ;;  %v1936_v30 = vrot.slane %v1922_v63, %v6722_v7  ;;  %v9062_v21 = vld [vmem:[#allocation44_spill] sm:$0xff]  ;;  %v9063_v41 = vld [vmem:[#allocation63_spill] sm:$0xff] }
0x1d20   :  { %v4308_v31 = vsel %vm151_vm5, %v4284_v40, %v4030_v5  ;;  %5921 = vmatmul.mubr.msk.f32.gmra.mrb[28].mxu1 %vm4374_vm14, %v4361_v8  ;;  %v4046_v59 = vpop.permute.xlu0 %4045  ;;  %5902 = vmatprep.mubr.msk.f32.mxu0 %vm6115_vm0, %v8938_v45  ;;  %v4293_v14 = vsel %vm4273_vm12, %v1839_v60, %v9060_v43  ;;  %v9065_v8 = vld [vmem:[#allocation51_spill] sm:$0xff] }
0x1d21   :  { %v4332_v46 = vsel %vm57_vm2, %v4308_v31, %v9054_v51  ;;  %v4316_v33 = vsel %vm151_vm5, %v4292_v22, %v4046_v59  ;;  %5991 = vmatpush3.bf16.msra.mxu0 %v7636_v11  ;;  %5944 = vmatprep.mubr.msk.f32.mxu1 %vm6115_vm0, %v8938_v45  ;;  %v1975_v22 = vcombine.low %v1936_v30, %v1968_v10  ;;  %v9066_v59 = vld [vmem:[#allocation64_spill] sm:$0xff] }
0x1d22   :  { %v4340_v48 = vsel %vm57_vm2, %v4316_v33, %v9055_v20  ;;  %v4357_v47 = vsel %vm4346_vm13, %v4332_v46, %v8161_v52  ;;  %5927 = vmatprep.subr.mxu0 %v8938_v45  ;;  %v1702_v52 = vcombine.high %v8319_v57, %v8322_v12  ;;  %v9059_v12 = vld [vmem:[#allocation62_spill] sm:$0xff]  ;;  %v1704_v46 = vcombine.high %v8429_v61, %v8439_v3 }
0x1d23   :  { %v4365_v42 = vsel %vm4346_vm13, %v4340_v48, %v9057_v26  ;;  %5903 = vmatmul.mubr.msk.f32.gmra.mrb[22].mxu0 %vm4374_vm14, %v4357_v47  ;;  %v4032_v58 = vpop.permute.xlu1 %4031  ;;  %v6098_v48 = vld [vmem:[%s8830_s8 + $0x10] sm:$0xf]  ;;  %s6148_s8 = smov 24  }
0x1d24   :  { %v4309_v25 = vsel %vm151_vm5, %v4285_v32, %v4032_v58  ;;  %5945 = vmatmul.mubr.msk.f32.vlgmr.msra.gmra.mrb[30].mxu1 %vm4374_vm14, %v4365_v42  ;;  %v3954_v49 = vpop.permute.xlu0 %3953  ;;  %5905 = vmatprep.mubr.msk.f32.mxu0 %vm6115_vm0, %v8938_v45  ;;  %v4295_v32 = vsel %vm4273_vm12, %v1704_v46, %v9068_v0  ;;  %v9069_v58 = vld [vmem:[#allocation55_spill] sm:$0xff] }
0x1d25   :  { %v4333_v9 = vsel %vm57_vm2, %v4309_v25, %v9058_v28  ;;  %5928 = vmatpush3.msk.msra.mxu0 %vm64_vm1, %v9023_v55  ;;  %5947 = vmatprep.mubr.msk.f32.mxu1 %vm6115_vm0, %v8938_v45  ;;  %v4289_v55 = vsel %vm4273_vm12, %v1702_v52, %v9059_v12  ;;  %v1840_v28 = vcombine.high %v8513_v37, %v8516_v44 }
0x1d26   :  { %v4358_v57 = vsel %vm4346_vm13, %v4333_v9, %v8186_v53  ;;  %5995 = vmatprep.subr.bf16.mxu0 %v9024_v54  ;;  %v1838_v53 = vcombine.high %v8367_v29, %v8370_v34  ;;  %v9064_v34 = vld [vmem:[#allocation12_spill] sm:$0xff]  ;;  %v9070_v9 = vld [vmem:[#allocation9_spill] sm:$0xff] }
0x1d27   :  { %5906 = vmatmul.mubr.msk.f32.gmra.mrb[24].mxu0 %vm4374_vm14, %v4358_v57  ;;  %v4040_v19 = vpop.permute.xlu1 %4039  ;;  %v4296_v63 = vsel %vm4273_vm12, %v1840_v28, %v9070_v9  ;;  %v9071_v57 = vld [vmem:[#allocation39_spill] sm:$0xff] }
0x1d28   :  { %v4313_v15 = vsel %vm151_vm5, %v4289_v55, %v4040_v19  ;;  %v4048_v27 = vpop.permute.xlu0 %4047  ;;  %5929 = vmatprep.mubr.msk.f32.mxu0 %vm6115_vm0, %v8938_v45  ;;  %v4290_v38 = vsel %vm4273_vm12, %v1838_v53, %v9063_v41  ;;  %v1976_v19 = vcombine.high %v1936_v30, %v1968_v10 }
0x1d29   :  { %v4337_v54 = vsel %vm57_vm2, %v4313_v15, %v9061_v13  ;;  %v4317_v35 = vsel %vm151_vm5, %v4293_v14, %v4048_v27 }
0x1d2a   :  { %v4362_v24 = vsel %vm4346_vm13, %v4337_v54, %v8200_v1  ;;  %v4341_v23 = vsel %vm57_vm2, %v4317_v35, %v9062_v21  ;;  %v1974_v1 = vcombine.high %v8418_v36, %v8421_v18  ;;  %v4294_v18 = vsel %vm4273_vm12, %v1975_v22, %v3954_v49 }
0x1d2b   :  { %5930 = vmatmul.mubr.msk.f32.vlgmr.msra.gmra.mrb[26].mxu0 %vm4374_vm14, %v4362_v24  ;;  %v4042_v29 = vpop.permute.xlu1 %4041  ;;  %v4366_v40 = vsel %vm4346_vm13, %v4341_v23, %v9064_v34 }
0x1d2c   :  { %v4314_v5 = vsel %vm151_vm5, %v4290_v38, %v4042_v29  ;;  %5948 = vmatmul.mubr.msk.f32.gmra.mrb[32].mxu1 %vm4374_vm14, %v4366_v40  ;;  %v4146_v62 = vpop.permute.xlu0 %4145  ;;  %5932 = vmatprep.mubr.msk.f32.mxu0 %vm6115_vm0, %v8938_v45  ;;  %v4291_v16 = vsel %vm4273_vm12, %v1974_v1, %v9066_v59 }
0x1d2d   :  { %v4338_v17 = vsel %vm57_vm2, %v4314_v5, %v9065_v8  ;;  %5997 = vmatpush3.bf16.msra.mxu0 %v7636_v11  ;;  %5950 = vmatprep.mubr.msk.f32.mxu1 %vm6115_vm0, %v8938_v45 }
0x1d2e   :  { %v4363_v31 = vsel %vm4346_vm13, %v4338_v17, %v8221_v50  ;;  %5957 = vmatprep.subr.mxu0 %v8938_v45  ;;  %v9067_v50 = vld [vmem:[#allocation53_spill] sm:$0xff] }
0x1d2f   :  { %5933 = vmatmul.mubr.msk.f32.gmra.mrb[28].mxu0 %vm4374_vm14, %v4363_v31  ;;  %v4044_v36 = vpop.permute.xlu1 %4043 }
0x1d30   :  { %v4315_v51 = vsel %vm151_vm5, %v4291_v16, %v4044_v36  ;;  %v4050_v11 = vpop.permute.xlu0 %4049  ;;  %5935 = vmatprep.mubr.msk.f32.mxu0 %vm6115_vm0, %v8938_v45 }
0x1d31   :  { %v4339_v33 = vsel %vm57_vm2, %v4315_v51, %v9067_v50  ;;  %v4318_v20 = vsel %vm151_vm5, %v4294_v18, %v4050_v11  ;;  %5958 = vmatpush3.msk.msra.mxu0 %vm64_vm1, %v6098_v48  ;;  %vm5599_vm1 = vcmask 261120  }
0x1d32   :  { %v4364_v47 = vsel %vm4346_vm13, %v4339_v33, %v8251_v39  ;;  %v4342_v26 = vsel %vm57_vm2, %v4318_v20, %v4146_v62 }
0x1d33   :  { %5936 = vmatmul.mubr.msk.f32.gmra.mrb[30].mxu0 %vm4374_vm14, %v4364_v47  ;;  %v4052_v61 = vpop.permute.xlu1 %4051 }
0x1d34   :  { %v4319_v3 = vsel %vm151_vm5, %v4295_v32, %v4052_v61  ;;  %v4242_v42 = vpop.permute.xlu0 %4241  ;;  %5959 = vmatprep.mubr.msk.f32.mxu0 %vm6115_vm0, %v8938_v45 }
0x1d35   :  { %v4343_v25 = vsel %vm57_vm2, %v4319_v3, %v9069_v58  ;;  %v4367_v49 = vsel %vm4346_vm13, %v4342_v26, %v4242_v42 }
0x1d36   :  { %v4368_v39 = vsel %vm4346_vm13, %v4343_v25, %v8284_v56  ;;  %5951 = vmatmul.mubr.msk.f32.gmra.mrb[34].mxu1 %vm4374_vm14, %v4367_v49 }
0x1d37   :  { %5960 = vmatmul.mubr.msk.f32.vlgmr.msra.gmra.mrb[32].mxu0 %vm4374_vm14, %v4368_v39  ;;  %v3960_v52 = vpop.permute.xlu1 %3959 }
0x1d38   :  { %5962 = vmatprep.mubr.msk.f32.mxu0 %vm6115_vm0, %v8938_v45  ;;  %v4297_v37 = vsel %vm4273_vm12, %v1976_v19, %v3960_v52 }
0x1d3b   :  { %v4054_v2 = vpop.permute.xlu1 %4053 }
0x1d3c   :  { %v4320_v60 = vsel %vm151_vm5, %v4296_v63, %v4054_v2 }
0x1d3d   :  { %v4344_v56 = vsel %vm57_vm2, %v4320_v60, %v9071_v57 }
0x1d3e   :  { %v4369_v12 = vsel %vm4346_vm13, %v4344_v56, %v8326_v4 }
0x1d3f   :  { %5963 = vmatmul.mubr.msk.f32.gmra.mrb[34].mxu0 %vm4374_vm14, %v4369_v12  ;;  %v4152_v55 = vpop.permute.xlu1 %4151 }
0x1d40   :  { %5965 = vmatprep.mubr.msk.f32.mxu0 %vm6115_vm0, %v8938_v45  ;;  %vm5597_vm0 = vcmask 228352  }
0x1d43   :  { %v4056_v44 = vpop.permute.xlu1 %4055 }
0x1d44   :  { %v4321_v43 = vsel %vm151_vm5, %v4297_v37, %v4056_v44 }
0x1d45   :  { %v4345_v14 = vsel %vm57_vm2, %v4321_v43, %v4152_v55 }
0x1d47   :  { %v4248_v15 = vpop.permute.xlu1 %4247 }
0x1d48   :  { %v4370_v27 = vsel %vm4346_vm13, %v4345_v14, %v4248_v15 }
0x1d49   :  { %5966 = vmatmul.mubr.msk.f32.gmra.mrb[36].mxu0 %vm4374_vm14, %v4370_v27 }
0x1dc7   :  { %v4453_v4 = vpop.f32.mrb[12].mxu1 }
0x1dc8   :  { %v5856_v53 = vpop.f32.mrb[13].mxu1 }
0x1dcb   :  { %v4458_v13 = vpop.f32.mrb[14].mxu1 }
0x1dcc   :  { %v5859_v54 = vpop.f32.mrb[15].mxu1 }
0x1ddb   :  { %v4463_v35 = vpop.f32.mrb[16].mxu1 }
0x1ddc   :  { %v5862_v24 = vpop.f32.mrb[17].mxu1 }
0x1ddf   :  { %v4631_v45 = vpop.f32.mrb[18].mxu1 }
0x1de0   :  { %v5090_v30 = vcombine.low %v4453_v4, %v4631_v45  ;;  %v5091_v10 = vcombine.high %v4453_v4, %v4631_v45  ;;  %v5886_v21 = vpop.f32.mrb[19].mxu1 }
0x1de2   :  { %v8645_v47 = vrot.slane %v5090_v30, %v6676_v6  ;;  %v8648_v0 = vrot.slane %v5091_v10, %v6676_v6 }
0x1de3   :  { %v4636_v23 = vpop.f32.mrb[20].mxu1 }
0x1de4   :  { %v5226_v41 = vcombine.low %v4458_v13, %v4636_v23  ;;  %v5227_v38 = vcombine.high %v4458_v13, %v4636_v23  ;;  %v5889_v29 = vpop.f32.mrb[21].mxu1 }
0x1de6   :  { %v4542_v34 = vpop.f32.mrb[10].mxu0  ;;  %v8663_v60 = vrot.slane %v5226_v41, %v6676_v6  ;;  %v8666_v57 = vrot.slane %v5227_v38, %v6676_v6 }
0x1de7   :  { %v5871_v40 = vpop.f32.mrb[11].mxu0  ;;  %v4641_v5 = vpop.f32.mrb[22].mxu1 }
0x1de8   :  { %v5362_v62 = vcombine.low %v4463_v35, %v4641_v5  ;;  %v5363_v1 = vcombine.high %v4463_v35, %v4641_v5  ;;  %v5892_v8 = vpop.f32.mrb[23].mxu1 }
0x1dea   :  { %v4547_v17 = vpop.f32.mrb[16].mxu0  ;;  %v8683_v4 = vrot.slane %v5362_v62, %v6676_v6  ;;  %v8686_v53 = vrot.slane %v5363_v1, %v6676_v6 }
0x1deb   :  { %v5874_v22 = vpop.f32.mrb[17].mxu0  ;;  %v8638_v31 = vpop.f32.mrb[24].mxu1 }
0x1dec   :  { %v5916_v59 = vpop.f32.mrb[25].mxu1 }
0x1dee   :  { %v4552_v16 = vpop.f32.mrb[18].mxu0 }
0x1def   :  { %v5877_v36 = vpop.f32.mrb[19].mxu0  ;;  %v8640_v18 = vpop.f32.mrb[26].mxu1 }
0x1df0   :  { %v5919_v51 = vpop.f32.mrb[27].mxu1 }
0x1df2   :  { %v4720_v11 = vpop.f32.mrb[20].mxu0 }
0x1df3   :  { %v5106_v46 = vcombine.low %v4542_v34, %v4720_v11  ;;  %v5107_v50 = vcombine.high %v4542_v34, %v4720_v11  ;;  %v5901_v33 = vpop.f32.mrb[21].mxu0  ;;  %v8642_v20 = vpop.f32.mrb[28].mxu1 }
0x1df4   :  { %v5922_v48 = vpop.f32.mrb[29].mxu1 }
0x1df5   :  { %v5114_v32 = vrot.slane %v5106_v46, %v6676_v6  ;;  %v8652_v61 = vrot.slane %v5107_v50, %v6676_v6 }
0x1df6   :  { %v4725_v3 = vpop.f32.mrb[22].mxu0 }
0x1df7   :  { %v5154_v26 = vcombine.low %v8645_v47, %v5114_v32  ;;  %v5155_v42 = vcombine.high %v8645_v47, %v5114_v32  ;;  %v5170_v58 = vcombine.low %v8648_v0, %v8652_v61  ;;  %v5171_v25 = vcombine.high %v8648_v0, %v8652_v61  ;;  %v5904_v49 = vpop.f32.mrb[23].mxu0  ;;  %v4987_v39 = vpop.f32.mrb[30].mxu1 }
0x1df8   :  { %v5242_v52 = vcombine.low %v4547_v17, %v4725_v3  ;;  %v5243_v28 = vcombine.high %v4547_v17, %v4725_v3  ;;  %v5122_v9 = vcombine.low %v8638_v31, %v4987_v39  ;;  %v5123_v63 = vcombine.high %v8638_v31, %v4987_v39  ;;  %v5946_v2 = vpop.f32.mrb[31].mxu1 }
0x1df9   :  { %v8717_v0 = vrot.slane %v5154_v26, %v6722_v7  ;;  %v5169_v32 = vrot.slane %v5155_v42, %v6722_v7 }
0x1dfa   :  { %v8669_v56 = vrot.slane %v5242_v52, %v6676_v6  ;;  %v8672_v12 = vrot.slane %v5243_v28, %v6676_v6  ;;  %v4730_v55 = vpop.f32.mrb[24].mxu0  ;;  %v5137_v51 = vrot.slane %v5123_v63, %v6676_v6  ;;  %v5178_v52 = vrot.slane %v5170_v58, %v6722_v7 }
0x1dfb   :  { %v5378_v19 = vcombine.low %v4552_v16, %v4730_v55  ;;  %v5379_v37 = vcombine.high %v4552_v16, %v4730_v55  ;;  %v5907_v44 = vpop.f32.mrb[25].mxu0  ;;  %v5185_v28 = vrot.slane %v5171_v25, %v6722_v7 }
0x1dfc   :  { %v5290_v43 = vcombine.low %v8663_v60, %v8669_v56  ;;  %v5291_v14 = vcombine.high %v8663_v60, %v8669_v56  ;;  %v5306_v15 = vcombine.low %v8666_v57, %v8672_v12  ;;  %v5307_v27 = vcombine.high %v8666_v57, %v8672_v12 }
0x1dfd   :  { %v8689_v13 = vrot.slane %v5378_v19, %v6676_v6  ;;  %v8692_v54 = vrot.slane %v5379_v37, %v6676_v6 }
0x1dfe   :  { %v4898_v35 = vpop.f32.mrb[26].mxu0  ;;  %v5321_v60 = vrot.slane %v5307_v27, %v6722_v7 }
0x1dff   :  { %v5426_v24 = vcombine.low %v8683_v4, %v8689_v13  ;;  %v5427_v45 = vcombine.high %v8683_v4, %v8689_v13  ;;  %v5442_v30 = vcombine.low %v8686_v53, %v8692_v54  ;;  %v5443_v10 = vcombine.high %v8686_v53, %v8692_v54  ;;  %v5931_v21 = vpop.f32.mrb[27].mxu0  ;;  %v4992_v23 = vpop.f32.mrb[32].mxu1 }
0x1e00   :  { %v5258_v41 = vcombine.low %v8640_v18, %v4992_v23  ;;  %v5259_v38 = vcombine.high %v8640_v18, %v4992_v23  ;;  %v5949_v29 = vpop.f32.mrb[33].mxu1  ;;  %v5130_v18 = vrot.slane %v5122_v9, %v6676_v6 }
0x1e01   :  { %v5457_v4 = vrot.slane %v5443_v10, %v6722_v7 }
0x1e02   :  { %v4903_v34 = vpop.f32.mrb[28].mxu0  ;;  %v5266_v9 = vrot.slane %v5258_v41, %v6676_v6  ;;  %v5273_v26 = vrot.slane %v5259_v38, %v6676_v6 }
0x1e03   :  { %v5934_v40 = vpop.f32.mrb[29].mxu0 }
0x1e06   :  { %v8704_v5 = vpop.f32.mrb[30].mxu0 }
0x1e07   :  { %v5937_v62 = vpop.f32.mrb[31].mxu0 }
0x1e09   :  { %v8706_v1 = vpop.f32.mrb[34].mxu1 }
0x1e0a   :  { %v5394_v8 = vcombine.low %v8642_v20, %v8706_v1  ;;  %v5395_v17 = vcombine.high %v8642_v20, %v8706_v1  ;;  %v5952_v22 = vpop.f32.mrb[35].mxu1  ;;  %v5076_v31 = vpop.f32.mrb[32].mxu0  ;;  %v5441_v20 = vrot.slane %v5427_v45, %v6722_v7 }
0x1e0b   :  { %v5138_v59 = vcombine.low %v4898_v35, %v5076_v31  ;;  %v5139_v16 = vcombine.high %v4898_v35, %v5076_v31  ;;  %v5961_v36 = vpop.f32.mrb[33].mxu0  ;;  %v5298_v22 = vrot.slane %v5290_v43, %v6722_v7  ;;  %v5305_v31 = vrot.slane %v5291_v14, %v6722_v7 }
0x1e0c   :  { %v5314_v43 = vrot.slane %v5306_v15, %v6722_v7  ;;  %v5402_v57 = vrot.slane %v5394_v8, %v6676_v6  ;;  %v5409_v12 = vrot.slane %v5395_v17, %v6676_v6  ;;  %v5434_v8 = vrot.slane %v5426_v24, %v6722_v7 }
0x1e0d   :  { %v5146_v11 = vrot.slane %v5138_v59, %v6676_v6  ;;  %v5153_v46 = vrot.slane %v5139_v16, %v6676_v6  ;;  %v5450_v24 = vrot.slane %v5442_v30, %v6722_v7 }
0x1e0f   :  { %v5186_v50 = vcombine.low %v5130_v18, %v5146_v11  ;;  %v5187_v33 = vcombine.high %v5130_v18, %v5146_v11  ;;  %v5202_v48 = vcombine.low %v5137_v51, %v5153_v46  ;;  %v5203_v47 = vcombine.high %v5137_v51, %v5153_v46 }
0x1e11   :  { %v8721_v61 = vrot.slane %v5186_v50, %v6722_v7  ;;  %v5201_v3 = vrot.slane %v5187_v33, %v6722_v7  ;;  %v5210_v49 = vrot.slane %v5202_v48, %v6722_v7  ;;  %v8726_v39 = vrot.slane %v5203_v47, %v6722_v7 }
0x1e12   :  { %v5081_v63 = vpop.f32.mrb[34].mxu0 }
0x1e13   :  { %v5274_v42 = vcombine.low %v4903_v34, %v5081_v63  ;;  %v5275_v2 = vcombine.high %v4903_v34, %v5081_v63  ;;  %v5964_v55 = vpop.f32.mrb[35].mxu0  ;;  %v5220_v19 = vcombine.low %v5169_v32, %v5201_v3  ;;  %v5219_v37 = vcombine.high %v8717_v0, %v8721_v61 }
0x1e14   :  { %v5222_v44 = vcombine.low %v5178_v52, %v5210_v49  ;;  %v5221_v35 = vcombine.high %v5169_v32, %v5201_v3  ;;  %v5224_v21 = vcombine.low %v5185_v28, %v8726_v39  ;;  %v5223_v23 = vcombine.high %v5178_v52, %v5210_v49 }
0x1e15   :  { %v5282_v58 = vrot.slane %v5274_v42, %v6676_v6  ;;  %v5289_v25 = vrot.slane %v5275_v2, %v6676_v6  ;;  %5503 = vrot.lane.b32.xlu1 %v5220_v19, %s6121_s19  ;;  %5499 = vrot.lane.b32.xlu0 %v5219_v37, %s6146_s3  ;;  %v5225_v41 = vcombine.high %v5185_v28, %v8726_v39  ;;  %s6150_s19 = smov 32  }
0x1e16   :  { %v5218_v38 = vcombine.low %v8717_v0, %v8721_v61 }
0x1e17   :  { %v5322_v29 = vcombine.low %v5266_v9, %v5282_v58  ;;  %v5323_v34 = vcombine.high %v5266_v9, %v5282_v58  ;;  %v5338_v40 = vcombine.low %v5273_v26, %v5289_v25  ;;  %v5339_v62 = vcombine.high %v5273_v26, %v5289_v25 }
0x1e19   :  { %v5330_v59 = vrot.slane %v5322_v29, %v6722_v7  ;;  %v5337_v16 = vrot.slane %v5323_v34, %v6722_v7  ;;  %v5346_v36 = vrot.slane %v5338_v40, %v6722_v7  ;;  %v5353_v18 = vrot.slane %v5339_v62, %v6722_v7  ;;  %5511 = vrot.lane.b32.xlu1 %v5222_v44, %s6118_s4  ;;  %s6149_s4 = smov 20  }
0x1e1a   :  { %5507 = vrot.lane.b32.xlu0 %v5221_v35, %s6145_s22 }
0x1e1b   :  { %v5354_v56 = vcombine.low %v5298_v22, %v5330_v59  ;;  %v5355_v14 = vcombine.high %v5298_v22, %v5330_v59  ;;  %v5356_v51 = vcombine.low %v5305_v31, %v5337_v16  ;;  %v5357_v11 = vcombine.high %v5305_v31, %v5337_v16 }
0x1e1c   :  { %v5086_v46 = vpop.f32.mrb[36].mxu0  ;;  %v5358_v50 = vcombine.low %v5314_v43, %v5346_v36  ;;  %v5359_v33 = vcombine.high %v5314_v43, %v5346_v36  ;;  %v5360_v48 = vcombine.low %v5321_v60, %v5353_v18  ;;  %v5361_v47 = vcombine.high %v5321_v60, %v5353_v18 }
0x1e1d   :  { %v5410_v32 = vcombine.low %v8704_v5, %v5086_v46  ;;  %v5411_v15 = vcombine.high %v8704_v5, %v5086_v46  ;;  %5519 = vrot.lane.b32.xlu1 %v5224_v21, %s6148_s8  ;;  %v5967_v3 = vpop.f32.mrb[37].mxu0 }
0x1e1e   :  { %5515 = vrot.lane.b32.xlu0 %v5223_v23, %s6149_s4 }
0x1e1f   :  { %v5418_v27 = vrot.slane %v5410_v32, %v6676_v6  ;;  %v5425_v49 = vrot.slane %v5411_v15, %v6676_v6 }
0x1e21   :  { %v5458_v5 = vcombine.low %v5402_v57, %v5418_v27  ;;  %v5459_v39 = vcombine.high %v5402_v57, %v5418_v27  ;;  %v5474_v52 = vcombine.low %v5409_v12, %v5425_v49  ;;  %v5475_v28 = vcombine.high %v5409_v12, %v5425_v49  ;;  %5527 = vrot.lane.b32.xlu1 %v5354_v56, %s6150_s19 }
0x1e22   :  { %5523 = vrot.lane.b32.xlu0 %v5225_v41, %s6151_s26 }
0x1e23   :  { %v5466_v6 = vrot.slane %v5458_v5, %v6722_v7  ;;  %v5473_v1 = vrot.slane %v5459_v39, %v6722_v7  ;;  %v5482_v17 = vrot.slane %v5474_v52, %v6722_v7  ;;  %v5489_v9 = vrot.slane %v5475_v28, %v6722_v7 }
0x1e25   :  { %5535 = vrot.lane.b32.xlu1 %v5356_v51, %s6137_s14  ;;  %v5490_v13 = vcombine.low %v5434_v8, %v5466_v6  ;;  %v5491_v45 = vcombine.high %v5434_v8, %v5466_v6  ;;  %v5492_v26 = vcombine.low %v5441_v20, %v5473_v1  ;;  %v5493_v63 = vcombine.high %v5441_v20, %v5473_v1 }
0x1e26   :  { %5531 = vrot.lane.b32.xlu0 %v5355_v14, %s6142_s18  ;;  %v5494_v42 = vcombine.low %v5450_v24, %v5482_v17  ;;  %v5495_v2 = vcombine.high %v5450_v24, %v5482_v17  ;;  %v5496_v55 = vcombine.low %v5457_v4, %v5489_v9  ;;  %v5497_v19 = vcombine.high %v5457_v4, %v5489_v9 }
0x1e29   :  { %5543 = vrot.lane.b32.xlu1 %v5358_v50, %s6135_s12 }
0x1e2a   :  { %5539 = vrot.lane.b32.xlu0 %v5357_v11, %s6141_s17 }
0x1e2d   :  { %5551 = vrot.lane.b32.xlu1 %v5360_v48, %s6133_s10 }
0x1e2e   :  { %5547 = vrot.lane.b32.xlu0 %v5359_v33, %s6140_s5 }
0x1e31   :  { %5559 = vrot.lane.b32.xlu1 %v5490_v13, %s6131_s29 }
0x1e32   :  { %5555 = vrot.lane.b32.xlu0 %v5361_v47, %s6139_s16 }
0x1e35   :  { %5567 = vrot.lane.b32.xlu1 %v5492_v26, %s6129_s27 }
0x1e36   :  { %5563 = vrot.lane.b32.xlu0 %v5491_v45, %s6138_s15 }
0x1e39   :  { %5575 = vrot.lane.b32.xlu1 %v5494_v42, %s6127_s25 }
0x1e3a   :  { %5571 = vrot.lane.b32.xlu0 %v5493_v63, %s6136_s13 }
0x1e3d   :  { %5583 = vrot.lane.b32.xlu1 %v5496_v55, %s6126_s24 }
0x1e3e   :  { %5579 = vrot.lane.b32.xlu0 %v5495_v2, %s6134_s11 }
0x1e42   :  { %5587 = vrot.lane.b32.xlu0 %v5497_v19, %s6132_s30 }
0x1e87   :  { %v5500_v7 = vpop.permute.xlu0 %5499  ;;  %v5504_v53 = vpop.permute.xlu1 %5503 }
0x1e88   :  { %v5590_v54 = vsel %vm4273_vm12, %v5218_v38, %v5500_v7  ;;  %vm5621_vm12 = vcmask 621568  }
0x1e89   :  { %v5591_v10 = vsel %vm151_vm5, %v5590_v54, %v5504_v53  ;;  %vm5607_vm5 = vcmask 392192  }
0x1e8b   :  { %v5512_v30 = vpop.permute.xlu1 %5511 }
0x1e8c   :  { %v5508_v37 = vpop.permute.xlu0 %5507 }
0x1e8d   :  { %v5592_v44 = vsel %vm57_vm2, %v5591_v10, %v5508_v37  ;;  %vm5605_vm2 = vcmask 359424  }
0x1e8e   :  { %v5593_v21 = vsel %vm4346_vm13, %v5592_v44, %v5512_v30  ;;  %vm5623_vm13 = vcmask 654336  }
0x1e8f   :  { %v5520_v35 = vpop.permute.xlu1 %5519 }
0x1e90   :  { %v5516_v23 = vpop.permute.xlu0 %5515 }
0x1e91   :  { %v5594_v58 = vsel %vm4374_vm14, %v5593_v21, %v5516_v23  ;;  %vm5625_vm14 = vcmask 687104  }
0x1e92   :  { %v5596_v41 = vsel %vm5595_vm15, %v5594_v58, %v5520_v35  ;;  %vm5627_vm15 = vcmask 719872  }
0x1e93   :  { %v5528_v25 = vpop.permute.xlu1 %5527 }
0x1e94   :  { %v5524_v29 = vpop.permute.xlu0 %5523 }
0x1e95   :  { %v5598_v0 = vsel %vm5597_vm0, %v5596_v41, %v5524_v29  ;;  %vm5629_vm0 = vcmask 752640  }
0x1e96   :  { %v5600_v38 = vsel %vm5599_vm1, %v5598_v0, %v5528_v25  ;;  %vm5631_vm1 = vcmask 785408  }
0x1e97   :  { %v5536_v61 = vpop.permute.xlu1 %5535 }
0x1e98   :  { %v5532_v34 = vpop.permute.xlu0 %5531 }
0x1e99   :  { %v5602_v40 = vsel %vm5601_vm3, %v5600_v38, %v5532_v34 }
0x1e9a   :  { %v5604_v22 = vsel %vm5603_vm4, %v5602_v40, %v5536_v61 }
0x1e9b   :  { %v5544_v62 = vpop.permute.xlu1 %5543 }
0x1e9c   :  { %v5540_v31 = vpop.permute.xlu0 %5539 }
0x1e9d   :  { %v5606_v59 = vsel %vm5605_vm2, %v5604_v22, %v5540_v31 }
0x1e9e   :  { %v5608_v36 = vsel %vm5607_vm5, %v5606_v59, %v5544_v62 }
0x1e9f   :  { %v5552_v16 = vpop.permute.xlu1 %5551 }
0x1ea0   :  { %v5548_v18 = vpop.permute.xlu0 %5547 }
0x1ea1   :  { %v5610_v43 = vsel %vm5609_vm6, %v5608_v36, %v5548_v18 }
0x1ea2   :  { %v5612_v56 = vsel %vm5611_vm7, %v5610_v43, %v5552_v16 }
0x1ea3   :  { %v5560_v60 = vpop.permute.xlu1 %5559 }
0x1ea4   :  { %v5556_v14 = vpop.permute.xlu0 %5555 }
0x1ea5   :  { %v5614_v51 = vsel %vm5613_vm8, %v5612_v56, %v5556_v14 }
0x1ea6   :  { %v5616_v46 = vsel %vm5615_vm9, %v5614_v51, %v5560_v60 }
0x1ea7   :  { %v5568_v11 = vpop.permute.xlu1 %5567 }
0x1ea8   :  { %v5564_v50 = vpop.permute.xlu0 %5563 }
0x1ea9   :  { %v5618_v33 = vsel %vm5617_vm10, %v5616_v46, %v5564_v50 }
0x1eaa   :  { %v5620_v47 = vsel %vm5619_vm11, %v5618_v33, %v5568_v11 }
0x1eab   :  { %v5576_v48 = vpop.permute.xlu1 %5575 }
0x1eac   :  { %v5572_v32 = vpop.permute.xlu0 %5571 }
0x1ead   :  { %v5622_v15 = vsel %vm5621_vm12, %v5620_v47, %v5572_v32 }
0x1eae   :  { %v5624_v3 = vsel %vm5623_vm13, %v5622_v15, %v5576_v48 }
0x1eaf   :  { %v5584_v27 = vpop.permute.xlu1 %5583 }
0x1eb0   :  { %v5580_v57 = vpop.permute.xlu0 %5579 }
0x1eb1   :  { %v5626_v12 = vsel %vm5625_vm14, %v5624_v3, %v5580_v57 }
0x1eb2   :  { %v5628_v49 = vsel %vm5627_vm15, %v5626_v12, %v5584_v27 }
0x1eb4   :  { %v5588_v5 = vpop.permute.xlu0 %5587 }
0x1eb5   :  { %v5630_v39 = vsel %vm5629_vm0, %v5628_v49, %v5588_v5 }
0x1eb6   :  { %5632 = vst.msk [vmem:[%s8831_s9] sm:$0xff] %vm5631_vm1, %v5630_v39 }
0x1eb7   :  { %5637 = vsyncpa [#allocation3], 1 }

</bundles_post_ra>
